<compile_context>
chip_gen: v7x
topology: tpu7x:2x2x1
jax: 0.10.0
libtpu: 0.0.40
codegen_flags: <defaults>
</compile_context>

<pallas_src>
import jax
import jax.numpy as jnp
from jax.experimental import pallas as pl
from jax.experimental.pallas import tpu as pltpu

LANG_DIM = 16    # stands in for 512 (language / first-stage condition dim)
TOKEN_DIM = 32   # stands in for 2048 (encoder output token dim)
HIDDEN = 64      # FiLM'd conv-stem channels
IMG_C = 3
IMG_H = 16
IMG_W = 16
BATCH = 2


# -----------------------------------------------------------------------------
# Kernel: one camera chain (stage-0 encoder -> stage-1 encoder) per grid step.
# -----------------------------------------------------------------------------
def _film_encode(img_ref, stage, w_stem, gb):
    """One FiLM encoder: 1x1-conv stem -> FiLM -> ReLU -> global avg pool.

    img_ref: (1, 2, B, P, C) VMEM ref;  stage: 0 or 1 (static)
    w_stem : (C, F);  gb: (B, 2F) = [gamma | beta]
    returns pooled features (B, F)
    """
    _, _, B, P, C = img_ref.shape
    F = w_stem.shape[-1]
    rows = []
    for b in range(B):                      # B is small & static; all ops stay 2-D
        xb = img_ref[0, stage, b]                                   # (P, C)
        # 1x1-conv stem as C VPU broadcast FMAs (no K=3 MXU matmul).
        h = xb[:, 0:1] * w_stem[0:1, :]
        for c in range(1, C):
            h = h + xb[:, c:c + 1] * w_stem[c:c + 1, :]             # (P, F)
        # FiLM + ReLU (gamma/beta broadcast over pixels).
        h = jnp.maximum(h * gb[b:b + 1, :F] + gb[b:b + 1, F:], 0.0)
        rows.append(jnp.mean(h, axis=0, keepdims=True))             # (1, F)
    return jnp.concatenate(rows, axis=0)                            # (B, F)


def fused_chain_kernel(img_ref, lang_ref, stem_ref, wgb_ref, bias_ref,
                       whead_ref, o_ref):
    # Per-chain blocks:
    #   img_ref : (1, 2, B, P, C)   [stage-0 image, stage-1 image]
    #   lang_ref: (B, DL)
    #   stem_ref: (1, 2, C, F)
    #   wgb_ref : (1, DL+DT, 2F)    rows 0:DL -> stage-0 [w_gamma|w_beta],
    #                               rows DL:  -> stage-1 [w_gamma|w_beta]
    #   bias_ref: (1, 3, 2F)        rows 0/1: stage-0/1 [b_gamma|b_beta],
    #                               row  2  : head biases (cols 0:DT / DT:2DT)
    #   whead_ref:(1, 2F, DT)       rows 0:F stage-0 head, rows F:2F stage-1 head
    #   o_ref   : (1, B, 2*DT)      cols 0:DT stage-0 token, DT:2DT stage-1 token
    B, DL = lang_ref.shape
    F = stem_ref.shape[-1]
    DT = whead_ref.shape[-1]

    lang = lang_ref[...]
    w_gb = wgb_ref[0]
    biases = bias_ref[0]
    w_head = whead_ref[0]

    # ---- stage 0: conditioned on the language embedding -----------------------
    gb0 = jnp.dot(lang, w_gb[0:DL, :],
                  preferred_element_type=jnp.float32) + biases[0:1, :]      # (B, 2F)
    pooled0 = _film_encode(img_ref, 0, stem_ref[0, 0], gb0)                 # (B, F)
    tok0 = jnp.dot(pooled0, w_head[0:F, :],
                   preferred_element_type=jnp.float32) + biases[2:3, 0:DT]  # (B, DT)

    # ---- stage 1: conditioned on the stage-0 tokens (kept on-chip) ------------
    gb1 = jnp.dot(tok0, w_gb[DL:DL + DT, :],
                  preferred_element_type=jnp.float32) + biases[1:2, :]
    pooled1 = _film_encode(img_ref, 1, stem_ref[0, 1], gb1)
    tok1 = jnp.dot(pooled1, w_head[F:2 * F, :],
                   preferred_element_type=jnp.float32) + biases[2:3, DT:2 * DT]

    o_ref[0] = jnp.concatenate([tok0, tok1], axis=1)                        # (B, 2*DT)


# -----------------------------------------------------------------------------
# Wrapper: parameter packing + fused pallas_call.
# -----------------------------------------------------------------------------
def init_film_params(key, cond_dim, c_in=IMG_C, hidden=HIDDEN, out_dim=TOKEN_DIM):
    ks = jax.random.split(key, 5)
    s = lambda fan_in: 1.0 / jnp.sqrt(jnp.float32(fan_in))
    return {
        "w_stem": jax.random.normal(ks[0], (c_in, hidden), jnp.float32) * s(c_in),
        "w_gamma": jax.random.normal(ks[1], (cond_dim, hidden), jnp.float32) * s(cond_dim),
        "b_gamma": jnp.ones((1, hidden), jnp.float32),
        "w_beta": jax.random.normal(ks[2], (cond_dim, hidden), jnp.float32) * s(cond_dim),
        "b_beta": jnp.zeros((1, hidden), jnp.float32),
        "w_head": jax.random.normal(ks[3], (hidden, out_dim), jnp.float32) * s(hidden),
        "b_head": jnp.zeros((1, out_dim), jnp.float32),
    }


def _pack_chain(enc0, enc1):
    """Pack the stage-0 / stage-1 encoders of one camera chain into 4 arrays."""
    F = enc0["w_stem"].shape[1]
    DT = enc0["w_head"].shape[1]
    assert 2 * DT <= 2 * F, "head biases must fit in the packed bias row"
    stems = jnp.stack([enc0["w_stem"], enc1["w_stem"]], axis=0)              # (2, C, F)
    w_gb = jnp.concatenate(
        [jnp.concatenate([enc0["w_gamma"], enc0["w_beta"]], axis=1),
         jnp.concatenate([enc1["w_gamma"], enc1["w_beta"]], axis=1)], axis=0)  # (DL+DT, 2F)
    b0 = jnp.concatenate([enc0["b_gamma"], enc0["b_beta"]], axis=1)          # (1, 2F)
    b1 = jnp.concatenate([enc1["b_gamma"], enc1["b_beta"]], axis=1)
    bh = jnp.zeros((1, 2 * F), jnp.float32)
    bh = bh.at[:, 0:DT].set(enc0["b_head"]).at[:, DT:2 * DT].set(enc1["b_head"])
    biases = jnp.concatenate([b0, b1, bh], axis=0)                           # (3, 2F)
    w_head = jnp.concatenate([enc0["w_head"], enc1["w_head"]], axis=0)       # (2F, DT)
    return stems, w_gb, biases, w_head


def _img_to_pixels(x_nchw):
    """NCHW -> (B, P, C) channels-last flattened pixels (f32)."""
    B, C, H, W = x_nchw.shape
    return jnp.transpose(x_nchw, (0, 2, 3, 1)).reshape(B, H * W, C).astype(jnp.float32)


def fused_res_fusion(imgs, lang, stems, w_gb, biases, w_head):
    """imgs: (2 chains, 2 stages, B, P, C) -> (2 chains, B, 2*TOKEN_DIM)."""
    n_chain, _, B, P, C = imgs.shape
    DL = lang.shape[1]
    F = stems.shape[-1]
    DT = w_head.shape[-1]
    return pl.pallas_call(
        fused_chain_kernel,
        out_shape=jax.ShapeDtypeStruct((n_chain, B, 2 * DT), jnp.float32),
        grid=(n_chain,),
        in_specs=[
            pl.BlockSpec((1, 2, B, P, C), lambda c: (c, 0, 0, 0, 0)),   # images
            pl.BlockSpec((B, DL), lambda c: (0, 0)),                    # lang (shared)
            pl.BlockSpec((1, 2, C, F), lambda c: (c, 0, 0, 0)),         # stems
            pl.BlockSpec((1, DL + DT, 2 * F), lambda c: (c, 0, 0)),     # cond weights
            pl.BlockSpec((1, 3, 2 * F), lambda c: (c, 0, 0)),           # all biases
            pl.BlockSpec((1, 2 * F, DT), lambda c: (c, 0, 0)),          # head weights
        ],
        out_specs=pl.BlockSpec((1, B, 2 * DT), lambda c: (c, 0, 0)),
        compiler_params=pltpu.CompilerParams(
            # v7x: one camera chain per TensorCore; neutral on v5e/v6e.
            dimension_semantics=("parallel",)),
    )(imgs, lang, stems, w_gb, biases, w_head)


class ResFusion:
    """Pallas port of Res_fusion (all four FiLM encoders in one fused kernel)."""

    def __init__(self, fuse_type, key):
        if fuse_type not in ("pc_cond_rgb", "rgb_cond_pc"):
            raise ValueError(f"unknown fuse_type: {fuse_type}")
        self.fuse_type = fuse_type
        k = jax.random.split(key, 4)
        if fuse_type == "pc_cond_rgb":
            self.pc_static = init_film_params(k[0], cond_dim=TOKEN_DIM)
            self.pc_gripper = init_film_params(k[1], cond_dim=TOKEN_DIM)
            self.rgb_static = init_film_params(k[2], cond_dim=LANG_DIM)
            self.rgb_gripper = init_film_params(k[3], cond_dim=LANG_DIM)
            chains = [(self.rgb_static, self.pc_static),      # static chain
                      (self.rgb_gripper, self.pc_gripper)]    # gripper chain
        else:  # rgb_cond_pc
            self.pc_static = init_film_params(k[0], cond_dim=LANG_DIM)
            self.pc_gripper = init_film_params(k[1], cond_dim=LANG_DIM)
            self.rgb_static = init_film_params(k[2], cond_dim=TOKEN_DIM)
            self.rgb_gripper = init_film_params(k[3], cond_dim=TOKEN_DIM)
            chains = [(self.pc_static, self.rgb_static),
                      (self.pc_gripper, self.rgb_gripper)]
        packs = [_pack_chain(e0, e1) for e0, e1 in chains]
        self.stems = jnp.stack([p[0] for p in packs], axis=0)     # (2, 2, C, F)
        self.w_gb = jnp.stack([p[1] for p in packs], axis=0)      # (2, DL+DT, 2F)
        self.biases = jnp.stack([p[2] for p in packs], axis=0)    # (2, 3, 2F)
        self.w_head = jnp.stack([p[3] for p in packs], axis=0)    # (2, 2F, DT)

    def __call__(self, x):
        lang = x["latent_goal"].astype(jnp.float32)
        if self.fuse_type == "pc_cond_rgb":
            stage0 = [x["rgb_static"], x["rgb_gripper"]]
            stage1 = [x["pc_static"], x["pc_gripper"]]
        else:
            stage0 = [x["pc_static"], x["pc_gripper"]]
            stage1 = [x["rgb_static"], x["rgb_gripper"]]
        imgs = jnp.stack(
            [jnp.stack([_img_to_pixels(stage0[c]), _img_to_pixels(stage1[c])], axis=0)
             for c in range(2)], axis=0)                          # (2, 2, B, P, C)

        out = fused_res_fusion(imgs, lang, self.stems, self.w_gb,
                               self.biases, self.w_head)          # (2, B, 2*DT)
        B = lang.shape[0]
        DT = self.w_head.shape[-1]
        out = jnp.transpose(out, (1, 0, 2))                       # (B, chain, 2*DT)
        if self.fuse_type == "pc_cond_rgb":
            # chain-major columns give [static, pc_static, gripper, pc_gripper]
            return out.reshape(B, 4, DT)
        # rgb_cond_pc: stack only the (stage-1) rgb tokens: [static, gripper]
        return out[:, :, DT:].reshape(B, 2, DT)


# -----------------------------------------------------------------------------
# Pure-JAX reference (for a correctness sanity check of the fused kernel).
# -----------------------------------------------------------------------------
def _film_policy_ref(x_nchw, cond, p):
    x = _img_to_pixels(x_nchw)
    h = jnp.einsum("bpc,cf->bpf", x, p["w_stem"])
    gamma = cond @ p["w_gamma"] + p["b_gamma"]
    beta = cond @ p["w_beta"] + p["b_beta"]
    h = jnp.maximum(h * gamma[:, None, :] + beta[:, None, :], 0.0)
    return jnp.mean(h, axis=1) @ p["w_head"] + p["b_head"]


def _res_fusion_ref(model, x):
    lang = x["latent_goal"].astype(jnp.float32)
    if model.fuse_type == "pc_cond_rgb":
        st = _film_policy_ref(x["rgb_static"], lang, model.rgb_static)
        gr = _film_policy_ref(x["rgb_gripper"], lang, model.rgb_gripper)
        pst = _film_policy_ref(x["pc_static"], st, model.pc_static)
        pgr = _film_policy_ref(x["pc_gripper"], gr, model.pc_gripper)
        return jnp.stack([st, pst, gr, pgr], axis=1)
    pst = _film_policy_ref(x["pc_static"], lang, model.pc_static)
    pgr = _film_policy_ref(x["pc_gripper"], lang, model.pc_gripper)
    st = _film_policy_ref(x["rgb_static"], pst, model.rgb_static)
    gr = _film_policy_ref(x["rgb_gripper"], pgr, model.rgb_gripper)
    return jnp.stack([st, gr], axis=1)


if __name__ == "__main__":
    key = jax.random.PRNGKey(0)
    k_in, k_params = jax.random.split(key)
    k_rs, k_rg, k_ps, k_pg, k_lang = jax.random.split(k_in, 5)

    # PyTorch-style NCHW image inputs + latent goal ("512" -> 16 here).
    inputs = {
        "rgb_static": jax.random.normal(k_rs, (BATCH, IMG_C, IMG_H, IMG_W), jnp.float32),
        "rgb_gripper": jax.random.normal(k_rg, (BATCH, IMG_C, IMG_H, IMG_W), jnp.float32),
        "pc_static": jax.random.normal(k_ps, (BATCH, IMG_C, IMG_H, IMG_W), jnp.float32),
        "pc_gripper": jax.random.normal(k_pg, (BATCH, IMG_C, IMG_H, IMG_W), jnp.float32),
        "latent_goal": jax.random.normal(k_lang, (BATCH, LANG_DIM), jnp.float32),
    }

    model = ResFusion("pc_cond_rgb", k_params)
    cam_features = jax.block_until_ready(model(inputs))
    assert cam_features.shape == (BATCH, 4, TOKEN_DIM), cam_features.shape

    # Sanity-check the fused kernel against the pure-JAX reference.
    ref = jax.block_until_ready(_res_fusion_ref(model, inputs))
    assert jnp.allclose(cam_features, ref, atol=1e-3, rtol=1e-3), (
        float(jnp.max(jnp.abs(cam_features - ref))))

    print("KERNEL_OK")
</pallas_src>

<mosaic_0001>
module attributes {stable_mosaic.version = 11 : i64} {
  func.func @fused_chain_kernel(%arg0: i32, %arg1: memref<1x2x2x256x3xf32, #tpu.memory_space<vmem>>, %arg2: memref<2x16xf32, #tpu.memory_space<vmem>>, %arg3: memref<1x2x3x64xf32, #tpu.memory_space<vmem>>, %arg4: memref<1x48x128xf32, #tpu.memory_space<vmem>>, %arg5: memref<1x3x128xf32, #tpu.memory_space<vmem>>, %arg6: memref<1x128x32xf32, #tpu.memory_space<vmem>>, %arg7: memref<1x2x64xf32, #tpu.memory_space<vmem>>) attributes {dimension_semantics = [#tpu.dimension_semantics<parallel>], iteration_bounds = array<i64: 2>, scalar_prefetch = 0 : i64, scratch_operands = 0 : i64, tpu.core_type = #tpu.core_type<tc>, window_params = [{transform_indices = @transform_0, window_bounds = array<i64: 1, 2, 2, 256, 3>}, {pipeline_mode = #tpu.pipeline_mode<synchronous>, transform_indices = @transform_1, window_bounds = array<i64: 2, 16>}, {transform_indices = @transform_2, window_bounds = array<i64: 1, 2, 3, 64>}, {transform_indices = @transform_3, window_bounds = array<i64: 1, 48, 128>}, {transform_indices = @transform_4, window_bounds = array<i64: 1, 3, 128>}, {transform_indices = @transform_5, window_bounds = array<i64: 1, 128, 32>}, {transform_indices = @transform_6, window_bounds = array<i64: 1, 2, 64>}]} {
    %c0 = arith.constant 0 : index
    %c0_0 = arith.constant 0 : index
    %0 = vector.load %arg2[%c0, %c0_0] : memref<2x16xf32, #tpu.memory_space<vmem>>, vector<2x16xf32>
    %c0_1 = arith.constant 0 : index
    %c0_2 = arith.constant 0 : index
    %c0_3 = arith.constant 0 : index
    %1 = vector.load %arg4[%c0_1, %c0_2, %c0_3] : memref<1x48x128xf32, #tpu.memory_space<vmem>>, vector<1x48x128xf32>
    %2 = vector.shape_cast %1 : vector<1x48x128xf32> to vector<48x128xf32>
    %c0_4 = arith.constant 0 : index
    %c0_5 = arith.constant 0 : index
    %c0_6 = arith.constant 0 : index
    %3 = vector.load %arg5[%c0_4, %c0_5, %c0_6] : memref<1x3x128xf32, #tpu.memory_space<vmem>>, vector<1x3x128xf32>
    %4 = vector.shape_cast %3 : vector<1x3x128xf32> to vector<3x128xf32>
    %c0_7 = arith.constant 0 : index
    %c0_8 = arith.constant 0 : index
    %c0_9 = arith.constant 0 : index
    %5 = vector.load %arg6[%c0_7, %c0_8, %c0_9] : memref<1x128x32xf32, #tpu.memory_space<vmem>>, vector<1x128x32xf32>
    %6 = vector.shape_cast %5 : vector<1x128x32xf32> to vector<128x32xf32>
    %7 = vector.extract_strided_slice %2 {offsets = [0, 0], sizes = [16, 128], strides = [1, 1]} : vector<48x128xf32> to vector<16x128xf32>
    %cst = arith.constant dense<0.000000e+00> : vector<2x128xf32>
    %8 = tpu.matmul %0, %7, %cst {dimension_numbers = #tpu.dot_dimension_numbers<[1], [0], [0], [1], [0, 0, 1, 1], [], []>} : vector<2x16xf32>, vector<16x128xf32>, vector<2x128xf32> -> vector<2x128xf32>
    %9 = vector.extract_strided_slice %4 {offsets = [0, 0], sizes = [1, 128], strides = [1, 1]} : vector<3x128xf32> to vector<1x128xf32>
    %10 = vector.broadcast %9 : vector<1x128xf32> to vector<2x128xf32>
    %11 = arith.addf %8, %10 : vector<2x128xf32>
    %c0_10 = arith.constant 0 : index
    %c0_11 = arith.constant 0 : index
    %c0_12 = arith.constant 0 : index
    %c0_13 = arith.constant 0 : index
    %12 = vector.load %arg3[%c0_10, %c0_11, %c0_12, %c0_13] : memref<1x2x3x64xf32, #tpu.memory_space<vmem>>, vector<1x1x3x64xf32>
    %13 = vector.shape_cast %12 : vector<1x1x3x64xf32> to vector<3x64xf32>
    %c0_14 = arith.constant 0 : index
    %c0_15 = arith.constant 0 : index
    %c0_16 = arith.constant 0 : index
    %c0_17 = arith.constant 0 : index
    %c0_18 = arith.constant 0 : index
    %14 = vector.load %arg1[%c0_14, %c0_15, %c0_16, %c0_17, %c0_18] : memref<1x2x2x256x3xf32, #tpu.memory_space<vmem>>, vector<1x1x1x256x3xf32>
    %15 = vector.shape_cast %14 : vector<1x1x1x256x3xf32> to vector<256x3xf32>
    %16 = vector.extract_strided_slice %15 {offsets = [0, 0], sizes = [256, 1], strides = [1, 1]} : vector<256x3xf32> to vector<256x1xf32>
    %17 = vector.extract_strided_slice %13 {offsets = [0, 0], sizes = [1, 64], strides = [1, 1]} : vector<3x64xf32> to vector<1x64xf32>
    %18 = vector.broadcast %16 : vector<256x1xf32> to vector<256x64xf32>
    %19 = vector.broadcast %17 : vector<1x64xf32> to vector<256x64xf32>
    %20 = arith.mulf %18, %19 : vector<256x64xf32>
    %21 = vector.extract_strided_slice %15 {offsets = [0, 1], sizes = [256, 1], strides = [1, 1]} : vector<256x3xf32> to vector<256x1xf32>
    %22 = vector.extract_strided_slice %13 {offsets = [1, 0], sizes = [1, 64], strides = [1, 1]} : vector<3x64xf32> to vector<1x64xf32>
    %23 = vector.broadcast %21 : vector<256x1xf32> to vector<256x64xf32>
    %24 = vector.broadcast %22 : vector<1x64xf32> to vector<256x64xf32>
    %25 = arith.mulf %23, %24 : vector<256x64xf32>
    %26 = arith.addf %20, %25 : vector<256x64xf32>
    %27 = vector.extract_strided_slice %15 {offsets = [0, 2], sizes = [256, 1], strides = [1, 1]} : vector<256x3xf32> to vector<256x1xf32>
    %28 = vector.extract_strided_slice %13 {offsets = [2, 0], sizes = [1, 64], strides = [1, 1]} : vector<3x64xf32> to vector<1x64xf32>
    %29 = vector.broadcast %27 : vector<256x1xf32> to vector<256x64xf32>
    %30 = vector.broadcast %28 : vector<1x64xf32> to vector<256x64xf32>
    %31 = arith.mulf %29, %30 : vector<256x64xf32>
    %32 = arith.addf %26, %31 : vector<256x64xf32>
    %33 = vector.extract_strided_slice %11 {offsets = [0, 0], sizes = [1, 64], strides = [1, 1]} : vector<2x128xf32> to vector<1x64xf32>
    %34 = vector.broadcast %33 : vector<1x64xf32> to vector<256x64xf32>
    %35 = arith.mulf %32, %34 : vector<256x64xf32>
    %36 = vector.extract_strided_slice %11 {offsets = [0, 64], sizes = [1, 64], strides = [1, 1]} : vector<2x128xf32> to vector<1x64xf32>
    %37 = vector.broadcast %36 : vector<1x64xf32> to vector<256x64xf32>
    %38 = arith.addf %35, %37 : vector<256x64xf32>
    %cst_19 = arith.constant 0.000000e+00 : f32
    %39 = vector.broadcast %cst_19 : f32 to vector<256x64xf32>
    %40 = arith.maximumf %38, %39 : vector<256x64xf32>
    %cst_20 = arith.constant dense<0.000000e+00> : vector<64xf32>
    %41 = vector.multi_reduction <add>, %40, %cst_20 [0] : vector<256x64xf32> to vector<64xf32>
    %42 = vector.shape_cast %41 : vector<64xf32> to vector<1x64xf32>
    %cst_21 = arith.constant 2.560000e+02 : f32
    %43 = vector.broadcast %cst_21 : f32 to vector<1x64xf32>
    %44 = arith.divf %42, %43 : vector<1x64xf32>
    %c0_22 = arith.constant 0 : index
    %c0_23 = arith.constant 0 : index
    %c1 = arith.constant 1 : index
    %c0_24 = arith.constant 0 : index
    %c0_25 = arith.constant 0 : index
    %45 = vector.load %arg1[%c0_22, %c0_23, %c1, %c0_24, %c0_25] : memref<1x2x2x256x3xf32, #tpu.memory_space<vmem>>, vector<1x1x1x256x3xf32>
    %46 = vector.shape_cast %45 : vector<1x1x1x256x3xf32> to vector<256x3xf32>
    %47 = vector.extract_strided_slice %46 {offsets = [0, 0], sizes = [256, 1], strides = [1, 1]} : vector<256x3xf32> to vector<256x1xf32>
    %48 = vector.extract_strided_slice %13 {offsets = [0, 0], sizes = [1, 64], strides = [1, 1]} : vector<3x64xf32> to vector<1x64xf32>
    %49 = vector.broadcast %47 : vector<256x1xf32> to vector<256x64xf32>
    %50 = vector.broadcast %48 : vector<1x64xf32> to vector<256x64xf32>
    %51 = arith.mulf %49, %50 : vector<256x64xf32>
    %52 = vector.extract_strided_slice %46 {offsets = [0, 1], sizes = [256, 1], strides = [1, 1]} : vector<256x3xf32> to vector<256x1xf32>
    %53 = vector.extract_strided_slice %13 {offsets = [1, 0], sizes = [1, 64], strides = [1, 1]} : vector<3x64xf32> to vector<1x64xf32>
    %54 = vector.broadcast %52 : vector<256x1xf32> to vector<256x64xf32>
    %55 = vector.broadcast %53 : vector<1x64xf32> to vector<256x64xf32>
    %56 = arith.mulf %54, %55 : vector<256x64xf32>
    %57 = arith.addf %51, %56 : vector<256x64xf32>
    %58 = vector.extract_strided_slice %46 {offsets = [0, 2], sizes = [256, 1], strides = [1, 1]} : vector<256x3xf32> to vector<256x1xf32>
    %59 = vector.extract_strided_slice %13 {offsets = [2, 0], sizes = [1, 64], strides = [1, 1]} : vector<3x64xf32> to vector<1x64xf32>
    %60 = vector.broadcast %58 : vector<256x1xf32> to vector<256x64xf32>
    %61 = vector.broadcast %59 : vector<1x64xf32> to vector<256x64xf32>
    %62 = arith.mulf %60, %61 : vector<256x64xf32>
    %63 = arith.addf %57, %62 : vector<256x64xf32>
    %64 = vector.extract_strided_slice %11 {offsets = [1, 0], sizes = [1, 64], strides = [1, 1]} : vector<2x128xf32> to vector<1x64xf32>
    %65 = vector.broadcast %64 : vector<1x64xf32> to vector<256x64xf32>
    %66 = arith.mulf %63, %65 : vector<256x64xf32>
    %67 = vector.extract_strided_slice %11 {offsets = [1, 64], sizes = [1, 64], strides = [1, 1]} : vector<2x128xf32> to vector<1x64xf32>
    %68 = vector.broadcast %67 : vector<1x64xf32> to vector<256x64xf32>
    %69 = arith.addf %66, %68 : vector<256x64xf32>
    %cst_26 = arith.constant 0.000000e+00 : f32
    %70 = vector.broadcast %cst_26 : f32 to vector<256x64xf32>
    %71 = arith.maximumf %69, %70 : vector<256x64xf32>
    %cst_27 = arith.constant dense<0.000000e+00> : vector<64xf32>
    %72 = vector.multi_reduction <add>, %71, %cst_27 [0] : vector<256x64xf32> to vector<64xf32>
    %73 = vector.shape_cast %72 : vector<64xf32> to vector<1x64xf32>
    %cst_28 = arith.constant 2.560000e+02 : f32
    %74 = vector.broadcast %cst_28 : f32 to vector<1x64xf32>
    %75 = arith.divf %73, %74 : vector<1x64xf32>
    %76 = tpu.concatenate %44, %75 in 0 : vector<1x64xf32>, vector<1x64xf32> -> vector<2x64xf32>
    %77 = vector.extract_strided_slice %6 {offsets = [0, 0], sizes = [64, 32], strides = [1, 1]} : vector<128x32xf32> to vector<64x32xf32>
    %cst_29 = arith.constant dense<0.000000e+00> : vector<2x32xf32>
    %78 = tpu.matmul %76, %77, %cst_29 {dimension_numbers = #tpu.dot_dimension_numbers<[1], [0], [0], [1], [0, 0, 1, 1], [], []>} : vector<2x64xf32>, vector<64x32xf32>, vector<2x32xf32> -> vector<2x32xf32>
    %79 = vector.extract_strided_slice %4 {offsets = [2, 0], sizes = [1, 32], strides = [1, 1]} : vector<3x128xf32> to vector<1x32xf32>
    %80 = vector.broadcast %79 : vector<1x32xf32> to vector<2x32xf32>
    %81 = arith.addf %78, %80 : vector<2x32xf32>
    %82 = vector.extract_strided_slice %2 {offsets = [16, 0], sizes = [32, 128], strides = [1, 1]} : vector<48x128xf32> to vector<32x128xf32>
    %cst_30 = arith.constant dense<0.000000e+00> : vector<2x128xf32>
    %83 = tpu.matmul %81, %82, %cst_30 {dimension_numbers = #tpu.dot_dimension_numbers<[1], [0], [0], [1], [0, 0, 1, 1], [], []>} : vector<2x32xf32>, vector<32x128xf32>, vector<2x128xf32> -> vector<2x128xf32>
    %84 = vector.extract_strided_slice %4 {offsets = [1, 0], sizes = [1, 128], strides = [1, 1]} : vector<3x128xf32> to vector<1x128xf32>
    %85 = vector.broadcast %84 : vector<1x128xf32> to vector<2x128xf32>
    %86 = arith.addf %83, %85 : vector<2x128xf32>
    %c0_31 = arith.constant 0 : index
    %c1_32 = arith.constant 1 : index
    %c0_33 = arith.constant 0 : index
    %c0_34 = arith.constant 0 : index
    %87 = vector.load %arg3[%c0_31, %c1_32, %c0_33, %c0_34] : memref<1x2x3x64xf32, #tpu.memory_space<vmem>>, vector<1x1x3x64xf32>
    %88 = vector.shape_cast %87 : vector<1x1x3x64xf32> to vector<3x64xf32>
    %c0_35 = arith.constant 0 : index
    %c1_36 = arith.constant 1 : index
    %c0_37 = arith.constant 0 : index
    %c0_38 = arith.constant 0 : index
    %c0_39 = arith.constant 0 : index
    %89 = vector.load %arg1[%c0_35, %c1_36, %c0_37, %c0_38, %c0_39] : memref<1x2x2x256x3xf32, #tpu.memory_space<vmem>>, vector<1x1x1x256x3xf32>
    %90 = vector.shape_cast %89 : vector<1x1x1x256x3xf32> to vector<256x3xf32>
    %91 = vector.extract_strided_slice %90 {offsets = [0, 0], sizes = [256, 1], strides = [1, 1]} : vector<256x3xf32> to vector<256x1xf32>
    %92 = vector.extract_strided_slice %88 {offsets = [0, 0], sizes = [1, 64], strides = [1, 1]} : vector<3x64xf32> to vector<1x64xf32>
    %93 = vector.broadcast %91 : vector<256x1xf32> to vector<256x64xf32>
    %94 = vector.broadcast %92 : vector<1x64xf32> to vector<256x64xf32>
    %95 = arith.mulf %93, %94 : vector<256x64xf32>
    %96 = vector.extract_strided_slice %90 {offsets = [0, 1], sizes = [256, 1], strides = [1, 1]} : vector<256x3xf32> to vector<256x1xf32>
    %97 = vector.extract_strided_slice %88 {offsets = [1, 0], sizes = [1, 64], strides = [1, 1]} : vector<3x64xf32> to vector<1x64xf32>
    %98 = vector.broadcast %96 : vector<256x1xf32> to vector<256x64xf32>
    %99 = vector.broadcast %97 : vector<1x64xf32> to vector<256x64xf32>
    %100 = arith.mulf %98, %99 : vector<256x64xf32>
    %101 = arith.addf %95, %100 : vector<256x64xf32>
    %102 = vector.extract_strided_slice %90 {offsets = [0, 2], sizes = [256, 1], strides = [1, 1]} : vector<256x3xf32> to vector<256x1xf32>
    %103 = vector.extract_strided_slice %88 {offsets = [2, 0], sizes = [1, 64], strides = [1, 1]} : vector<3x64xf32> to vector<1x64xf32>
    %104 = vector.broadcast %102 : vector<256x1xf32> to vector<256x64xf32>
    %105 = vector.broadcast %103 : vector<1x64xf32> to vector<256x64xf32>
    %106 = arith.mulf %104, %105 : vector<256x64xf32>
    %107 = arith.addf %101, %106 : vector<256x64xf32>
    %108 = vector.extract_strided_slice %86 {offsets = [0, 0], sizes = [1, 64], strides = [1, 1]} : vector<2x128xf32> to vector<1x64xf32>
    %109 = vector.broadcast %108 : vector<1x64xf32> to vector<256x64xf32>
    %110 = arith.mulf %107, %109 : vector<256x64xf32>
    %111 = vector.extract_strided_slice %86 {offsets = [0, 64], sizes = [1, 64], strides = [1, 1]} : vector<2x128xf32> to vector<1x64xf32>
    %112 = vector.broadcast %111 : vector<1x64xf32> to vector<256x64xf32>
    %113 = arith.addf %110, %112 : vector<256x64xf32>
    %cst_40 = arith.constant 0.000000e+00 : f32
    %114 = vector.broadcast %cst_40 : f32 to vector<256x64xf32>
    %115 = arith.maximumf %113, %114 : vector<256x64xf32>
    %cst_41 = arith.constant dense<0.000000e+00> : vector<64xf32>
    %116 = vector.multi_reduction <add>, %115, %cst_41 [0] : vector<256x64xf32> to vector<64xf32>
    %117 = vector.shape_cast %116 : vector<64xf32> to vector<1x64xf32>
    %cst_42 = arith.constant 2.560000e+02 : f32
    %118 = vector.broadcast %cst_42 : f32 to vector<1x64xf32>
    %119 = arith.divf %117, %118 : vector<1x64xf32>
    %c0_43 = arith.constant 0 : index
    %c1_44 = arith.constant 1 : index
    %c1_45 = arith.constant 1 : index
    %c0_46 = arith.constant 0 : index
    %c0_47 = arith.constant 0 : index
    %120 = vector.load %arg1[%c0_43, %c1_44, %c1_45, %c0_46, %c0_47] : memref<1x2x2x256x3xf32, #tpu.memory_space<vmem>>, vector<1x1x1x256x3xf32>
    %121 = vector.shape_cast %120 : vector<1x1x1x256x3xf32> to vector<256x3xf32>
    %122 = vector.extract_strided_slice %121 {offsets = [0, 0], sizes = [256, 1], strides = [1, 1]} : vector<256x3xf32> to vector<256x1xf32>
    %123 = vector.extract_strided_slice %88 {offsets = [0, 0], sizes = [1, 64], strides = [1, 1]} : vector<3x64xf32> to vector<1x64xf32>
    %124 = vector.broadcast %122 : vector<256x1xf32> to vector<256x64xf32>
    %125 = vector.broadcast %123 : vector<1x64xf32> to vector<256x64xf32>
    %126 = arith.mulf %124, %125 : vector<256x64xf32>
    %127 = vector.extract_strided_slice %121 {offsets = [0, 1], sizes = [256, 1], strides = [1, 1]} : vector<256x3xf32> to vector<256x1xf32>
    %128 = vector.extract_strided_slice %88 {offsets = [1, 0], sizes = [1, 64], strides = [1, 1]} : vector<3x64xf32> to vector<1x64xf32>
    %129 = vector.broadcast %127 : vector<256x1xf32> to vector<256x64xf32>
    %130 = vector.broadcast %128 : vector<1x64xf32> to vector<256x64xf32>
    %131 = arith.mulf %129, %130 : vector<256x64xf32>
    %132 = arith.addf %126, %131 : vector<256x64xf32>
    %133 = vector.extract_strided_slice %121 {offsets = [0, 2], sizes = [256, 1], strides = [1, 1]} : vector<256x3xf32> to vector<256x1xf32>
    %134 = vector.extract_strided_slice %88 {offsets = [2, 0], sizes = [1, 64], strides = [1, 1]} : vector<3x64xf32> to vector<1x64xf32>
    %135 = vector.broadcast %133 : vector<256x1xf32> to vector<256x64xf32>
    %136 = vector.broadcast %134 : vector<1x64xf32> to vector<256x64xf32>
    %137 = arith.mulf %135, %136 : vector<256x64xf32>
    %138 = arith.addf %132, %137 : vector<256x64xf32>
    %139 = vector.extract_strided_slice %86 {offsets = [1, 0], sizes = [1, 64], strides = [1, 1]} : vector<2x128xf32> to vector<1x64xf32>
    %140 = vector.broadcast %139 : vector<1x64xf32> to vector<256x64xf32>
    %141 = arith.mulf %138, %140 : vector<256x64xf32>
    %142 = vector.extract_strided_slice %86 {offsets = [1, 64], sizes = [1, 64], strides = [1, 1]} : vector<2x128xf32> to vector<1x64xf32>
    %143 = vector.broadcast %142 : vector<1x64xf32> to vector<256x64xf32>
    %144 = arith.addf %141, %143 : vector<256x64xf32>
    %cst_48 = arith.constant 0.000000e+00 : f32
    %145 = vector.broadcast %cst_48 : f32 to vector<256x64xf32>
    %146 = arith.maximumf %144, %145 : vector<256x64xf32>
    %cst_49 = arith.constant dense<0.000000e+00> : vector<64xf32>
    %147 = vector.multi_reduction <add>, %146, %cst_49 [0] : vector<256x64xf32> to vector<64xf32>
    %148 = vector.shape_cast %147 : vector<64xf32> to vector<1x64xf32>
    %cst_50 = arith.constant 2.560000e+02 : f32
    %149 = vector.broadcast %cst_50 : f32 to vector<1x64xf32>
    %150 = arith.divf %148, %149 : vector<1x64xf32>
    %151 = tpu.concatenate %119, %150 in 0 : vector<1x64xf32>, vector<1x64xf32> -> vector<2x64xf32>
    %152 = vector.extract_strided_slice %6 {offsets = [64, 0], sizes = [64, 32], strides = [1, 1]} : vector<128x32xf32> to vector<64x32xf32>
    %cst_51 = arith.constant dense<0.000000e+00> : vector<2x32xf32>
    %153 = tpu.matmul %151, %152, %cst_51 {dimension_numbers = #tpu.dot_dimension_numbers<[1], [0], [0], [1], [0, 0, 1, 1], [], []>} : vector<2x64xf32>, vector<64x32xf32>, vector<2x32xf32> -> vector<2x32xf32>
    %154 = vector.extract_strided_slice %4 {offsets = [2, 32], sizes = [1, 32], strides = [1, 1]} : vector<3x128xf32> to vector<1x32xf32>
    %155 = vector.broadcast %154 : vector<1x32xf32> to vector<2x32xf32>
    %156 = arith.addf %153, %155 : vector<2x32xf32>
    %157 = tpu.concatenate %81, %156 in 1 : vector<2x32xf32>, vector<2x32xf32> -> vector<2x64xf32>
    %c0_52 = arith.constant 0 : index
    %c0_53 = arith.constant 0 : index
    %c0_54 = arith.constant 0 : index
    %158 = vector.load %arg7[%c0_52, %c0_53, %c0_54] : memref<1x2x64xf32, #tpu.memory_space<vmem>>, vector<1x2x64xf32>
    %159 = vector.shape_cast %158 : vector<1x2x64xf32> to vector<2x64xf32>
    %160 = vector.shape_cast %157 : vector<2x64xf32> to vector<1x2x64xf32>
    tpu.vector_store %arg7[%c0_52, %c0_53, %c0_54], %160 {strides = array<i32>} : memref<1x2x64xf32, #tpu.memory_space<vmem>>, vector<1x2x64xf32>,
    return
  }
  func.func @transform_0(%arg0: i32) -> (i32, i32, i32, i32, i32) {
    %c0_i32 = arith.constant 0 : i32
    %c0_i32_0 = arith.constant 0 : i32
    %c0_i32_1 = arith.constant 0 : i32
    %c0_i32_2 = arith.constant 0 : i32
    %c0_i32_3 = arith.constant 0 : i32
    return %arg0, %c0_i32, %c0_i32_0, %c0_i32_1, %c0_i32_2 : i32, i32, i32, i32, i32
  }
  func.func @transform_1(%arg0: i32) -> (i32, i32) {
    %c0_i32 = arith.constant 0 : i32
    %c0_i32_0 = arith.constant 0 : i32
    %c0_i32_1 = arith.constant 0 : i32
    return %c0_i32, %c0_i32_0 : i32, i32
  }
  func.func @transform_2(%arg0: i32) -> (i32, i32, i32, i32) {
    %c0_i32 = arith.constant 0 : i32
    %c0_i32_0 = arith.constant 0 : i32
    %c0_i32_1 = arith.constant 0 : i32
    %c0_i32_2 = arith.constant 0 : i32
    return %arg0, %c0_i32, %c0_i32_0, %c0_i32_1 : i32, i32, i32, i32
  }
  func.func @transform_3(%arg0: i32) -> (i32, i32, i32) {
    %c0_i32 = arith.constant 0 : i32
    %c0_i32_0 = arith.constant 0 : i32
    %c0_i32_1 = arith.constant 0 : i32
    return %arg0, %c0_i32, %c0_i32_0 : i32, i32, i32
  }
  func.func @transform_4(%arg0: i32) -> (i32, i32, i32) {
    %c0_i32 = arith.constant 0 : i32
    %c0_i32_0 = arith.constant 0 : i32
    %c0_i32_1 = arith.constant 0 : i32
    return %arg0, %c0_i32, %c0_i32_0 : i32, i32, i32
  }
  func.func @transform_5(%arg0: i32) -> (i32, i32, i32) {
    %c0_i32 = arith.constant 0 : i32
    %c0_i32_0 = arith.constant 0 : i32
    %c0_i32_1 = arith.constant 0 : i32
    return %arg0, %c0_i32, %c0_i32_0 : i32, i32, i32
  }
  func.func @transform_6(%arg0: i32) -> (i32, i32, i32) {
    %c0_i32 = arith.constant 0 : i32
    %c0_i32_0 = arith.constant 0 : i32
    %c0_i32_1 = arith.constant 0 : i32
    return %arg0, %c0_i32, %c0_i32_0 : i32, i32, i32
  }
}

</mosaic_0001>

<bundles_post_ra>
// kernel: tpu_custom_call.1
= control target key start
LH: loop header
LB: loop body
LE: loop exit
PB: predicated region body
PF: predicated region fallthrough
CT: control target
= control target key end

     0   :  { %11 = vsyncpa [#allocation3], 0  ;;  %s7928_s0 = inlined_call_operand.vmem [shape: f32[2,2,2,256,3], index: 0, kind: input, shape index: {}]   ;;  %s7929_s1 = inlined_call_operand.vmem [shape: f32[2,16], index: 1, kind: input, shape index: {}]   ;;  %s7930_s2 = inlined_call_operand.vmem [shape: f32[2,2,3,64], index: 2, kind: input, shape index: {}]   ;;  %s7931_s3 = inlined_call_operand.vmem [shape: f32[2,48,128], index: 3, kind: input, shape index: {}]   ;;  %s7932_s4 = inlined_call_operand.vmem [shape: f32[2,3,128], index: 4, kind: input, shape index: {}]   ;;  %s7933_s5 = inlined_call_operand.vmem [shape: f32[2,128,32], index: 5, kind: input, shape index: {}]   ;;  %s7934_s6 = inlined_call_operand.hbm [shape: f32[2,2,64], index: 6, kind: output, shape index: {}]  }
   0x1   :  { %13 = vsyncpa [#allocation3 + $0x1], 0  ;;  %s4475_s21 = smov 0   ;;  %s4477_s22 = smov 0  }
   0x2   :  { %s4479_s23 = smov 0   ;;  %s4481_s24 = smov 0  }
   0x3 LB: > { %s4496_s25 = sadd.s32 4294967295, %s4428_s24   ;;  %s3952_s26 = sadd.s32 4294967294, %s4428_s24   ;;  %s4428_s24 = sphi %s4481_s24, %s8615_s24   ;;  %s4424_s23 = sphi %s4479_s23, %s8614_s23   ;;  %s4420_s22 = sphi %s4477_s22, %s8613_s22   ;;  %s4416_s21 = sphi %s4475_s21, %s8612_s21  }
   0x4   : > { %s4500_s27 = sadd.s32 1, %s4428_s24   ;;  %s177_s28 = sadd.s32 1, %s4424_s23 }
   0x5   : > { %s174_s29 = ssub.s32 %s4428_s24, %s4500_s27  ;;  %p187_p0 = scmp.ne.s32.totalorder %s4424_s23, %s4420_s22 }
   0x6   : > { %p175_p1 = scmp.eq.s32.totalorder %s174_s29, 0  ;;  %p188_p2 = scmp.eq.s32.totalorder %s4496_s25, 1 }
   0x7   : > { %p193_p3 = scmp.ne.s32.totalorder %s4420_s22, %s4416_s21  ;;  %p194_p4 = scmp.eq.s32.totalorder %s3952_s26, 1 }
   0x8   : > { %s4511_s30 = scalar_select %p175_p1, %s4424_s23, %s177_s28  }
   0x9   : > { %p4513_p5 = por %p188_p2, %p187_p0  ;;  %p4517_p6 = por %p194_p4, %p193_p3 }
   0xa   : > { %p3955_p7 = scmp.ge.s32.totalorder %s4428_s24, 1  ;;  %p254_p8 = scmp.lt.s32.totalorder %s4428_s24, 3 }
   0xc   : > { %p255_p9 = pnand %p3955_p7, %p254_p8 }
   0xe   : > { %258 = sbr.rel (%p255_p9) target bundleno = 1625 (0x659), region = 44 }
  0x15   : > { %p303_p10 = scmp.lt.s32.totalorder %s4496_s25, 1  ;;  %v7942_v0 = vmov 0   ;;  %v7936_v1 = vmov 0.0|0.0   ;;  %vm4432_vm0 = vmmov 0   ;;  %v7935_v2 = vmov 0.0   ;;  %s4067_s28 = sshll.u32 %s4496_s25, 5 }
  0x16   : > { %4238 = vset.pattern.permute.xlu1 %v7942_v0  ;;  %4237 = vset.pattern.permute.xlu0 %v7942_v0  ;;  %v327_v10 = vld [vmem:[%s7929_s1] sm:$0x3]  ;;  %vm355_vm1 = vcmask 130048   ;;  %v7940_v40 = vmov 1   ;;  %v7938_v55 = vmov 2   ;;  %vm1154_vm2 = vcmask 523264   ;;  %s7884_s13 = scalar_lea.hbm %s7934_s6, %s4067_s28 }
  0x17   : > { %s4527_s9 = scalar_select %p303_p10, %s4496_s25, 1  ;;  %4155 = vmatprep.subr.bf16.mxu1 %v7936_v1  ;;  %4103 = vmatprep.mubr.msk.f32.mxu1 %vm4432_vm0, %v7935_v2  ;;  %vm2009_vm3 = vcmask 1040384   ;;  %vm2092_vm4 = vcmask 261120   ;;  %vm3829_vm5 = vcmask 517120  }
  0x18   : > { %4170 = vmatprep.subr.bf16.mxu0 %v7936_v1  ;;  %4133 = vmatprep.mubr.msk.f32.mxu0 %vm4432_vm0, %v7935_v2 }
  0x19   : > { %s4070_s10 = sshll.u32 %s4527_s9, 10  ;;  %s4188_s11 = smul.u32 48, %s4527_s9 }
  0x1a   : > { %s4540_s14 = scalar_lea.vmem %s7928_s0, %s4070_s10  ;;  %s3962_s20 = sshll.u32 %s4527_s9, 2 }
  0x1b   : > { %v4543_v3 = vld [vmem:[%s4540_s14 + $0x10] sm:$0xff]  ;;  %v4546_v4 = vld [vmem:[%s4540_s14] sm:$0xff]  ;;  %s4551_s17 = scalar_lea.vmem %s7931_s3, %s4188_s11  ;;  %v4558_v8 = vld [vmem:[%s4540_s14 + $0x18] sm:$0xff]  ;;  %s4908_s29 = scalar_lea.vmem %s7932_s4, %s3962_s20 }
  0x1c   : > { %474 = vperm.xlu1 %4238, %v4543_v3   ;;  %464 = vperm.xlu0 %4237, %v4546_v4   ;;  %v328_v5 = vld [vmem:[%s4551_s17] sm:$0xff]  ;;  %v329_v6 = vld [vmem:[%s4551_s17 + $0x8] sm:$0xff]  ;;  %v4580_v13 = vld [vmem:[%s4540_s14 + $0x38] sm:$0xff]  ;;  %s4436_s10 = smov 64   ;;  %s4071_s11 = sshll.u32 %s4527_s9, 3 }
  0x1d   : > { %v4156_v7 = vpack.c.bf16 %v329_v6, %v328_v5  ;;  %v4561_v9 = vld [vmem:[%s4540_s14 + $0x8] sm:$0xff]  ;;  %v4572_v12 = vld [vmem:[%s4540_s14 + $0x20] sm:$0xff]  ;;  %v4583_v14 = vld [vmem:[%s4540_s14 + $0x30] sm:$0xff]  ;;  %s5275_s15 = scalar_lea.vmem %s7930_s2, %s4071_s11  ;;  %s4072_s16 = sshll.u32 %s4527_s9, 7 }
  0x1e   : > { %v4569_v11 = vld [vmem:[%s4540_s14 + $0x28] sm:$0xff]  ;;  %v4591_v16 = vld [vmem:[%s4540_s14 + $0x40] sm:$0xff]  ;;  %v4596_v17 = vld [vmem:[%s4540_s14 + $0x58] sm:$0xff]  ;;  %s5772_s20 = scalar_lea.vmem %s7933_s5, %s4072_s16  ;;  %s4437_s9 = smov 96  }
  0x1f   : > { %4157 = vmatpush3.bf16.msra.mxu1 %v4156_v7  ;;  %v4588_v15 = vld [vmem:[%s4540_s14 + $0x48] sm:$0xff]  ;;  %v4599_v18 = vld [vmem:[%s4540_s14 + $0x50] sm:$0xff]  ;;  %v4607_v20 = vld [vmem:[%s4540_s14 + $0x60] sm:$0xff]  ;;  %s4439_s16 = smov [#allocation2]  }
  0x20   : > { %479 = vperm.xlu1 %4238, %v4558_v8   ;;  %469 = vperm.xlu0 %4237, %v4561_v9   ;;  %v4604_v19 = vld [vmem:[%s4540_s14 + $0x68] sm:$0xff]  ;;  %v4612_v21 = vld [vmem:[%s4540_s14 + $0x78] sm:$0xff]  ;;  %v4615_v22 = vld [vmem:[%s4540_s14 + $0x70] sm:$0xff]  ;;  %s4370_s18 = sshll.u32 %s4439_s16, 4  ;;  %s4371_s18 = int_to_ptr.vmem [resolvable:$false] %s4370_s18 }
  0x21   : > { %4158 = vmatprep.subr.bf16.mxu1 %v7936_v1  ;;  %v4620_v23 = vld [vmem:[%s4540_s14 + $0x88] sm:$0xff]  ;;  %v4623_v24 = vld [vmem:[%s4540_s14 + $0x80] sm:$0xff]  ;;  %v4628_v25 = vld [vmem:[%s4540_s14 + $0x98] sm:$0xff]  ;;  %s4372_s19 = scalar_lea.vmem %s4371_s18, 64 }
  0x22   : > { %4104 = vmatmul.mubr.msk.f32.vlgmr.msra.gmra.mrb[0].mxu1 %vm355_vm1, %v327_v10  ;;  %v4631_v26 = vld [vmem:[%s4540_s14 + $0x90] sm:$0xff]  ;;  %v4636_v27 = vld [vmem:[%s4540_s14 + $0xa8] sm:$0xff]  ;;  %v4639_v28 = vld [vmem:[%s4540_s14 + $0xa0] sm:$0xff] }
  0x23   : > { %4122 = vmatprep.mubr.msk.f32.mxu1 %vm4432_vm0, %v7935_v2  ;;  %v4644_v29 = vld [vmem:[%s4540_s14 + $0xb8] sm:$0xff]  ;;  %v4647_v30 = vld [vmem:[%s4540_s14 + $0xb0] sm:$0xff]  ;;  %v4652_v31 = vld [vmem:[%s4540_s14 + $0xc8] sm:$0xff] }
  0x24   : > { %489 = vperm.xlu1 %4238, %v4569_v11   ;;  %484 = vperm.xlu0 %4237, %v4572_v12   ;;  %v4655_v32 = vld [vmem:[%s4540_s14 + $0xc0] sm:$0xff]  ;;  %v4660_v33 = vld [vmem:[%s4540_s14 + $0xd8] sm:$0xff]  ;;  %v4663_v34 = vld [vmem:[%s4540_s14 + $0xd0] sm:$0xff] }
  0x25   : > { %v4668_v35 = vld [vmem:[%s4540_s14 + $0xe8] sm:$0xff]  ;;  %v4671_v36 = vld [vmem:[%s4540_s14 + $0xe0] sm:$0xff]  ;;  %v4676_v37 = vld [vmem:[%s4540_s14 + $0xf8] sm:$0xff] }
  0x26   : > { %v4679_v38 = vld [vmem:[%s4540_s14 + $0xf0] sm:$0xff]  ;;  %v4684_v39 = vld [vmem:[%s4540_s14 + $0x108] sm:$0xff]  ;;  %v4690_v41 = vld [vmem:[%s4540_s14 + $0x120] sm:$0xff] }
  0x27   : > { %v4695_v42 = vld [vmem:[%s4540_s14 + $0x130] sm:$0xff]  ;;  %v4700_v43 = vld [vmem:[%s4540_s14 + $0x140] sm:$0xff] }
  0x28   : > { %499 = vperm.xlu1 %4238, %v4580_v13   ;;  %494 = vperm.xlu0 %4237, %v4583_v14   ;;  %v4705_v44 = vld [vmem:[%s4540_s14 + $0x150] sm:$0xff]  ;;  %v4710_v45 = vld [vmem:[%s4540_s14 + $0x160] sm:$0xff] }
  0x29   : > { %v4715_v46 = vld [vmem:[%s4540_s14 + $0x170] sm:$0xff]  ;;  %v4720_v47 = vld [vmem:[%s4540_s14 + $0x180] sm:$0xff] }
  0x2a   : > { %v4725_v48 = vld [vmem:[%s4540_s14 + $0x190] sm:$0xff]  ;;  %v4730_v49 = vld [vmem:[%s4540_s14 + $0x1a0] sm:$0xff] }
  0x2b   : > { %v4735_v50 = vld [vmem:[%s4540_s14 + $0x1b0] sm:$0xff]  ;;  %v4740_v51 = vld [vmem:[%s4540_s14 + $0x1c0] sm:$0xff] }
  0x2c   : > { %509 = vperm.xlu1 %4238, %v4588_v15   ;;  %504 = vperm.xlu0 %4237, %v4591_v16   ;;  %v4745_v52 = vld [vmem:[%s4540_s14 + $0x1d0] sm:$0xff]  ;;  %v4750_v53 = vld [vmem:[%s4540_s14 + $0x1e0] sm:$0xff] }
  0x2d   : > { %v4755_v54 = vld [vmem:[%s4540_s14 + $0x1f0] sm:$0xff] }
  0x2e   : > { %7997 = vst [vmem:[#allocation5_spill] sm:$0xff] %v4755_v54 }
  0x30   : > { %519 = vperm.xlu1 %4238, %v4596_v17   ;;  %514 = vperm.xlu0 %4237, %v4599_v18  }
  0x34   : > { %529 = vperm.xlu1 %4238, %v4604_v19   ;;  %524 = vperm.xlu0 %4237, %v4607_v20  }
  0x38   : > { %539 = vperm.xlu1 %4238, %v4612_v21   ;;  %534 = vperm.xlu0 %4237, %v4615_v22  }
  0x3c   : > { %549 = vperm.xlu1 %4238, %v4620_v23   ;;  %544 = vperm.xlu0 %4237, %v4623_v24  }
  0x40   : > { %559 = vperm.xlu1 %4238, %v4628_v25   ;;  %554 = vperm.xlu0 %4237, %v4631_v26  }
  0x44   : > { %569 = vperm.xlu1 %4238, %v4636_v27   ;;  %564 = vperm.xlu0 %4237, %v4639_v28  }
  0x48   : > { %579 = vperm.xlu1 %4238, %v4644_v29   ;;  %574 = vperm.xlu0 %4237, %v4647_v30  }
  0x4c   : > { %589 = vperm.xlu1 %4238, %v4652_v31   ;;  %584 = vperm.xlu0 %4237, %v4655_v32  }
  0x50   : > { %599 = vperm.xlu1 %4238, %v4660_v33   ;;  %594 = vperm.xlu0 %4237, %v4663_v34  }
  0x54   : > { %609 = vperm.xlu1 %4238, %v4668_v35   ;;  %604 = vperm.xlu0 %4237, %v4671_v36  }
  0x58   : > { %619 = vperm.xlu1 %4238, %v4676_v37   ;;  %614 = vperm.xlu0 %4237, %v4679_v38  }
  0x5c   : > { %4239 = vset.pattern.permute.xlu1 %v7940_v40  ;;  %1266 = vperm.xlu0 %4237, %v4684_v39  }
  0x5d   : > { %663 = vperm.xlu1 %4239, %v4561_v9  }
  0x60   : > { %1281 = vperm.xlu0 %4237, %v4690_v41  }
  0x61   : > { %667 = vperm.xlu1 %4239, %v4543_v3  }
  0x64   : > { %1291 = vperm.xlu0 %4237, %v4695_v42  }
  0x65   : > { %675 = vperm.xlu1 %4239, %v4572_v12  }
  0x68   : > { %1301 = vperm.xlu0 %4237, %v4700_v43  }
  0x69   : > { %683 = vperm.xlu1 %4239, %v4583_v14  }
  0x6c   : > { %1311 = vperm.xlu0 %4237, %v4705_v44  }
  0x6d   : > { %691 = vperm.xlu1 %4239, %v4591_v16  }
  0x70   : > { %1321 = vperm.xlu0 %4237, %v4710_v45  }
  0x71   : > { %699 = vperm.xlu1 %4239, %v4599_v18  }
  0x74   : > { %1331 = vperm.xlu0 %4237, %v4715_v46  }
  0x75   : > { %707 = vperm.xlu1 %4239, %v4607_v20  }
  0x78   : > { %1341 = vperm.xlu0 %4237, %v4720_v47  }
  0x79   : > { %715 = vperm.xlu1 %4239, %v4615_v22  }
  0x7c   : > { %1351 = vperm.xlu0 %4237, %v4725_v48  }
  0x7d   : > { %723 = vperm.xlu1 %4239, %v4623_v24  }
  0x80   : > { %1361 = vperm.xlu0 %4237, %v4730_v49  }
  0x81   : > { %731 = vperm.xlu1 %4239, %v4631_v26  }
  0x84   : > { %1371 = vperm.xlu0 %4237, %v4735_v50  }
  0x85   : > { %739 = vperm.xlu1 %4239, %v4639_v28  }
  0x88   : > { %1381 = vperm.xlu0 %4237, %v4740_v51  }
  0x89   : > { %747 = vperm.xlu1 %4239, %v4647_v30  }
  0x8c   : > { %1391 = vperm.xlu0 %4237, %v4745_v52  }
  0x8d   : > { %755 = vperm.xlu1 %4239, %v4655_v32  }
  0x90   : > { %1401 = vperm.xlu0 %4237, %v4750_v53  }
  0x91   : > { %763 = vperm.xlu1 %4239, %v4663_v34  }
  0x94   : > { %1411 = vperm.xlu0 %4237, %v4755_v54  }
  0x95   : > { %771 = vperm.xlu1 %4239, %v4671_v36  }
  0x98   : > { %4242 = vset.pattern.permute.xlu0 %v7938_v55 }
  0x99   : > { %779 = vperm.xlu1 %4239, %v4679_v38   ;;  %859 = vperm.xlu0 %4242, %v4561_v9  }
  0x9b   : > { %v4762_v56 = vpop.permute.xlu1 %474  ;;  %v4764_v57 = vpop.permute.xlu0 %464 }
  0x9d   : > { %4240 = vset.pattern.permute.xlu1 %v7938_v55  ;;  %871 = vperm.xlu0 %4242, %v4572_v12  }
  0x9e   : > { %855 = vperm.xlu1 %4240, %v4546_v4  }
  0x9f   : > { %v4769_v58 = vpop.permute.xlu1 %479  ;;  %v4771_v59 = vpop.permute.xlu0 %469 }
  0xa1   : > { %879 = vperm.xlu0 %4242, %v4583_v14  }
  0xa2   : > { %863 = vperm.xlu1 %4240, %v4543_v3  }
  0xa3   : > { %v4775_v60 = vpop.permute.xlu1 %489  ;;  %v4777_v61 = vpop.permute.xlu0 %484 }
  0xa5   : > { %887 = vperm.xlu0 %4242, %v4591_v16  }
  0xa6   : > { %867 = vperm.xlu1 %4240, %v4558_v8  }
  0xa7   : > { %v4781_v62 = vpop.permute.xlu1 %499  ;;  %v4783_v63 = vpop.permute.xlu0 %494 }
  0xa9   : > { %895 = vperm.xlu0 %4242, %v4599_v18  }
  0xaa   : > { %875 = vperm.xlu1 %4240, %v4569_v11  }
  0xab   : > { %v4787_v5 = vpop.permute.xlu1 %509  ;;  %v4789_v6 = vpop.permute.xlu0 %504 }
  0xad   : > { %903 = vperm.xlu0 %4242, %v4607_v20  }
  0xae   : > { %883 = vperm.xlu1 %4240, %v4580_v13  }
  0xaf   : > { %v4793_v3 = vpop.permute.xlu1 %519  ;;  %v4795_v7 = vpop.permute.xlu0 %514 }
  0xb0   : > { %7998 = vst [vmem:[#allocation6_spill] sm:$0xff] %v4795_v7 }
  0xb1   : > { %911 = vperm.xlu0 %4242, %v4615_v22  }
  0xb2   : > { %891 = vperm.xlu1 %4240, %v4588_v15  }
  0xb3   : > { %v4799_v9 = vpop.permute.xlu1 %529  ;;  %v4801_v10 = vpop.permute.xlu0 %524 }
  0xb4   : > { %7999 = vst [vmem:[#allocation7_spill] sm:$0xff] %v4799_v9  ;;  %8000 = vst [vmem:[#allocation8_spill] sm:$0xff] %v4801_v10  ;;  %v4991_v10 = vld [vmem:[%s4540_s14 + $0x1a8] sm:$0xff]  ;;  %v5000_v9 = vld [vmem:[%s4540_s14 + $0x1b8] sm:$0xff] }
  0xb5   : > { %919 = vperm.xlu0 %4242, %v4623_v24  }
  0xb6   : > { %899 = vperm.xlu1 %4240, %v4596_v17  }
  0xb7   : > { %v4805_v12 = vpop.permute.xlu1 %539  ;;  %v4807_v14 = vpop.permute.xlu0 %534 }
  0xb8   : > { %8001 = vst [vmem:[#allocation9_spill] sm:$0xff] %v4805_v12  ;;  %8002 = vst [vmem:[#allocation10_spill] sm:$0xff] %v4807_v14 }
  0xb9   : > { %927 = vperm.xlu0 %4242, %v4631_v26  }
  0xba   : > { %907 = vperm.xlu1 %4240, %v4604_v19  }
  0xbb   : > { %v4811_v16 = vpop.permute.xlu1 %549  ;;  %v4813_v18 = vpop.permute.xlu0 %544 }
  0xbc   : > { %8003 = vst [vmem:[#allocation11_spill] sm:$0xff] %v4811_v16  ;;  %8004 = vst [vmem:[#allocation12_spill] sm:$0xff] %v4813_v18  ;;  %v4929_v18 = vld [vmem:[%s4540_s14 + $0x148] sm:$0xff] }
  0xbd   : > { %935 = vperm.xlu0 %4242, %v4639_v28  }
  0xbe   : > { %915 = vperm.xlu1 %4240, %v4612_v21  }
  0xbf   : > { %v4817_v20 = vpop.permute.xlu1 %559  ;;  %v4819_v22 = vpop.permute.xlu0 %554 }
  0xc0   : > { %8005 = vst [vmem:[#allocation13_spill] sm:$0xff] %v4817_v20  ;;  %8006 = vst [vmem:[#allocation14_spill] sm:$0xff] %v4819_v22 }
  0xc1   : > { %943 = vperm.xlu0 %4242, %v4647_v30  }
  0xc2   : > { %923 = vperm.xlu1 %4240, %v4620_v23  }
  0xc3   : > { %v4823_v24 = vpop.permute.xlu1 %569  ;;  %v4825_v26 = vpop.permute.xlu0 %564 }
  0xc4   : > { %8007 = vst [vmem:[#allocation15_spill] sm:$0xff] %v4823_v24  ;;  %8008 = vst [vmem:[#allocation16_spill] sm:$0xff] %v4825_v26  ;;  %v4903_v26 = vld [vmem:[%s4540_s14 + $0x128] sm:$0xff] }
  0xc5   : > { %951 = vperm.xlu0 %4242, %v4655_v32  }
  0xc6   : > { %931 = vperm.xlu1 %4240, %v4628_v25  }
  0xc7   : > { %v4829_v2 = vpop.permute.xlu1 %579  ;;  %v4831_v28 = vpop.permute.xlu0 %574 }
  0xc8   : > { %8009 = vst [vmem:[#allocation17_spill] sm:$0xff] %v4829_v2  ;;  %8010 = vst [vmem:[#allocation18_spill] sm:$0xff] %v4831_v28  ;;  %v4892_v28 = vld [vmem:[%s4540_s14 + $0x118] sm:$0xff] }
  0xc9   : > { %959 = vperm.xlu0 %4242, %v4663_v34  }
  0xca   : > { %939 = vperm.xlu1 %4240, %v4636_v27  }
  0xcb   : > { %v4835_v1 = vpop.permute.xlu1 %589  ;;  %v4837_v30 = vpop.permute.xlu0 %584 }
  0xcc   : > { %8011 = vst [vmem:[#allocation19_spill] sm:$0xff] %v4835_v1  ;;  %8012 = vst [vmem:[#allocation20_spill] sm:$0xff] %v4837_v30  ;;  %v4883_v30 = vld [vmem:[%s4540_s14 + $0x110] sm:$0xff]  ;;  %v351_v1 = vlaneseq }
  0xcd   : > { %967 = vperm.xlu0 %4242, %v4671_v36  }
  0xce   : > { %947 = vperm.xlu1 %4240, %v4644_v29  }
  0xcf   : > { %v4841_v55 = vpop.permute.xlu1 %599  ;;  %v4843_v32 = vpop.permute.xlu0 %594 }
  0xd0   : > { %8013 = vst [vmem:[#allocation21_spill] sm:$0xff] %v4841_v55  ;;  %8014 = vst [vmem:[#allocation22_spill] sm:$0xff] %v4843_v32  ;;  %v4875_v32 = vld [vmem:[%s4540_s14 + $0x168] sm:$0xff] }
  0xd1   : > { %975 = vperm.xlu0 %4242, %v4679_v38  }
  0xd2   : > { %955 = vperm.xlu1 %4240, %v4652_v31  }
  0xd3   : > { %v4847_v34 = vpop.permute.xlu1 %609  ;;  %v4849_v40 = vpop.permute.xlu0 %604 }
  0xd4   : > { %8015 = vst [vmem:[#allocation23_spill] sm:$0xff] %v4847_v34  ;;  %8016 = vst [vmem:[#allocation24_spill] sm:$0xff] %v4849_v40  ;;  %v8022_v34 = vmov 0  }
  0xd5   : > { %1648 = vperm.xlu0 %4242, %v4684_v39  }
  0xd6   : > { %963 = vperm.xlu1 %4240, %v4660_v33  }
  0xd7   : > { %v4853_v36 = vpop.permute.xlu1 %619  ;;  %v4855_v0 = vpop.permute.xlu0 %614 }
  0xd8   : > { %8017 = vst [vmem:[#allocation25_spill] sm:$0xff] %v4853_v36  ;;  %8018 = vst [vmem:[#allocation26_spill] sm:$0xff] %v4855_v0  ;;  %v4870_v0 = vld [vmem:[%s4540_s14 + $0x100] sm:$0xff] }
  0xd9   : > { %1660 = vperm.xlu0 %4242, %v4690_v41  }
  0xda   : > { %971 = vperm.xlu1 %4240, %v4668_v35  }
  0xdb   : > { %v4859_v38 = vpop.permute.xlu0 %1266 }
  0xdc   : > { %8019 = vst [vmem:[#allocation27_spill] sm:$0xff] %v4859_v38  ;;  %v4861_v54 = vpop.permute.xlu1 %663 }
  0xdd   : > { %1668 = vperm.xlu0 %4242, %v4695_v42  }
  0xde   : > { %979 = vperm.xlu1 %4240, %v4676_v37  }
  0xdf   : > { %v4865_v40 = vpop.permute.xlu0 %1281 }
  0xe0   : > { %8020 = vst [vmem:[#allocation28_spill] sm:$0xff] %v4865_v40  ;;  %v4867_v36 = vpop.permute.xlu1 %667 }
  0xe1   : > { %8021 = vst [vmem:[#allocation29_spill] sm:$0xff] %v4867_v36  ;;  %1684 = vperm.xlu0 %4242, %v4705_v44  }
  0xe2   : > { %4241 = vset.pattern.permute.xlu1 %v8022_v34 }
  0xe3   : > { %1261 = vperm.xlu1 %4241, %v4870_v0   ;;  %v4878_v38 = vpop.permute.xlu0 %1291 }
  0xe4   : > { %8023 = vst [vmem:[#allocation30_spill] sm:$0xff] %v4878_v38  ;;  %v4880_v55 = vpop.permute.xlu1 %675 }
  0xe5   : > { %8024 = vst [vmem:[#allocation31_spill] sm:$0xff] %v4880_v55  ;;  %1696 = vperm.xlu0 %4242, %v4875_v32   ;;  %v4898_v55 = vshrl.u32 %v351_v1, 7 }
  0xe7   : > { %1271 = vperm.xlu1 %4241, %v4883_v30   ;;  %v4887_v40 = vpop.permute.xlu0 %1301  ;;  %v4915_v24 = vsub.s32 0, %v4898_v55 }
  0xe8   : > { %8025 = vst [vmem:[#allocation32_spill] sm:$0xff] %v4887_v40  ;;  %v4889_v34 = vpop.permute.xlu1 %683 }
  0xe9   : > { %8026 = vst [vmem:[#allocation33_spill] sm:$0xff] %v4889_v34  ;;  %v334_v34 = vld [vmem:[%s4908_s29] sm:$0x7]  ;;  %8030 = vst [vmem:[#allocation37_spill] sm:$0xff] %v4915_v24 }
  0xeb   : > { %1276 = vperm.xlu1 %4241, %v4892_v28   ;;  %v4896_v38 = vpop.permute.xlu0 %1311 }
  0xec   : > { %8027 = vst [vmem:[#allocation34_spill] sm:$0xff] %v4896_v38  ;;  %v4900_v2 = vpop.permute.xlu1 %691  ;;  %v4920_v38 = vld [vmem:[%s4540_s14 + $0x138] sm:$0xff] }
  0xed   : > { %8028 = vst [vmem:[#allocation35_spill] sm:$0xff] %v4900_v2  ;;  %v354_v2 = vrot.slane %v334_v34, %v4915_v24 }
  0xef   : > { %1286 = vperm.xlu1 %4241, %v4903_v26   ;;  %v4911_v40 = vpop.permute.xlu0 %1321 }
  0xf0   : > { %8029 = vst [vmem:[#allocation36_spill] sm:$0xff] %v4911_v40  ;;  %v4917_v1 = vpop.permute.xlu1 %699 }
  0xf1   : > { %8031 = vst [vmem:[#allocation38_spill] sm:$0xff] %v4917_v1  ;;  %v4935_v1 = vsub.s32 1, %v4898_v55 }
  0xf3   : > { %1296 = vperm.xlu1 %4241, %v4920_v38   ;;  %v4924_v22 = vpop.permute.xlu0 %1331  ;;  %8035 = vst [vmem:[#allocation42_spill] sm:$0xff] %v4935_v1 }
  0xf4   : > { %8032 = vst [vmem:[#allocation39_spill] sm:$0xff] %v4924_v22  ;;  %v4926_v20 = vpop.permute.xlu1 %707  ;;  %v4943_v22 = vld [vmem:[%s4540_s14 + $0x158] sm:$0xff] }
  0xf5   : > { %8033 = vst [vmem:[#allocation40_spill] sm:$0xff] %v4926_v20  ;;  %v425_v40 = vpop.f32.mrb[0].mxu1 }
  0xf6   : > { %v426_v36 = vadd.f32 %v425_v40, %v354_v2  ;;  %v4105_v16 = vpop.f32.mrb[1].mxu1 }
  0xf7   : > { %1306 = vperm.xlu1 %4241, %v4929_v18   ;;  %v4932_v14 = vpop.permute.xlu0 %1341 }
  0xf8   : > { %8034 = vst [vmem:[#allocation41_spill] sm:$0xff] %v4932_v14  ;;  %v4938_v34 = vrot.slane %v426_v36, %v4915_v24  ;;  %v4940_v12 = vpop.permute.xlu1 %715  ;;  %v4946_v20 = vrot.slane %v426_v36, %v4935_v1  ;;  %v4963_v14 = vld [vmem:[%s4540_s14 + $0x178] sm:$0xff] }
  0xf9   : > { %8037 = vst [vmem:[#allocation44_spill] sm:$0xff] %v4940_v12 }
  0xfa   : > { %8036 = vst [vmem:[#allocation43_spill] sm:$0xff] %v4938_v34  ;;  %8038 = vst [vmem:[#allocation45_spill] sm:$0xff] %v4946_v20  ;;  %1087 = vrot.lane.b32.xlu0 %v4938_v34, %s4436_s10  ;;  %v8047_v34 = vmov 1  }
  0xfb   : > { %1316 = vperm.xlu1 %4241, %v4943_v22   ;;  %v4951_v2 = vpop.permute.xlu0 %1351 }
  0xfc   : > { %8039 = vst [vmem:[#allocation46_spill] sm:$0xff] %v4951_v2  ;;  %v4953_v40 = vpop.permute.xlu1 %723  ;;  %v4970_v2 = vld [vmem:[%s4540_s14 + $0x198] sm:$0xff] }
  0xfd   : > { %8040 = vst [vmem:[#allocation47_spill] sm:$0xff] %v4953_v40 }
  0xfe   : > { %1872 = vrot.lane.b32.xlu0 %v4946_v20, %s4436_s10  ;;  %v4975_v20 = vld [vmem:[%s4540_s14 + $0x188] sm:$0xff] }
  0xff   : > { %1326 = vperm.xlu1 %4241, %v4875_v32   ;;  %v4958_v16 = vpop.permute.xlu0 %1361 }
 0x100   : > { %8041 = vst [vmem:[#allocation48_spill] sm:$0xff] %v4958_v16  ;;  %v4960_v36 = vpop.permute.xlu1 %731 }
 0x101   : > { %8042 = vst [vmem:[#allocation49_spill] sm:$0xff] %v4960_v36 }
 0x102   : > { %1708 = vperm.xlu0 %4242, %v4720_v47  }
 0x103   : > { %1336 = vperm.xlu1 %4241, %v4963_v14   ;;  %v4967_v12 = vpop.permute.xlu0 %1371 }
 0x104   : > { %8043 = vst [vmem:[#allocation50_spill] sm:$0xff] %v4967_v12  ;;  %v4972_v40 = vpop.permute.xlu1 %739 }
 0x105   : > { %8044 = vst [vmem:[#allocation51_spill] sm:$0xff] %v4972_v40 }
 0x106   : > { %1720 = vperm.xlu0 %4242, %v4970_v2  }
 0x107   : > { %1346 = vperm.xlu1 %4241, %v4975_v20   ;;  %v4979_v16 = vpop.permute.xlu0 %1381 }
 0x108   : > { %8045 = vst [vmem:[#allocation52_spill] sm:$0xff] %v4979_v16  ;;  %v4981_v36 = vpop.permute.xlu1 %747 }
 0x109   : > { %8046 = vst [vmem:[#allocation53_spill] sm:$0xff] %v4981_v36 }
 0x10a   : > { %4252 = vset.pattern.permute.xlu0 %v8047_v34 }
 0x10b   : > { %1356 = vperm.xlu1 %4241, %v4970_v2   ;;  %659 = vperm.xlu0 %4252, %v4546_v4   ;;  %v4986_v12 = vpop.permute.xlu0 %1391 }
 0x10c   : > { %8048 = vst [vmem:[#allocation54_spill] sm:$0xff] %v4986_v12  ;;  %v4988_v40 = vpop.permute.xlu1 %755 }
 0x10d   : > { %8049 = vst [vmem:[#allocation55_spill] sm:$0xff] %v4988_v40  ;;  %v5009_v40 = vld [vmem:[%s4540_s14 + $0x1c8] sm:$0xff] }
 0x10f   : > { %1366 = vperm.xlu1 %4241, %v4991_v10   ;;  %671 = vperm.xlu0 %4252, %v4558_v8   ;;  %v4995_v16 = vpop.permute.xlu0 %1401 }
 0x110   : > { %8050 = vst [vmem:[#allocation56_spill] sm:$0xff] %v4995_v16  ;;  %v4997_v36 = vpop.permute.xlu1 %763 }
 0x111   : > { %8051 = vst [vmem:[#allocation57_spill] sm:$0xff] %v4997_v36  ;;  %v5018_v36 = vld [vmem:[%s4540_s14 + $0x1d8] sm:$0xff] }
 0x113   : > { %1376 = vperm.xlu1 %4241, %v5000_v9   ;;  %679 = vperm.xlu0 %4252, %v4569_v11   ;;  %v5004_v4 = vpop.permute.xlu0 %1411 }
 0x114   : > { %8052 = vst [vmem:[#allocation58_spill] sm:$0xff] %v5004_v4  ;;  %v5006_v12 = vpop.permute.xlu1 %771  ;;  %v5025_v4 = vld [vmem:[%s4540_s14 + $0x1e8] sm:$0xff] }
 0x115   : > { %8053 = vst [vmem:[#allocation59_spill] sm:$0xff] %v5006_v12  ;;  %8056 = vst [vmem:[#allocation62_spill] sm:$0xff] %v5025_v4 }
 0x117   : > { %1386 = vperm.xlu1 %4241, %v5009_v40   ;;  %687 = vperm.xlu0 %4252, %v4580_v13  }
 0x118   : > { %v5013_v8 = vpop.permute.xlu1 %779  ;;  %v5015_v16 = vpop.permute.xlu0 %859 }
 0x119   : > { %8054 = vst [vmem:[#allocation60_spill] sm:$0xff] %v5013_v8  ;;  %v5034_v8 = vld [vmem:[%s4540_s14 + $0x1f8] sm:$0xff] }
 0x11b   : > { %1396 = vperm.xlu1 %4241, %v5018_v36   ;;  %695 = vperm.xlu0 %4252, %v4588_v15  }
 0x11c   : > { %v5022_v11 = vpop.permute.xlu0 %871 }
 0x11d   : > { %8055 = vst [vmem:[#allocation61_spill] sm:$0xff] %v5022_v11  ;;  %v5027_v12 = vpop.permute.xlu1 %855 }
 0x11f   : > { %1406 = vperm.xlu1 %4241, %v5025_v4   ;;  %703 = vperm.xlu0 %4252, %v4596_v17  }
 0x120   : > { %v5031_v13 = vpop.permute.xlu0 %879 }
 0x121   : > { %8057 = vst [vmem:[#allocation63_spill] sm:$0xff] %v5031_v13  ;;  %v5036_v7 = vpop.permute.xlu1 %863 }
 0x123   : > { %1416 = vperm.xlu1 %4241, %v5034_v8   ;;  %711 = vperm.xlu0 %4252, %v4604_v19  }
 0x124   : > { %v5040_v15 = vpop.permute.xlu0 %887 }
 0x125   : > { %8058 = vst [vmem:[#allocation64_spill] sm:$0xff] %v5040_v15  ;;  %v5042_v11 = vpop.permute.xlu1 %867 }
 0x127   : > { %4243 = vset.pattern.permute.xlu1 %v8047_v34  ;;  %719 = vperm.xlu0 %4252, %v4612_v21  }
 0x128   : > { %1456 = vperm.xlu1 %4243, %v4684_v39   ;;  %v5047_v17 = vpop.permute.xlu0 %895 }
 0x129   : > { %v5049_v13 = vpop.permute.xlu1 %875 }
 0x12b   : > { %727 = vperm.xlu0 %4252, %v4620_v23  }
 0x12c   : > { %1460 = vperm.xlu1 %4243, %v4883_v30   ;;  %v5053_v4 = vpop.permute.xlu0 %903 }
 0x12d   : > { %8059 = vst [vmem:[#allocation65_spill] sm:$0xff] %v5053_v4  ;;  %v5055_v19 = vpop.permute.xlu1 %883 }
 0x12f   : > { %735 = vperm.xlu0 %4252, %v4628_v25  }
 0x130   : > { %1468 = vperm.xlu1 %4243, %v4690_v41   ;;  %v5059_v15 = vpop.permute.xlu0 %911  ;;  %v8063_v41 = vmov 2  }
 0x131   : > { %v5061_v21 = vpop.permute.xlu1 %891 }
 0x132   : > { %8060 = vst [vmem:[#allocation66_spill] sm:$0xff] %v5061_v21 }
 0x133   : > { %743 = vperm.xlu0 %4252, %v4636_v27  }
 0x134   : > { %1476 = vperm.xlu1 %4243, %v4695_v42   ;;  %v5065_v39 = vpop.permute.xlu0 %919 }
 0x135   : > { %v5067_v23 = vpop.permute.xlu1 %899 }
 0x136   : > { %8061 = vst [vmem:[#allocation67_spill] sm:$0xff] %v5067_v23 }
 0x137   : > { %751 = vperm.xlu0 %4252, %v4644_v29  }
 0x138   : > { %1484 = vperm.xlu1 %4243, %v4700_v43   ;;  %v5071_v4 = vpop.permute.xlu0 %927 }
 0x139   : > { %v5073_v25 = vpop.permute.xlu1 %907 }
 0x13a   : > { %8062 = vst [vmem:[#allocation68_spill] sm:$0xff] %v5073_v25 }
 0x13b   : > { %759 = vperm.xlu0 %4252, %v4652_v31  }
 0x13c   : > { %4244 = vset.pattern.permute.xlu1 %v8063_v41  ;;  %v5077_v21 = vpop.permute.xlu0 %935 }
 0x13d   : > { %1644 = vperm.xlu1 %4244, %v4870_v0   ;;  %v5080_v27 = vpop.permute.xlu1 %915 }
 0x13e   : > { %8064 = vst [vmem:[#allocation69_spill] sm:$0xff] %v5080_v27  ;;  %v8177_v27 = vld [vmem:[#allocation38_spill] sm:$0xff] }
 0x13f   : > { %767 = vperm.xlu0 %4252, %v4660_v33  }
 0x140   : > { %v5083_v42 = vpop.permute.xlu0 %943 }
 0x141   : > { %1652 = vperm.xlu1 %4244, %v4883_v30   ;;  %v5086_v29 = vpop.permute.xlu1 %923 }
 0x142   : > { %8065 = vst [vmem:[#allocation70_spill] sm:$0xff] %v5086_v29  ;;  %v8170_v29 = vld [vmem:[#allocation61_spill] sm:$0xff] }
 0x143   : > { %775 = vperm.xlu0 %4252, %v4668_v35  }
 0x144   : > { %v5089_v25 = vpop.permute.xlu0 %951 }
 0x145   : > { %1656 = vperm.xlu1 %4244, %v4892_v28   ;;  %v5092_v31 = vpop.permute.xlu1 %931 }
 0x146   : > { %8066 = vst [vmem:[#allocation71_spill] sm:$0xff] %v5092_v31 }
 0x147   : > { %783 = vperm.xlu0 %4252, %v4676_v37  }
 0x148   : > { %v5095_v23 = vpop.permute.xlu0 %959 }
 0x149   : > { %1664 = vperm.xlu1 %4244, %v4903_v26   ;;  %v5098_v33 = vpop.permute.xlu1 %939 }
 0x14a   : > { %8067 = vst [vmem:[#allocation72_spill] sm:$0xff] %v5098_v33 }
 0x14b   : > { %1452 = vperm.xlu0 %4252, %v4870_v0  }
 0x14c   : > { %v5104_v35 = vpop.permute.xlu0 %967 }
 0x14d   : > { %1672 = vperm.xlu1 %4244, %v4920_v38   ;;  %v5102_v30 = vpop.permute.xlu1 %947 }
 0x14e   : > { %8068 = vst [vmem:[#allocation73_spill] sm:$0xff] %v5102_v30 }
 0x14f   : > { %1464 = vperm.xlu0 %4252, %v4892_v28  }
 0x150   : > { %v5111_v37 = vpop.permute.xlu0 %975 }
 0x151   : > { %1676 = vperm.xlu1 %4244, %v4700_v43   ;;  %v5108_v31 = vpop.permute.xlu1 %955 }
 0x152   : > { %8069 = vst [vmem:[#allocation74_spill] sm:$0xff] %v5108_v31 }
 0x153   : > { %1472 = vperm.xlu0 %4252, %v4903_v26  }
 0x154   : > { %v5117_v0 = vpop.permute.xlu0 %1648 }
 0x155   : > { %1680 = vperm.xlu1 %4244, %v4929_v18   ;;  %v5114_v33 = vpop.permute.xlu1 %963  ;;  %8071 = vst [vmem:[#allocation76_spill] sm:$0xff] %v5117_v0 }
 0x156   : > { %8070 = vst [vmem:[#allocation75_spill] sm:$0xff] %v5114_v33 }
 0x157   : > { %1480 = vperm.xlu0 %4252, %v4920_v38  }
 0x158   : > { %v5127_v26 = vpop.permute.xlu0 %1660 }
 0x159   : > { %4245 = vset.pattern.permute.xlu1 %v8047_v34  ;;  %v5120_v30 = vpop.permute.xlu1 %971  ;;  %8074 = vst [vmem:[#allocation79_spill] sm:$0xff] %v5127_v26 }
 0x15a   : > { %8072 = vst [vmem:[#allocation77_spill] sm:$0xff] %v5120_v30  ;;  %1496 = vperm.xlu1 %4245, %v4943_v22  }
 0x15b   : > { %1488 = vperm.xlu0 %4252, %v4929_v18  }
 0x15c   : > { %v5135_v38 = vpop.permute.xlu0 %1668 }
 0x15d   : > { %v5124_v43 = vpop.permute.xlu1 %979  ;;  %8076 = vst [vmem:[#allocation81_spill] sm:$0xff] %v5135_v38  ;;  %v5281_v38 = vld [vmem:[%s4540_s14 + $0x2a0] sm:$0xff] }
 0x15e   : > { %8073 = vst [vmem:[#allocation78_spill] sm:$0xff] %v5124_v43  ;;  %1500 = vperm.xlu1 %4245, %v4710_v45   ;;  %8110 = vst [vmem:[#allocation115_spill] sm:$0xff] %v5281_v38 }
 0x15f   : > { %1492 = vperm.xlu0 %4252, %v4705_v44  }
 0x160   : > { %v5143_v43 = vpop.permute.xlu0 %1684 }
 0x161   : > { %8079 = vst [vmem:[#allocation84_spill] sm:$0xff] %v5143_v43  ;;  %v5257_v43 = vld [vmem:[%s4540_s14 + $0x280] sm:$0xff] }
 0x162   : > { %4246 = vset.pattern.permute.xlu1 %v8063_v41  ;;  %v5131_v28 = vpop.permute.xlu1 %1261  ;;  %8104 = vst [vmem:[#allocation109_spill] sm:$0xff] %v5257_v43 }
 0x163   : > { %8075 = vst [vmem:[#allocation80_spill] sm:$0xff] %v5131_v28  ;;  %1688 = vperm.xlu1 %4246, %v4943_v22   ;;  %1504 = vperm.xlu0 %4252, %v4875_v32  }
 0x164   : > { %v5152_v22 = vpop.permute.xlu0 %1696 }
 0x165   : > { %8081 = vst [vmem:[#allocation86_spill] sm:$0xff] %v5152_v22  ;;  %v5240_v22 = vld [vmem:[%s4540_s14 + $0x260] sm:$0xff] }
 0x166   : > { %v5137_v30 = vpop.permute.xlu1 %1271  ;;  %8100 = vst [vmem:[#allocation105_spill] sm:$0xff] %v5240_v22 }
 0x167   : > { %8077 = vst [vmem:[#allocation82_spill] sm:$0xff] %v5137_v30  ;;  %1692 = vperm.xlu1 %4246, %v4710_v45   ;;  %1516 = vperm.xlu0 %4252, %v4720_v47  }
 0x16a   : > { %v5141_v18 = vpop.permute.xlu1 %1276 }
 0x16b   : > { %8078 = vst [vmem:[#allocation83_spill] sm:$0xff] %v5141_v18  ;;  %4247 = vset.pattern.permute.xlu1 %v8047_v34  ;;  %1528 = vperm.xlu0 %4252, %v4970_v2   ;;  %v5231_v18 = vld [vmem:[%s4540_s14 + $0x250] sm:$0xff] }
 0x16c   : > { %1508 = vperm.xlu1 %4247, %v4715_v46   ;;  %v5161_v32 = vpop.permute.xlu0 %1087  ;;  %8098 = vst [vmem:[#allocation103_spill] sm:$0xff] %v5231_v18 }
 0x16e   : > { %v5148_v44 = vpop.permute.xlu1 %1286 }
 0x16f   : > { %8080 = vst [vmem:[#allocation85_spill] sm:$0xff] %v5148_v44  ;;  %1540 = vperm.xlu0 %4252, %v4735_v50  }
 0x170   : > { %1512 = vperm.xlu1 %4247, %v4963_v14   ;;  %v5168_v44 = vpop.permute.xlu0 %1872 }
 0x171   : > { %8085 = vst [vmem:[#allocation90_spill] sm:$0xff] %v5168_v44  ;;  %v5221_v44 = vld [vmem:[%s4540_s14 + $0x240] sm:$0xff] }
 0x172   : > { %v5154_v45 = vpop.permute.xlu1 %1296  ;;  %8096 = vst [vmem:[#allocation101_spill] sm:$0xff] %v5221_v44 }
 0x173   : > { %8082 = vst [vmem:[#allocation87_spill] sm:$0xff] %v5154_v45  ;;  %1552 = vperm.xlu0 %4252, %v5009_v40  }
 0x174   : > { %4248 = vset.pattern.permute.xlu1 %v8063_v41 }
 0x175   : > { %1700 = vperm.xlu1 %4248, %v4715_v46  }
 0x176   : > { %v5159_v47 = vpop.permute.xlu1 %1306 }
 0x177   : > { %8083 = vst [vmem:[#allocation88_spill] sm:$0xff] %v5159_v47  ;;  %1564 = vperm.xlu0 %4252, %v4750_v53  }
 0x179   : > { %1704 = vperm.xlu1 %4248, %v4963_v14  }
 0x17a   : > { %v5165_v2 = vpop.permute.xlu1 %1316 }
 0x17b   : > { %8084 = vst [vmem:[#allocation89_spill] sm:$0xff] %v5165_v2  ;;  %4258 = vset.pattern.permute.xlu0 %v8063_v41 }
 0x17c   : > { %1732 = vperm.xlu0 %4258, %v4735_v50  }
 0x17d   : > { %4249 = vset.pattern.permute.xlu1 %v8047_v34 }
 0x17e   : > { %1520 = vperm.xlu1 %4249, %v4975_v20   ;;  %v5173_v46 = vpop.permute.xlu1 %1326 }
 0x17f   : > { %8086 = vst [vmem:[#allocation91_spill] sm:$0xff] %v5173_v46  ;;  %v5193_v46 = vld [vmem:[%s4540_s14 + $0x208] sm:$0xff] }
 0x180   : > { %1744 = vperm.xlu0 %4258, %v5009_v40  }
 0x181   : > { %v5176_v47 = vpop.permute.xlu0 %1708 }
 0x182   : > { %8087 = vst [vmem:[#allocation92_spill] sm:$0xff] %v5176_v47  ;;  %1524 = vperm.xlu1 %4249, %v4725_v48   ;;  %v5179_v14 = vpop.permute.xlu1 %1336 }
 0x183   : > { %8088 = vst [vmem:[#allocation93_spill] sm:$0xff] %v5179_v14 }
 0x184   : > { %1756 = vperm.xlu0 %4258, %v4750_v53  }
 0x185   : > { %v5182_v2 = vpop.permute.xlu0 %1720 }
 0x186   : > { %8089 = vst [vmem:[#allocation94_spill] sm:$0xff] %v5182_v2  ;;  %4250 = vset.pattern.permute.xlu1 %v8063_v41  ;;  %v5185_v50 = vpop.permute.xlu1 %1346 }
 0x187   : > { %8090 = vst [vmem:[#allocation95_spill] sm:$0xff] %v5185_v50  ;;  %1712 = vperm.xlu1 %4250, %v4975_v20   ;;  %v5202_v20 = vld [vmem:[%s4540_s14 + $0x220] sm:$0xff] }
 0x188   : > { %4261 = vset.pattern.permute.xlu0 %v8047_v34 }
 0x189   : > { %1576 = vperm.xlu0 %4261, %v5034_v8  }
 0x18a   : > { %v5190_v40 = vpop.permute.xlu1 %1356  ;;  %v660_v47 = vpop.permute.xlu0 %659 }
 0x18b   : > { %8091 = vst [vmem:[#allocation96_spill] sm:$0xff] %v5190_v40  ;;  %1716 = vperm.xlu1 %4250, %v4725_v48   ;;  %v5212_v48 = vld [vmem:[%s4540_s14 + $0x230] sm:$0xff] }
 0x18c   : > { %8094 = vst [vmem:[#allocation99_spill] sm:$0xff] %v5212_v48 }
 0x18d   : > { %2402 = vperm.xlu0 %4261, %v5193_v46  }
 0x18e   : > { %v5197_v53 = vpop.permute.xlu1 %1366  ;;  %v5199_v50 = vpop.permute.xlu0 %671 }
 0x18f   : > { %8092 = vst [vmem:[#allocation97_spill] sm:$0xff] %v5197_v53  ;;  %4251 = vset.pattern.permute.xlu1 %v8047_v34 }
 0x190   : > { %1532 = vperm.xlu1 %4251, %v4730_v49  }
 0x191   : > { %2414 = vperm.xlu0 %4261, %v5202_v20  }
 0x192   : > { %v5207_v40 = vpop.permute.xlu1 %1376  ;;  %v5209_v2 = vpop.permute.xlu0 %679 }
 0x193   : > { %8093 = vst [vmem:[#allocation98_spill] sm:$0xff] %v5207_v40 }
 0x194   : > { %1536 = vperm.xlu1 %4251, %v4991_v10  }
 0x195   : > { %2422 = vperm.xlu0 %4261, %v5212_v48  }
 0x196   : > { %v5216_v53 = vpop.permute.xlu1 %1386  ;;  %v5218_v14 = vpop.permute.xlu0 %687 }
 0x197   : > { %8095 = vst [vmem:[#allocation100_spill] sm:$0xff] %v5216_v53 }
 0x198   : > { %4253 = vset.pattern.permute.xlu1 %v8063_v41 }
 0x199   : > { %1724 = vperm.xlu1 %4253, %v4730_v49   ;;  %2430 = vperm.xlu0 %4261, %v5221_v44  }
 0x19a   : > { %v5226_v40 = vpop.permute.xlu1 %1396  ;;  %v5228_v45 = vpop.permute.xlu0 %695 }
 0x19b   : > { %8097 = vst [vmem:[#allocation102_spill] sm:$0xff] %v5226_v40 }
 0x19d   : > { %1728 = vperm.xlu1 %4253, %v4991_v10   ;;  %2438 = vperm.xlu0 %4261, %v5231_v18   ;;  %v5250_v10 = vld [vmem:[%s4540_s14 + $0x270] sm:$0xff] }
 0x19e   : > { %v5235_v53 = vpop.permute.xlu1 %1406  ;;  %v5237_v30 = vpop.permute.xlu0 %703  ;;  %8102 = vst [vmem:[#allocation107_spill] sm:$0xff] %v5250_v10 }
 0x19f   : > { %8099 = vst [vmem:[#allocation104_spill] sm:$0xff] %v5235_v53 }
 0x1a1   : > { %4254 = vset.pattern.permute.xlu1 %v8047_v34  ;;  %2446 = vperm.xlu0 %4261, %v5240_v22   ;;  %v5267_v22 = vld [vmem:[%s4540_s14 + $0x290] sm:$0xff] }
 0x1a2   : > { %1544 = vperm.xlu1 %4254, %v5000_v9   ;;  %v5245_v49 = vpop.permute.xlu1 %1416  ;;  %v5247_v40 = vpop.permute.xlu0 %711  ;;  %8107 = vst [vmem:[#allocation112_spill] sm:$0xff] %v5267_v22 }
 0x1a3   : > { %8101 = vst [vmem:[#allocation106_spill] sm:$0xff] %v5245_v49 }
 0x1a5   : > { %2454 = vperm.xlu0 %4261, %v5250_v10  }
 0x1a6   : > { %1548 = vperm.xlu1 %4254, %v4740_v51   ;;  %v5254_v53 = vpop.permute.xlu0 %719 }
 0x1a7   : > { %8103 = vst [vmem:[#allocation108_spill] sm:$0xff] %v5254_v53  ;;  %v5259_v18 = vpop.permute.xlu1 %1456  ;;  %v5422_v53 = vld [vmem:[%s4540_s14 + $0x2e0] sm:$0xff] }
 0x1a8   : > { %8105 = vst [vmem:[#allocation110_spill] sm:$0xff] %v5259_v18  ;;  %v5292_v18 = vsub.s32 2, %v4898_v55 }
 0x1a9   : > { %2462 = vperm.xlu0 %4261, %v5257_v43  }
 0x1aa   : > { %4255 = vset.pattern.permute.xlu1 %v8063_v41  ;;  %v5264_v49 = vpop.permute.xlu0 %727  ;;  %8112 = vst [vmem:[#allocation117_spill] sm:$0xff] %v5292_v18 }
 0x1ab   : > { %8106 = vst [vmem:[#allocation111_spill] sm:$0xff] %v5264_v49  ;;  %1736 = vperm.xlu1 %4255, %v5000_v9   ;;  %v5270_v10 = vpop.permute.xlu1 %1460  ;;  %v429_v9 = vld [vmem:[%s5275_s15] sm:$0x7] }
 0x1ac   : > { %8108 = vst [vmem:[#allocation113_spill] sm:$0xff] %v5270_v10  ;;  %v5288_v10 = vrot.slane %v429_v9, %v4935_v1  ;;  %v5311_v55 = vrot.slane %v429_v9, %v5292_v18 }
 0x1ad   : > { %2470 = vperm.xlu0 %4261, %v5267_v22   ;;  %v5297_v22 = vld [vmem:[%s4540_s14 + $0x2b0] sm:$0xff] }
 0x1ae   : > { %v5278_v43 = vpop.permute.xlu0 %735  ;;  %8114 = vst [vmem:[#allocation119_spill] sm:$0xff] %v5297_v22 }
 0x1af   : > { %8109 = vst [vmem:[#allocation114_spill] sm:$0xff] %v5278_v43  ;;  %1740 = vperm.xlu1 %4255, %v4740_v51   ;;  %v5284_v49 = vpop.permute.xlu1 %1468  ;;  %v5300_v43 = vrot.slane %v429_v9, %v4915_v24  ;;  %v790_v51 = vmul.f32 %v5288_v10, %v660_v47  ;;  %v5316_v24 = vld [vmem:[%s4540_s14 + $0x2c0] sm:$0xff]  ;;  %v791_v9 = vmul.f32 %v5288_v10, %v4861_v54 }
 0x1b0   : > { %8111 = vst [vmem:[#allocation116_spill] sm:$0xff] %v5284_v49  ;;  %8117 = vst [vmem:[#allocation122_spill] sm:$0xff] %v5316_v24 }
 0x1b1   : > { %2478 = vperm.xlu0 %4261, %v5281_v38   ;;  %v626_v1 = vmul.f32 %v5300_v43, %v4764_v57  ;;  %v629_v26 = vmul.f32 %v5300_v43, %v4769_v58  ;;  %v627_v57 = vmul.f32 %v5300_v43, %v4771_v59  ;;  %v986_v58 = vmul.f32 %v5311_v55, %v5027_v12  ;;  %v5361_v12 = vld [vmem:[%s4540_s14 + $0x2d0] sm:$0xff] }
 0x1b2   : > { %v5294_v28 = vpop.permute.xlu0 %743  ;;  %v5346_v54 = vmul.f32 %v5300_v43, %v4783_v63  ;;  %v5350_v59 = vmul.f32 %v5300_v43, %v4787_v5  ;;  %8120 = vst [vmem:[#allocation125_spill] sm:$0xff] %v5361_v12  ;;  %v5365_v18 = vmul.f32 %v5300_v43, %v4793_v3  ;;  %v8121_v63 = vld [vmem:[#allocation6_spill] sm:$0xff] }
 0x1b3   : > { %8113 = vst [vmem:[#allocation118_spill] sm:$0xff] %v5294_v28  ;;  %4256 = vset.pattern.permute.xlu1 %v8047_v34  ;;  %v5304_v49 = vpop.permute.xlu1 %1476  ;;  %v822_v28 = vadd.f32 %v790_v51, %v626_v1  ;;  %v5331_v1 = vmul.f32 %v5300_v43, %v4775_v60  ;;  %v5335_v51 = vmul.f32 %v5300_v43, %v4777_v61 }
 0x1b4   : > { %8115 = vst [vmem:[#allocation120_spill] sm:$0xff] %v5304_v49  ;;  %1556 = vperm.xlu1 %4256, %v4745_v52   ;;  %v628_v49 = vmul.f32 %v5300_v43, %v4762_v56  ;;  %v5339_v56 = vmul.f32 %v5300_v43, %v4781_v62  ;;  %v5354_v60 = vmul.f32 %v5300_v43, %v4789_v6 }
 0x1b5   : > { %2486 = vperm.xlu0 %4261, %v5297_v22   ;;  %v987_v61 = vmul.f32 %v5311_v55, %v5015_v16  ;;  %v1018_v5 = vadd.f32 %v986_v58, %v822_v28  ;;  %v793_v6 = vmul.f32 %v5288_v10, %v5199_v50  ;;  %v8124_v16 = vld [vmem:[#allocation8_spill] sm:$0xff]  ;;  %v8125_v22 = vld [vmem:[#allocation9_spill] sm:$0xff]  ;;  %v823_v44 = vadd.f32 %v791_v9, %v627_v57  ;;  %v8128_v58 = vld [vmem:[#allocation10_spill] sm:$0xff] }
 0x1b6   : > { %v5313_v38 = vpop.permute.xlu0 %751  ;;  %v5383_v3 = vmul.f32 %v5300_v43, %v8125_v22  ;;  %v5390_v50 = vmul.f32 %v5300_v43, %v8128_v58  ;;  %v8132_v22 = vld [vmem:[#allocation12_spill] sm:$0xff]  ;;  %v8133_v9 = vld [vmem:[#allocation13_spill] sm:$0xff]  ;;  %v8135_v58 = vld [vmem:[#allocation14_spill] sm:$0xff] }
 0x1b7   : > { %8116 = vst [vmem:[#allocation121_spill] sm:$0xff] %v5313_v38  ;;  %v5318_v47 = vpop.permute.xlu1 %1484  ;;  %v5369_v38 = vmul.f32 %v5300_v43, %v8121_v63  ;;  %v5402_v57 = vmul.f32 %v5300_v43, %v8132_v22  ;;  %v8139_v22 = vld [vmem:[#allocation43_spill] sm:$0xff]  ;;  %v825_v31 = vadd.f32 %v793_v6, %v629_v26  ;;  %8140 = vst [vmem:[#allocation12_spill] sm:$0xff] %v5422_v53  ;;  %v8148_v26 = vld [vmem:[#allocation20_spill] sm:$0xff] }
 0x1b8   : > { %8118 = vst [vmem:[#allocation123_spill] sm:$0xff] %v5318_v47  ;;  %1560 = vperm.xlu1 %4256, %v5018_v36   ;;  %v1054_v33 = vmul.f32 %v8139_v22, %v1018_v5  ;;  %v5444_v6 = vmul.f32 %v5300_v43, %v8148_v26  ;;  %v8154_v26 = vld [vmem:[#allocation31_spill] sm:$0xff] }
 0x1b9   : > { %2494 = vperm.xlu0 %4261, %v5316_v24   ;;  %v8122_v24 = vld [vmem:[#allocation7_spill] sm:$0xff]  ;;  %v794_v48 = vmul.f32 %v5288_v10, %v8154_v26  ;;  %v8158_v26 = vld [vmem:[#allocation25_spill] sm:$0xff] }
 0x1ba   : > { %v5358_v62 = vpop.permute.xlu0 %759  ;;  %v5375_v47 = vmul.f32 %v5300_v43, %v8122_v24  ;;  %8126 = vst [vmem:[#allocation7_spill] sm:$0xff] %v5383_v3  ;;  %v8129_v24 = vld [vmem:[#allocation11_spill] sm:$0xff]  ;;  %v5410_v3 = vmul.f32 %v5300_v43, %v8135_v58  ;;  %v8142_v58 = vld [vmem:[#allocation17_spill] sm:$0xff] }
 0x1bb   : > { %8119 = vst [vmem:[#allocation124_spill] sm:$0xff] %v5358_v62  ;;  %v5379_v62 = vmul.f32 %v5300_v43, %v8124_v16  ;;  %v5394_v63 = vmul.f32 %v5300_v43, %v8129_v24  ;;  %v8131_v16 = vld [vmem:[#allocation29_spill] sm:$0xff]  ;;  %v1019_v24 = vadd.f32 %v987_v61, %v823_v44  ;;  %v5430_v44 = vmul.f32 %v5300_v43, %v8142_v58  ;;  %v8144_v61 = vld [vmem:[#allocation18_spill] sm:$0xff] }
 0x1bc   : > { %8123 = vst [vmem:[#allocation6_spill] sm:$0xff] %v5375_v47  ;;  %4257 = vset.pattern.permute.xlu1 %v8063_v41  ;;  %v5386_v28 = vpop.permute.xlu1 %1644  ;;  %v792_v0 = vmul.f32 %v5288_v10, %v8131_v16  ;;  %v8137_v16 = vld [vmem:[#allocation15_spill] sm:$0xff] }
 0x1bd   : > { %8127 = vst [vmem:[#allocation8_spill] sm:$0xff] %v5386_v28  ;;  %8130 = vst [vmem:[#allocation9_spill] sm:$0xff] %v5394_v63  ;;  %1748 = vperm.xlu1 %4257, %v4745_v52   ;;  %2502 = vperm.xlu0 %4261, %v5361_v12   ;;  %v5406_v28 = vmul.f32 %v5300_v43, %v8133_v9  ;;  %v5416_v52 = vmul.f32 %v5300_v43, %v8137_v16  ;;  %v8141_v9 = vld [vmem:[#allocation16_spill] sm:$0xff] }
 0x1be   : > { %v5412_v63 = vpop.permute.xlu0 %767  ;;  %v988_v12 = vmul.f32 %v5311_v55, %v5036_v7  ;;  %8143 = vst [vmem:[#allocation13_spill] sm:$0xff] %v5430_v44  ;;  %v5434_v16 = vmul.f32 %v5300_v43, %v8144_v61  ;;  %v824_v58 = vadd.f32 %v792_v0, %v628_v49  ;;  %v989_v61 = vmul.f32 %v5311_v55, %v5042_v11  ;;  %v8151_v44 = vld [vmem:[#allocation22_spill] sm:$0xff] }
 0x1bf   : > { %8134 = vst [vmem:[#allocation10_spill] sm:$0xff] %v5406_v28  ;;  %8136 = vst [vmem:[#allocation11_spill] sm:$0xff] %v5412_v63  ;;  %v5426_v28 = vmul.f32 %v5300_v43, %v8141_v9  ;;  %v8145_v63 = vld [vmem:[#allocation19_spill] sm:$0xff]  ;;  %v8149_v9 = vld [vmem:[#allocation21_spill] sm:$0xff] }
 0x1c0   : > { %8138 = vst [vmem:[#allocation29_spill] sm:$0xff] %v5416_v52  ;;  %v5438_v7 = vmul.f32 %v5300_v43, %v8145_v63  ;;  %v5440_v5 = vpop.permute.xlu1 %1652  ;;  %v5448_v52 = vmul.f32 %v5300_v43, %v8149_v9  ;;  %v5455_v63 = vmul.f32 %v5300_v43, %v8151_v44  ;;  %v1055_v9 = vmul.f32 %v8139_v22, %v1019_v24 }
 0x1c1   : > { %8147 = vst [vmem:[#allocation15_spill] sm:$0xff] %v5440_v5  ;;  %1752 = vperm.xlu1 %4257, %v5018_v36   ;;  %2510 = vperm.xlu0 %4261, %v5422_v53   ;;  %v1020_v11 = vadd.f32 %v988_v12, %v824_v58  ;;  %v1090_v36 = vadd.f32 %v5161_v32, %v1054_v33  ;;  %v8160_v53 = vld [vmem:[#allocation26_spill] sm:$0xff]  ;;  %v8161_v12 = vld [vmem:[#allocation33_spill] sm:$0xff] }
 0x1c2   : > { %8146 = vst [vmem:[#allocation14_spill] sm:$0xff] %v5438_v7  ;;  %8150 = vst [vmem:[#allocation43_spill] sm:$0xff] %v5448_v52  ;;  %v8152_v7 = vld [vmem:[#allocation23_spill] sm:$0xff]  ;;  %v5465_v0 = vpop.permute.xlu0 %775  ;;  %v1021_v49 = vadd.f32 %v989_v61, %v825_v31  ;;  %v795_v44 = vmul.f32 %v5288_v10, %v5209_v2  ;;  %v5479_v24 = vmul.f32 %v5300_v43, %v8158_v26  ;;  %v8165_v61 = vld [vmem:[#allocation28_spill] sm:$0xff] }
 0x1c3   : > { %v5459_v5 = vmul.f32 %v5300_v43, %v8152_v7  ;;  %8155 = vst [vmem:[#allocation17_spill] sm:$0xff] %v5465_v0  ;;  %v5471_v52 = vld [vmem:[%s4540_s14 + $0x2f0] sm:$0xff]  ;;  %v8157_v7 = vld [vmem:[#allocation24_spill] sm:$0xff]  ;;  %v5483_v0 = vmul.f32 %v5300_v43, %v8160_v53  ;;  %v796_v31 = vmul.f32 %v5288_v10, %v8161_v12  ;;  %v1091_v53 = vadd.f32 %v5161_v32, %v1055_v9 }
 0x1c4   : > { %8156 = vst [vmem:[#allocation18_spill] sm:$0xff] %v5471_v52  ;;  %8159 = vst [vmem:[#allocation19_spill] sm:$0xff] %v5479_v24  ;;  %v5487_v33 = vpop.permute.xlu1 %1656  ;;  %v8163_v2 = vld [vmem:[#allocation27_spill] sm:$0xff]  ;;  %v8167_v26 = vld [vmem:[#allocation30_spill] sm:$0xff]  ;;  %v826_v12 = vadd.f32 %v794_v48, %v5335_v51  ;;  %v1057_v9 = vmul.f32 %v8139_v22, %v1021_v49  ;;  %v991_v49 = vmul.f32 %v5311_v55, %v5049_v13 }
 0x1c5   : > { %8153 = vst [vmem:[#allocation16_spill] sm:$0xff] %v5459_v5  ;;  %v5475_v5 = vmul.f32 %v5300_v43, %v8157_v7  ;;  %8162 = vst [vmem:[#allocation20_spill] sm:$0xff] %v5487_v33  ;;  %v5491_v58 = vmul.f32 %v8163_v2, %v5300_v43  ;;  %v5495_v7 = vmul.f32 %v8165_v61, %v5300_v43  ;;  %4259 = vset.pattern.permute.xlu1 %v8047_v34  ;;  %v8169_v33 = vld [vmem:[#allocation35_spill] sm:$0xff]  ;;  %v8171_v61 = vld [vmem:[#allocation62_spill] sm:$0xff] }
 0x1c6   : > { %v5499_v24 = vmul.f32 %v8167_v26, %v5300_v43  ;;  %v798_v47 = vmul.f32 %v5288_v10, %v8169_v33  ;;  %v990_v2 = vmul.f32 %v5311_v55, %v8170_v29  ;;  %2518 = vperm.xlu0 %4261, %v5471_v52   ;;  %1568 = vperm.xlu1 %4259, %v8171_v61   ;;  %v4034_v48 = vld [vmem:[%s4540_s14 + $0x308] sm:$0xff]  ;;  %v8173_v51 = vld [vmem:[#allocation32_spill] sm:$0xff] }
 0x1c7   : > { %8164 = vst [vmem:[#allocation21_spill] sm:$0xff] %v5491_v58  ;;  %8166 = vst [vmem:[#allocation22_spill] sm:$0xff] %v5495_v7  ;;  %v5510_v7 = vpop.permute.xlu0 %783  ;;  %v1056_v26 = vmul.f32 %v8139_v22, %v1020_v11  ;;  %v827_v34 = vadd.f32 %v795_v44, %v5331_v1  ;;  %v5518_v33 = vmul.f32 %v8173_v51, %v5300_v43  ;;  %v8175_v52 = vld [vmem:[#allocation34_spill] sm:$0xff]  ;;  %v1123_v44 = vmax.f32 %v1091_v53, 0.0 }
 0x1c8   : > { %8168 = vst [vmem:[#allocation23_spill] sm:$0xff] %v5499_v24  ;;  %8172 = vst [vmem:[#allocation31_spill] sm:$0xff] %v5510_v7  ;;  %v1122_v24 = vmax.f32 %v1090_v36, 0.0  ;;  %v828_v29 = vadd.f32 %v796_v31, %v5346_v54  ;;  %v5523_v58 = vmul.f32 %v8175_v52, %v5300_v43  ;;  %v800_v7 = vmul.f32 %v5288_v10, %v8177_v27  ;;  %v5527_v11 = vpop.permute.xlu1 %1664  ;;  %v8179_v36 = vld [vmem:[#allocation40_spill] sm:$0xff]  ;;  %v8181_v27 = vld [vmem:[#allocation5_spill] sm:$0xff] }
 0x1c9   : > { %8174 = vst [vmem:[#allocation24_spill] sm:$0xff] %v5518_v33  ;;  %8178 = vst [vmem:[#allocation26_spill] sm:$0xff] %v5527_v11  ;;  %v802_v1 = vmul.f32 %v5288_v10, %v8179_v36  ;;  %v1092_v51 = vadd.f32 %v5161_v32, %v1056_v26  ;;  %v5535_v54 = vadd.f32 %v798_v47, %v5354_v60  ;;  %v8180_v52 = vld [vmem:[#allocation44_spill] sm:$0xff] }
 0x1ca   : > { %8176 = vst [vmem:[#allocation25_spill] sm:$0xff] %v5523_v58  ;;  %v804_v31 = vmul.f32 %v5288_v10, %v8180_v52  ;;  %v1022_v58 = vadd.f32 %v990_v2, %v826_v12  ;;  %3193 = vperm.xlu0 %4261, %v4034_v48   ;;  %1572 = vperm.xlu1 %4259, %v8181_v27   ;;  %v1155_v36 = vsel %vm1154_vm2, %v1122_v24, 0.0  ;;  %v4036_v47 = vld [vmem:[%s4540_s14 + $0x318] sm:$0xff] }
 0x1cb   : > { %v5540_v33 = vpop.permute.xlu0 %1452  ;;  %v1093_v13 = vadd.f32 %v5161_v32, %v1057_v9  ;;  %v1023_v53 = vadd.f32 %v991_v49, %v827_v34  ;;  %v797_v26 = vmul.f32 %v5288_v10, %v5218_v14  ;;  %v8182_v60 = vld [vmem:[#allocation36_spill] sm:$0xff]  ;;  %v5552_v12 = vadd.f32 %v800_v7, %v5369_v38  ;;  %v8184_v2 = vld [vmem:[#allocation39_spill] sm:$0xff]  ;;  %v8187_v9 = vld [vmem:[#allocation41_spill] sm:$0xff] }
 0x1cc   : > { %v5549_v11 = vmul.f32 %v8182_v60, %v5300_v43  ;;  %v5556_v48 = vmul.f32 %v8184_v2, %v5300_v43  ;;  %v8186_v52 = vld [vmem:[#allocation47_spill] sm:$0xff]  ;;  %v5560_v34 = vpop.permute.xlu1 %1672  ;;  %v5563_v14 = vadd.f32 %v802_v1, %v5379_v62  ;;  %v5567_v49 = vmul.f32 %v8187_v9, %v5300_v43 }
 0x1cd   : > { %v806_v24 = vmul.f32 %v5288_v10, %v8186_v52  ;;  %v1156_v38 = vsel %vm1154_vm2, %v1123_v44, 0.0  ;;  %v1124_v7 = vmax.f32 %v1092_v51, 0.0  ;;  %v5571_v60 = vadd.f32 %v804_v31, %v5390_v50  ;;  %v8189_v2 = vld [vmem:[#allocation63_spill] sm:$0xff]  ;;  %v4037_v44 = vld [vmem:[%s4540_s14 + $0x320] sm:$0xff]  ;;  %v8190_v50 = vld [vmem:[#allocation46_spill] sm:$0xff] }
 0x1ce   : > { %8183 = vst [vmem:[#allocation33_spill] sm:$0xff] %v5549_v11  ;;  %8185 = vst [vmem:[#allocation27_spill] sm:$0xff] %v5556_v48  ;;  %v992_v48 = vmul.f32 %v5311_v55, %v8189_v2  ;;  %v1157_v52 = vadd.f32 %v1156_v38, %v1155_v36  ;;  %3201 = vperm.xlu0 %4261, %v4036_v47   ;;  %4260 = vset.pattern.permute.xlu1 %v8063_v41  ;;  %v1125_v1 = vmax.f32 %v1093_v13, 0.0  ;;  %v8192_v36 = vld [vmem:[#allocation49_spill] sm:$0xff]  ;;  %v8193_v38 = vld [vmem:[#allocation51_spill] sm:$0xff] }
 0x1cf   : > { %8188 = vst [vmem:[#allocation28_spill] sm:$0xff] %v5567_v49  ;;  %v1058_v62 = vmul.f32 %v8139_v22, %v1022_v58  ;;  %v1059_v11 = vmul.f32 %v8139_v22, %v1023_v53  ;;  %v829_v9 = vadd.f32 %v797_v26, %v5339_v56  ;;  %1760 = vperm.xlu1 %4260, %v8171_v61   ;;  %v5592_v13 = vpop.permute.xlu0 %1464  ;;  %v8195_v61 = vld [vmem:[#allocation53_spill] sm:$0xff]  ;;  %v8196_v2 = vld [vmem:[#allocation48_spill] sm:$0xff] }
 0x1d0   : > { %v5583_v51 = vmul.f32 %v8190_v50, %v5300_v43  ;;  %v5586_v31 = vadd.f32 %v806_v24, %v5402_v57  ;;  %v808_v47 = vmul.f32 %v5288_v10, %v8192_v36  ;;  %v810_v58 = vmul.f32 %v5288_v10, %v8193_v38  ;;  %v5594_v56 = vpop.permute.xlu1 %1676  ;;  %v8198_v36 = vld [vmem:[#allocation55_spill] sm:$0xff] }
 0x1d1   : > { %8194 = vst [vmem:[#allocation35_spill] sm:$0xff] %v5594_v56  ;;  %v812_v53 = vmul.f32 %v5288_v10, %v8195_v61  ;;  %v993_v26 = vmul.f32 %v5311_v55, %v5055_v19  ;;  %v1158_v57 = vsel %vm1154_vm2, %v1124_v7, 0.0  ;;  %v1094_v24 = vadd.f32 %v5161_v32, %v1058_v62  ;;  %v4041_v7 = vld [vmem:[%s4540_s14 + $0x340] sm:$0xff] }
 0x1d2   : > { %8191 = vst [vmem:[#allocation30_spill] sm:$0xff] %v5583_v51  ;;  %v5604_v50 = vmul.f32 %v8196_v2, %v5300_v43  ;;  %v814_v38 = vmul.f32 %v5288_v10, %v8198_v36  ;;  %v1024_v41 = vadd.f32 %v992_v48, %v828_v29  ;;  %v1159_v51 = vadd.f32 %v1158_v57, %v1157_v52  ;;  %v8199_v2 = vld [vmem:[#allocation50_spill] sm:$0xff]  ;;  %v8201_v48 = vld [vmem:[#allocation52_spill] sm:$0xff] }
 0x1d3   : > { %3205 = vperm.xlu0 %4261, %v4037_v44   ;;  %v1160_v49 = vsel %vm1154_vm2, %v1125_v1, 0.0  ;;  %v1095_v61 = vadd.f32 %v5161_v32, %v1059_v11  ;;  %v1025_v56 = vadd.f32 %v993_v26, %v829_v9  ;;  %v799_v19 = vmul.f32 %v5288_v10, %v5228_v45  ;;  %1764 = vperm.xlu1 %4260, %v8181_v27   ;;  %v8205_v1 = vld [vmem:[#allocation64_spill] sm:$0xff] }
 0x1d4   : > { %8197 = vst [vmem:[#allocation61_spill] sm:$0xff] %v5604_v50  ;;  %v5615_v62 = vadd.f32 %v808_v47, %v5410_v3  ;;  %v5619_v36 = vmul.f32 %v8199_v2, %v5300_v43  ;;  %v5622_v29 = vadd.f32 %v810_v58, %v5426_v28  ;;  %v5626_v11 = vmul.f32 %v8201_v48, %v5300_v43  ;;  %v5628_v52 = vpop.permute.xlu1 %1680  ;;  %v8203_v3 = vld [vmem:[#allocation54_spill] sm:$0xff]  ;;  %v8206_v58 = vld [vmem:[#allocation65_spill] sm:$0xff]  ;;  %v342_v50 = vld [vmem:[%s5772_s20 + $0x38] sm:$0xff] }
 0x1d5   : > { %v5631_v45 = vadd.f32 %v812_v53, %v5434_v16  ;;  %v5635_v27 = vmul.f32 %v8203_v3, %v5300_v43  ;;  %v994_v9 = vmul.f32 %v5311_v55, %v8205_v1  ;;  %v1126_v44 = vmax.f32 %v1094_v24, 0.0  ;;  %v5646_v16 = vpop.permute.xlu0 %1472  ;;  %v8208_v3 = vld [vmem:[#allocation59_spill] sm:$0xff] }
 0x1d6   : > { %8200 = vst [vmem:[#allocation62_spill] sm:$0xff] %v5619_v36  ;;  %8202 = vst [vmem:[#allocation32_spill] sm:$0xff] %v5626_v11  ;;  %v5640_v28 = vadd.f32 %v814_v38, %v5444_v6  ;;  %v996_v47 = vmul.f32 %v5311_v55, %v5047_v17  ;;  %v998_v26 = vmul.f32 %v5311_v55, %v8206_v58  ;;  %v1127_v2 = vmax.f32 %v1095_v61, 0.0  ;;  %v4042_v6 = vld [vmem:[%s4540_s14 + $0x348] sm:$0xff]  ;;  %v8211_v58 = vld [vmem:[#allocation56_spill] sm:$0xff] }
 0x1d7   : > { %8204 = vst [vmem:[#allocation34_spill] sm:$0xff] %v5635_v27  ;;  %v1161_v57 = vadd.f32 %v1160_v49, %v1159_v51  ;;  %3221 = vperm.xlu0 %4261, %v4041_v7   ;;  %v1060_v53 = vmul.f32 %v8139_v22, %v1024_v41  ;;  %v1061_v48 = vmul.f32 %v8139_v22, %v1025_v56  ;;  %v8207_v38 = vld [vmem:[#allocation57_spill] sm:$0xff]  ;;  %v8209_v49 = vld [vmem:[#allocation60_spill] sm:$0xff]  ;;  %v8210_v61 = vld [vmem:[#allocation66_spill] sm:$0xff] }
 0x1d8   : > { %v831_v24 = vadd.f32 %v799_v19, %v5350_v59  ;;  %1768 = vperm.xlu1 %4260, %v5034_v8   ;;  %v816_v17 = vmul.f32 %v5288_v10, %v8207_v38  ;;  %v818_v1 = vmul.f32 %v5288_v10, %v8208_v3  ;;  %v820_v51 = vmul.f32 %v5288_v10, %v8209_v49  ;;  %v4046_v27 = vld [vmem:[%s4540_s14 + $0x368] sm:$0xff]  ;;  %v8246_v36 = vld [vmem:[#allocation111_spill] sm:$0xff] }
 0x1d9   : > { %v1000_v41 = vmul.f32 %v5311_v55, %v5059_v15  ;;  %v1026_v56 = vadd.f32 %v994_v9, %v5535_v54  ;;  %v995_v59 = vmul.f32 %v5311_v55, %v8210_v61  ;;  %v1162_v8 = vsel %vm1154_vm2, %v1126_v44, 0.0  ;;  %v5666_v7 = vpop.permute.xlu1 %1496 }
 0x1da   : > { %v1096_v19 = vadd.f32 %v5161_v32, %v1060_v53  ;;  %v5670_v38 = vmul.f32 %v8211_v58, %v5300_v43  ;;  %v1028_v3 = vadd.f32 %v996_v47, %v5552_v12  ;;  %v1030_v15 = vadd.f32 %v998_v26, %v5563_v14  ;;  %v5685_v26 = vpop.permute.xlu0 %1480 }
 0x1db   : > { %v1163_v49 = vadd.f32 %v1162_v8, %v1161_v57  ;;  %3225 = vperm.xlu0 %4261, %v4042_v6   ;;  %v1164_v54 = vsel %vm1154_vm2, %v1127_v2, 0.0  ;;  %v1097_v9 = vadd.f32 %v5161_v32, %v1061_v48  ;;  %v1027_v44 = vadd.f32 %v995_v59, %v831_v24 }
 0x1dc   : > { %8212 = vst [vmem:[#allocation38_spill] sm:$0xff] %v5670_v38  ;;  %v801_v53 = vmul.f32 %v5288_v10, %v5237_v30  ;;  %v8213_v61 = vmov 0   ;;  %v848_v58 = vadd.f32 %v816_v17, %v5455_v63  ;;  %v850_v12 = vadd.f32 %v818_v1, %v5475_v5  ;;  %v5695_v5 = vld [vmem:[%s4540_s14 + $0x210] sm:$0xff] }
 0x1dd   : > { %4262 = vset.pattern.permute.xlu1 %v8213_v61  ;;  %v1032_v14 = vadd.f32 %v1000_v41, %v5571_v60  ;;  %v1002_v47 = vmul.f32 %v5311_v55, %v5065_v39  ;;  %v852_v57 = vadd.f32 %v820_v51, %v5483_v0  ;;  %v1062_v30 = vmul.f32 %v8139_v22, %v1026_v56  ;;  %v5692_v48 = vpop.permute.xlu1 %1500  ;;  %v4047_v1 = vld [vmem:[%s4540_s14 + $0x370] sm:$0xff] }
 0x1de   : > { %2208 = vperm.xlu1 %4262, %v5193_v46   ;;  %v1004_v2 = vmul.f32 %v5311_v55, %v5071_v4  ;;  %v1128_v63 = vmax.f32 %v1096_v19, 0.0  ;;  %8214 = vst [vmem:[#allocation40_spill] sm:$0xff] %v5695_v5  ;;  %v5698_v60 = vmul.f32 %v8139_v22, %v1028_v3  ;;  %v1006_v39 = vmul.f32 %v5311_v55, %v5077_v21  ;;  %v8215_v21 = vld [vmem:[#allocation67_spill] sm:$0xff] }
 0x1df   : > { %v1008_v46 = vmul.f32 %v5311_v55, %v5083_v42  ;;  %v1165_v0 = vadd.f32 %v1164_v54, %v1163_v49  ;;  %3241 = vperm.xlu0 %4261, %v4046_v27   ;;  %v5705_v24 = vmul.f32 %v8139_v22, %v1030_v15  ;;  %v1129_v4 = vmax.f32 %v1097_v9, 0.0  ;;  %v5728_v15 = vpop.permute.xlu0 %1488 }
 0x1e0   : > { %v1063_v6 = vmul.f32 %v8139_v22, %v1027_v44  ;;  %v833_v17 = vadd.f32 %v801_v53, %v5365_v18  ;;  %v5711_v51 = vmul.f32 %v8139_v22, %v1032_v14  ;;  %v1034_v41 = vadd.f32 %v1002_v47, %v5586_v31 }
 0x1e1   : > { %v997_v56 = vmul.f32 %v5311_v55, %v8215_v21  ;;  %v1010_v42 = vmul.f32 %v5311_v55, %v5089_v25  ;;  %v1036_v27 = vadd.f32 %v1004_v2, %v5615_v62  ;;  %v1012_v18 = vmul.f32 %v5311_v55, %v5095_v23  ;;  %v8220_v21 = vld [vmem:[#allocation71_spill] sm:$0xff] }
 0x1e2   : > { %2213 = vperm.xlu1 %4262, %v5695_v5   ;;  %v1166_v59 = vsel %vm1154_vm2, %v1128_v63, 0.0  ;;  %v1098_v8 = vadd.f32 %v5161_v32, %v1062_v30  ;;  %v1038_v31 = vadd.f32 %v1006_v39, %v5622_v29  ;;  %v1040_v19 = vadd.f32 %v1008_v46, %v5631_v45  ;;  %v5730_v49 = vpop.permute.xlu1 %1688  ;;  %v4051_v29 = vld [vmem:[%s4540_s14 + $0x390] sm:$0xff]  ;;  %v8255_v5 = vld [vmem:[#allocation9_spill] sm:$0xff] }
 0x1e3   : > { %v1014_v3 = vmul.f32 %v5311_v55, %v5104_v35  ;;  %v1167_v25 = vadd.f32 %v1166_v59, %v1165_v0  ;;  %3245 = vperm.xlu0 %4261, %v4047_v1   ;;  %v1168_v62 = vsel %vm1154_vm2, %v1129_v4, 0.0  ;;  %v1099_v23 = vadd.f32 %v5161_v32, %v1063_v6  ;;  %v8216_v35 = vld [vmem:[#allocation68_spill] sm:$0xff]  ;;  %v8218_v46 = vld [vmem:[#allocation70_spill] sm:$0xff]  ;;  %v5785_v59 = vpop.permute.xlu0 %1492 }
 0x1e4   : > { %v1029_v54 = vadd.f32 %v997_v56, %v833_v17  ;;  %v803_v9 = vmul.f32 %v5288_v10, %v5247_v40  ;;  %v5738_v45 = vmul.f32 %v8139_v22, %v1034_v41  ;;  %v999_v44 = vmul.f32 %v5311_v55, %v8216_v35  ;;  %v8217_v40 = vld [vmem:[#allocation69_spill] sm:$0xff]  ;;  %v8219_v17 = vld [vmem:[#allocation6_spill] sm:$0xff]  ;;  %v4052_v41 = vld [vmem:[%s4540_s14 + $0x398] sm:$0xff] }
 0x1e5   : > { %v1042_v53 = vadd.f32 %v1010_v42, %v5640_v28  ;;  %v1016_v14 = vmul.f32 %v5311_v55, %v5111_v37  ;;  %v5747_v47 = vmul.f32 %v8139_v22, %v1036_v27  ;;  %v5751_v30 = vmul.f32 %v5311_v55, %v8217_v40  ;;  %v8221_v42 = vld [vmem:[#allocation72_spill] sm:$0xff] }
 0x1e6   : > { %2223 = vperm.xlu1 %4262, %v5202_v20   ;;  %v1044_v2 = vadd.f32 %v1012_v18, %v848_v58  ;;  %v1130_v63 = vmax.f32 %v1098_v8, 0.0  ;;  %v5754_v39 = vmul.f32 %v8139_v22, %v1038_v31  ;;  %v5758_v28 = vmul.f32 %v5311_v55, %v8218_v46  ;;  %v5760_v20 = vpop.permute.xlu1 %1692  ;;  %v8222_v8 = vld [vmem:[#allocation99_spill] sm:$0xff]  ;;  %v335_v31 = vld [vmem:[%s5772_s20] sm:$0xff] }
 0x1e7   : > { %v1046_v37 = vadd.f32 %v1014_v3, %v850_v12  ;;  %v1169_v0 = vadd.f32 %v1168_v62, %v1167_v25  ;;  %3261 = vperm.xlu0 %4261, %v4051_v29   ;;  %v5764_v4 = vmul.f32 %v8139_v22, %v1040_v19  ;;  %v1131_v6 = vmax.f32 %v1099_v23, 0.0  ;;  %v336_v19 = vld [vmem:[%s5772_s20 + $0x8] sm:$0xff]  ;;  %v8224_v35 = vld [vmem:[#allocation108_spill] sm:$0xff] }
 0x1e8   : > { %v1065_v58 = vmul.f32 %v8139_v22, %v1029_v54  ;;  %v835_v1 = vadd.f32 %v803_v9, %v8219_v17  ;;  %v5775_v12 = vmul.f32 %v8139_v22, %v1042_v53  ;;  %v5779_v56 = vmul.f32 %v5311_v55, %v8220_v21  ;;  %v338_v40 = vld [vmem:[%s5772_s20 + $0x18] sm:$0xff] }
 0x1e9   : > { %v5783_v27 = vmul.f32 %v5311_v55, %v8221_v42  ;;  %v1048_v18 = vadd.f32 %v1016_v14, %v852_v57  ;;  %v5791_v3 = vmul.f32 %v8139_v22, %v1044_v2  ;;  %v1170_v25 = vsel %vm1154_vm2, %v1130_v63, 0.0  ;;  %v8223_v57 = vld [vmem:[#allocation73_spill] sm:$0xff]  ;;  %v337_v14 = vld [vmem:[%s5772_s20 + $0x10] sm:$0xff] }
 0x1ea   : > { %2233 = vperm.xlu1 %4262, %v8222_v8   ;;  %v1100_v62 = vadd.f32 %v5161_v32, %v5698_v60  ;;  %v4159_v23 = vpack.c.bf16 %v336_v19, %v335_v31  ;;  %v5797_v54 = vmul.f32 %v8139_v22, %v1046_v37  ;;  %v5801_v9 = vmul.f32 %v5311_v55, %v8223_v57  ;;  %v4056_v37 = vld [vmem:[%s4540_s14 + $0x3b8] sm:$0xff]  ;;  %v8231_v8 = vld [vmem:[#allocation77_spill] sm:$0xff] }
 0x1eb   : > { %v1171_v29 = vadd.f32 %v1170_v25, %v1169_v0  ;;  %v805_v53 = vmul.f32 %v5288_v10, %v8224_v35  ;;  %3265 = vperm.xlu0 %4261, %v4052_v41   ;;  %v1172_v2 = vsel %vm1154_vm2, %v1131_v6, 0.0  ;;  %v1101_v63 = vadd.f32 %v5161_v32, %v1065_v58  ;;  %v5809_v46 = vpop.permute.xlu1 %1508  ;;  %v8226_v0 = vld [vmem:[#allocation74_spill] sm:$0xff]  ;;  %v8227_v41 = vld [vmem:[#allocation75_spill] sm:$0xff]  ;;  %v8235_v35 = vld [vmem:[#allocation80_spill] sm:$0xff] }
 0x1ec   : > { %v1031_v60 = vadd.f32 %v999_v44, %v835_v1  ;;  %4160 = vmatpush3.bf16.msra.mxu1 %v4159_v23  ;;  %v4162_v17 = vpack.c.bf16 %v338_v40, %v337_v14  ;;  %v5813_v21 = vmul.f32 %v8139_v22, %v1048_v18  ;;  %v5817_v42 = vmul.f32 %v5311_v55, %v8226_v0  ;;  %v8229_v44 = vld [vmem:[#allocation76_spill] sm:$0xff]  ;;  %v8230_v1 = vld [vmem:[#allocation101_spill] sm:$0xff]  ;;  %v8233_v18 = vld [vmem:[#allocation79_spill] sm:$0xff] }
 0x1ed   : > { %v5821_v6 = vmul.f32 %v5311_v55, %v8227_v41  ;;  %v1772_v58 = vmul.f32 %v8229_v44, %v5311_v55  ;;  %v5828_v31 = vmul.f32 %v5311_v55, %v8231_v8  ;;  %v5832_v19 = vmul.f32 %v8233_v18, %v5311_v55  ;;  %v8236_v0 = vld [vmem:[#allocation7_spill] sm:$0xff]  ;;  %v8237_v44 = vld [vmem:[#allocation110_spill] sm:$0xff]  ;;  %v5842_v8 = vpop.permute.xlu0 %1504  ;;  %v339_v18 = vld [vmem:[%s5772_s20 + $0x20] sm:$0xff] }
 0x1ee   : > { %8225 = vst [vmem:[#allocation44_spill] sm:$0xff] %v5813_v21  ;;  %2243 = vperm.xlu1 %4262, %v8230_v1   ;;  %v1132_v25 = vmax.f32 %v1100_v62, 0.0  ;;  %v1579_v23 = vmul.f32 %v5540_v33, %v5288_v10  ;;  %v8234_v57 = vmov 0.0|0.0   ;;  %v1419_v14 = vmul.f32 %v8235_v35, %v5300_v43  ;;  %v340_v62 = vld [vmem:[%s5772_s20 + $0x28] sm:$0xff] }
 0x1ef   : > { %8228 = vst [vmem:[#allocation5_spill] sm:$0xff] %v5821_v6  ;;  %8232 = vst [vmem:[#allocation36_spill] sm:$0xff] %v5828_v31  ;;  %4161 = vmatprep.subr.bf16.mxu1 %v8234_v57  ;;  %v1173_v40 = vadd.f32 %v1172_v2, %v1171_v29  ;;  %v837_v41 = vadd.f32 %v805_v53, %v8236_v0  ;;  %v1580_v1 = vmul.f32 %v8237_v44, %v5288_v10  ;;  %v5849_v11 = vpop.permute.xlu1 %1512  ;;  %v8238_v53 = vld [vmem:[#allocation78_spill] sm:$0xff]  ;;  %v8240_v35 = vld [vmem:[#allocation81_spill] sm:$0xff] }
 0x1f0   : > { %3281 = vperm.xlu0 %4261, %v4056_v37   ;;  %v1133_v38 = vmax.f32 %v1101_v63, 0.0  ;;  %v1102_v33 = vadd.f32 %v5161_v32, %v5705_v24  ;;  %v1067_v21 = vmul.f32 %v8139_v22, %v1031_v60  ;;  %4163 = vmatpush3.bf16.msra.mxu1 %v4162_v17  ;;  %v4165_v29 = vpack.c.bf16 %v340_v62, %v339_v18  ;;  %v8241_v24 = vld [vmem:[#allocation103_spill] sm:$0xff]  ;;  %v5863_v60 = vld [vmem:[%s4540_s14 + $0x200] sm:$0xff]  ;;  %v8243_v44 = vld [vmem:[#allocation86_spill] sm:$0xff] }
 0x1f1   : > { %v5853_v2 = vmul.f32 %v5311_v55, %v8238_v53  ;;  %v5857_v37 = vmul.f32 %v8240_v35, %v5311_v55  ;;  %v1104_v63 = vadd.f32 %v5161_v32, %v5711_v51  ;;  %4164 = vmatprep.subr.bf16.mxu1 %v8234_v57  ;;  %v8242_v17 = vld [vmem:[#allocation84_spill] sm:$0xff]  ;;  %v5872_v18 = vmul.f32 %v8243_v44, %v5311_v55 }
 0x1f2   : > { %2253 = vperm.xlu1 %4262, %v8241_v24   ;;  %v5868_v0 = vmul.f32 %v8242_v17, %v5311_v55  ;;  %v1174_v62 = vsel %vm1154_vm2, %v1132_v25, 0.0  ;;  %v1611_v53 = vadd.f32 %v1579_v23, %v1419_v14  ;;  %v1033_v51 = vadd.f32 %v5751_v30, %v837_v41  ;;  %v341_v17 = vld [vmem:[%s5772_s20 + $0x30] sm:$0xff]  ;;  %v8247_v25 = vld [vmem:[#allocation8_spill] sm:$0xff] }
 0x1f3   : > { %8239 = vst [vmem:[#allocation39_spill] sm:$0xff] %v5853_v2  ;;  %8244 = vst [vmem:[#allocation47_spill] sm:$0xff] %v5872_v18  ;;  %v1175_v35 = vadd.f32 %v1174_v62, %v1173_v40  ;;  %v8245_v2 = vld [vmem:[#allocation21_spill] sm:$0xff]  ;;  %v807_v31 = vmul.f32 %v5288_v10, %v8246_v36  ;;  %v1176_v6 = vsel %vm1154_vm2, %v1133_v38, 0.0  ;;  %v1134_v44 = vmax.f32 %v1102_v33, 0.0  ;;  %v8248_v30 = vld [vmem:[#allocation82_spill] sm:$0xff] }
 0x1f4   : > { %v1612_v24 = vadd.f32 %v1580_v1, %v8245_v2  ;;  %4307 = vset.pattern.permute.xlu0 %v8213_v61  ;;  %v1103_v18 = vadd.f32 %v5161_v32, %v1067_v21  ;;  %v1771_v23 = vmul.f32 %v8247_v25, %v5311_v55  ;;  %4166 = vmatpush3.bf16.msra.mxu1 %v4165_v29  ;;  %v8249_v36 = vld [vmem:[#allocation83_spill] sm:$0xff]  ;;  %v1136_v41 = vmax.f32 %v1104_v63, 0.0  ;;  %v5891_v1 = vpop.permute.xlu0 %1516  ;;  %v8251_v2 = vld [vmem:[#allocation105_spill] sm:$0xff]  ;;  %v5894_v38 = vpop.permute.xlu1 %1700 }
 0x1f5   : > { %2203 = vperm.xlu0 %4307, %v5863_v60   ;;  %v1421_v14 = vmul.f32 %v8248_v30, %v5300_v43  ;;  %v1422_v40 = vmul.f32 %v8249_v36, %v5300_v43  ;;  %8250 = vst [vmem:[#allocation41_spill] sm:$0xff] %v5891_v1  ;;  %8252 = vst [vmem:[#allocation63_spill] sm:$0xff] %v5894_v38  ;;  %v5897_v21 = vld [vmem:[%s4540_s14 + $0x218] sm:$0xff]  ;;  %4167 = vmatprep.subr.bf16.mxu1 %v8234_v57  ;;  %v8253_v29 = vld [vmem:[#allocation85_spill] sm:$0xff] }
 0x1f6   : > { %2263 = vperm.xlu1 %4262, %v8251_v2   ;;  %v4168_v33 = vpack.c.bf16 %v342_v50, %v341_v17  ;;  %v5902_v62 = vmul.f32 %v8253_v29, %v5300_v43  ;;  %v8254_v25 = vld [vmem:[#allocation113_spill] sm:$0xff]  ;;  %v1803_v36 = vadd.f32 %v1771_v23, %v1611_v53  ;;  %v1582_v63 = vmul.f32 %v5592_v13, %v5288_v10  ;;  %v8256_v50 = vld [vmem:[#allocation87_spill] sm:$0xff] }
 0x1f7   : > { %v1581_v30 = vmul.f32 %v8254_v25, %v5288_v10  ;;  %v1177_v61 = vadd.f32 %v1176_v6, %v1175_v35  ;;  %v1069_v2 = vmul.f32 %v8139_v22, %v1033_v51  ;;  %v1804_v1 = vadd.f32 %v1772_v58, %v1612_v24  ;;  %v8257_v25 = vld [vmem:[#allocation15_spill] sm:$0xff]  ;;  %v5931_v35 = vld [vmem:[%s4540_s14 + $0x228] sm:$0xff] }
 0x1f8   : > { %v839_v38 = vadd.f32 %v807_v31, %v8255_v5  ;;  %v5912_v17 = vmul.f32 %v8256_v50, %v5300_v43  ;;  %v1178_v29 = vsel %vm1154_vm2, %v1134_v44, 0.0  ;;  %v1135_v57 = vmax.f32 %v1103_v18, 0.0  ;;  %4169 = vmatpush3.bf16.msra.mxu1 %v4168_v33  ;;  %v8258_v31 = vld [vmem:[#allocation107_spill] sm:$0xff]  ;;  %v5928_v18 = vpop.permute.xlu1 %1704  ;;  %8259 = vst [vmem:[#allocation46_spill] sm:$0xff] %v5931_v35  ;;  %v8260_v44 = vld [vmem:[#allocation45_spill] sm:$0xff]  ;;  %v5941_v50 = vpop.permute.xlu0 %1528 }
 0x1f9   : > { %v1773_v53 = vmul.f32 %v8257_v25, %v5311_v55  ;;  %2218 = vperm.xlu0 %4307, %v5897_v21   ;;  %v1182_v13 = vsel %vm1154_vm2, %v1136_v41, 0.0  ;;  %v1106_v6 = vadd.f32 %v5161_v32, %v5738_v45  ;;  %v1108_v5 = vadd.f32 %v5161_v32, %v5747_v47  ;;  %8261 = vst [vmem:[#allocation49_spill] sm:$0xff] %v5941_v50  ;;  %v8267_v50 = vld [vmem:[#allocation22_spill] sm:$0xff] }
 0x1fa   : > { %v5925_v58 = vadd.f32 %v5161_v32, %v5754_v39  ;;  %2273 = vperm.xlu1 %4262, %v8258_v31   ;;  %v1613_v51 = vadd.f32 %v1581_v30, %v1421_v14  ;;  %v5935_v24 = vadd.f32 %v5161_v32, %v5764_v4  ;;  %v1839_v45 = vmul.f32 %v8260_v44, %v1803_v36  ;;  %v8262_v14 = vld [vmem:[#allocation116_spill] sm:$0xff] }
 0x1fb   : > { %v1614_v23 = vadd.f32 %v1582_v63, %v1422_v40  ;;  %v1179_v47 = vadd.f32 %v1178_v29, %v1177_v61  ;;  %v1105_v41 = vadd.f32 %v5161_v32, %v1069_v2  ;;  %v1840_v39 = vmul.f32 %v8260_v44, %v1804_v1  ;;  %v8263_v31 = vld [vmem:[#allocation20_spill] sm:$0xff]  ;;  %v8264_v40 = vld [vmem:[#allocation114_spill] sm:$0xff]  ;;  %v8265_v1 = vld [vmem:[#allocation109_spill] sm:$0xff] }
 0x1fc   : > { %v1035_v33 = vadd.f32 %v5758_v28, %v839_v38  ;;  %v1180_v25 = vsel %vm1154_vm2, %v1135_v57, 0.0  ;;  %v1583_v30 = vmul.f32 %v8262_v14, %v5288_v10  ;;  %v1805_v4 = vadd.f32 %v1773_v53, %v1613_v51  ;;  %v5961_v38 = vld [vmem:[%s4540_s14 + $0x238] sm:$0xff]  ;;  %v8266_v29 = vld [vmem:[#allocation90_spill] sm:$0xff] }
 0x1fd   : > { %v1774_v36 = vmul.f32 %v8263_v31, %v5311_v55  ;;  %2228 = vperm.xlu0 %4307, %v5931_v35   ;;  %v1138_v61 = vmax.f32 %v1106_v6, 0.0  ;;  %v809_v63 = vmul.f32 %v5288_v10, %v8264_v40  ;;  %v5953_v28 = vadd.f32 %v5161_v32, %v5775_v12  ;;  %v5966_v14 = vpop.permute.xlu1 %1520 }
 0x1fe   : > { %v5957_v57 = vadd.f32 %v5161_v32, %v5791_v3  ;;  %2283 = vperm.xlu1 %4262, %v8265_v1   ;;  %v1140_v2 = vmax.f32 %v1108_v5, 0.0  ;;  %v1875_v53 = vadd.f32 %v8266_v29, %v1839_v45  ;;  %v1584_v6 = vmul.f32 %v5646_v16, %v5288_v10  ;;  %v8269_v16 = vld [vmem:[#allocation10_spill] sm:$0xff] }
 0x1ff   : > { %v1806_v51 = vadd.f32 %v1774_v36, %v1614_v23  ;;  %v1181_v12 = vadd.f32 %v1180_v25, %v1179_v47  ;;  %v1137_v31 = vmax.f32 %v1105_v41, 0.0  ;;  %v1876_v40 = vadd.f32 %v8266_v29, %v1840_v39  ;;  %v8273_v25 = vld [vmem:[#allocation88_spill] sm:$0xff] }
 0x200   : > { %v1071_v3 = vmul.f32 %v8139_v22, %v1035_v33  ;;  %v1615_v1 = vadd.f32 %v1583_v30, %v8267_v50  ;;  %v1142_v35 = vmax.f32 %v5925_v58, 0.0  ;;  %v1841_v5 = vmul.f32 %v8260_v44, %v1805_v4  ;;  %v5982_v33 = vpop.permute.xlu0 %1540  ;;  %v8271_v50 = vld [vmem:[#allocation112_spill] sm:$0xff]  ;;  %v5986_v58 = vld [vmem:[%s4540_s14 + $0x248] sm:$0xff] }
 0x201   : > { %v5975_v45 = vadd.f32 %v5161_v32, %v5797_v54  ;;  %2238 = vperm.xlu0 %4307, %v5961_v38   ;;  %v841_v23 = vadd.f32 %v809_v63, %v8269_v16  ;;  %v1144_v47 = vmax.f32 %v5935_v24, 0.0  ;;  %v1146_v41 = vmax.f32 %v5953_v28, 0.0  ;;  %8270 = vst [vmem:[#allocation53_spill] sm:$0xff] %v5982_v33  ;;  %8272 = vst [vmem:[#allocation48_spill] sm:$0xff] %v5986_v58  ;;  %v5994_v24 = vpop.permute.xlu1 %1524 }
 0x202   : > { %v1148_v39 = vmax.f32 %v5957_v57, 0.0  ;;  %2293 = vperm.xlu1 %4262, %v8271_v50   ;;  %v5990_v54 = vmul.f32 %v8273_v25, %v5300_v43  ;;  %v1907_v30 = vmax.f32 %v1875_v53, 0.0  ;;  %v1842_v4 = vmul.f32 %v8260_v44, %v1806_v51  ;;  %v8275_v51 = vld [vmem:[#allocation26_spill] sm:$0xff] }
 0x203   : > { %8268 = vst [vmem:[#allocation51_spill] sm:$0xff] %v5975_v45  ;;  %v1616_v36 = vadd.f32 %v1584_v6, %v5902_v62  ;;  %v1183_v63 = vadd.f32 %v1182_v13, %v1181_v12  ;;  %v1184_v28 = vsel %vm1154_vm2, %v1137_v31, 0.0  ;;  %v1908_v57 = vmax.f32 %v1876_v40, 0.0  ;;  %v8274_v45 = vld [vmem:[#allocation120_spill] sm:$0xff]  ;;  %v8276_v12 = vld [vmem:[#allocation118_spill] sm:$0xff]  ;;  %v8277_v31 = vld [vmem:[#allocation115_spill] sm:$0xff] }
 0x204   : > { %v1107_v16 = vadd.f32 %v5161_v32, %v1071_v3  ;;  %v1807_v50 = vadd.f32 %v5832_v19, %v1615_v1  ;;  %v1585_v25 = vmul.f32 %v8274_v45, %v5288_v10  ;;  %v1877_v53 = vadd.f32 %v8266_v29, %v1841_v5  ;;  %v6014_v40 = vld [vmem:[%s4540_s14 + $0x258] sm:$0xff] }
 0x205   : > { %v1776_v33 = vmul.f32 %v8275_v51, %v5311_v55  ;;  %2248 = vperm.xlu0 %4307, %v5986_v58   ;;  %v1186_v62 = vsel %vm1154_vm2, %v1138_v61, 0.0  ;;  %v6007_v13 = vsel %vm1154_vm2, %v1140_v2, 0.0  ;;  %v1037_v6 = vadd.f32 %v5779_v56, %v841_v23  ;;  %8278 = vst [vmem:[#allocation55_spill] sm:$0xff] %v6014_v40  ;;  %v6026_v51 = vpop.permute.xlu0 %1552  ;;  %v8299_v58 = vld [vmem:[#allocation95_spill] sm:$0xff] }
 0x206   : > { %v811_v19 = vmul.f32 %v5288_v10, %v8276_v12  ;;  %2303 = vperm.xlu1 %4262, %v8277_v31   ;;  %v1939_v3 = vsel %vm1154_vm2, %v1907_v30, 0.0  ;;  %v1878_v1 = vadd.f32 %v8266_v29, %v1842_v4  ;;  %v1586_v61 = vmul.f32 %v5685_v26, %v5288_v10  ;;  %8279 = vst [vmem:[#allocation50_spill] sm:$0xff] %v6026_v51  ;;  %v6028_v12 = vpop.permute.xlu1 %1712  ;;  %v8280_v4 = vld [vmem:[#allocation23_spill] sm:$0xff]  ;;  %v6041_v51 = vld [vmem:[%s4540_s14 + $0x268] sm:$0xff] }
 0x207   : > { %v1808_v5 = vadd.f32 %v1776_v33, %v1616_v36  ;;  %v1185_v45 = vadd.f32 %v1184_v28, %v1183_v63  ;;  %v1139_v2 = vmax.f32 %v1107_v16, 0.0  ;;  %v6021_v56 = vsel %vm1154_vm2, %v1142_v35, 0.0  ;;  %v8281_v35 = vld [vmem:[#allocation29_spill] sm:$0xff]  ;;  %v8283_v31 = vld [vmem:[#allocation119_spill] sm:$0xff]  ;;  %8284 = vst [vmem:[#allocation54_spill] sm:$0xff] %v6041_v51 }
 0x208   : > { %v6024_v23 = vsel %vm1154_vm2, %v1144_v47, 0.0  ;;  %v1940_v30 = vsel %vm1154_vm2, %v1908_v57, 0.0  ;;  %v1843_v33 = vmul.f32 %v8260_v44, %v1807_v50  ;;  %v1617_v36 = vadd.f32 %v1585_v25, %v8280_v4 }
 0x209   : > { %v1909_v26 = vmax.f32 %v1877_v53, 0.0  ;;  %2258 = vperm.xlu0 %4307, %v6014_v40   ;;  %v1073_v63 = vmul.f32 %v8139_v22, %v1037_v6  ;;  %v843_v28 = vadd.f32 %v811_v19, %v8281_v35  ;;  %v6037_v47 = vsel %vm1154_vm2, %v1146_v41, 0.0  ;;  %v8286_v6 = vld [vmem:[#allocation89_spill] sm:$0xff]  ;;  %v8287_v41 = vld [vmem:[#allocation91_spill] sm:$0xff] }
 0x20a   : > { %8282 = vst [vmem:[#allocation52_spill] sm:$0xff] %v6037_v47  ;;  %v1941_v16 = vadd.f32 %v1940_v30, %v1939_v3  ;;  %2313 = vperm.xlu1 %4262, %v8283_v31   ;;  %v6044_v57 = vsel %vm1154_vm2, %v1148_v39, 0.0  ;;  %v1910_v50 = vmax.f32 %v1878_v1, 0.0  ;;  %v1844_v25 = vmul.f32 %v8260_v44, %v1808_v5  ;;  %v6057_v35 = vpop.permute.xlu1 %1716  ;;  %v6104_v40 = vld [vmem:[%s4540_s14 + $0x288] sm:$0xff] }
 0x20b   : > { %8285 = vst [vmem:[#allocation64_spill] sm:$0xff] %v6044_v57  ;;  %v1618_v53 = vadd.f32 %v1586_v61, %v5912_v17  ;;  %v6050_v4 = vmul.f32 %v8286_v6, %v5300_v43  ;;  %v6054_v19 = vmul.f32 %v8287_v41, %v5300_v43  ;;  %v1187_v3 = vadd.f32 %v1186_v62, %v1185_v45  ;;  %v8288_v62 = vld [vmem:[#allocation123_spill] sm:$0xff]  ;;  %v6069_v6 = vpop.permute.xlu0 %1564 }
 0x20c   : > { %v1188_v30 = vsel %vm1154_vm2, %v1139_v2, 0.0  ;;  %v1879_v39 = vadd.f32 %v8266_v29, %v1843_v33  ;;  %v1809_v1 = vadd.f32 %v5857_v37, %v1617_v36  ;;  %v1942_v17 = vsel %vm1154_vm2, %v1909_v26, 0.0  ;;  %8289 = vst [vmem:[#allocation65_spill] sm:$0xff] %v6069_v6  ;;  %v8290_v33 = vld [vmem:[#allocation122_spill] sm:$0xff]  ;;  %v6073_v37 = vld [vmem:[%s4540_s14 + $0x278] sm:$0xff] }
 0x20d   : > { %v1778_v5 = vmul.f32 %v5560_v34, %v5311_v55  ;;  %2268 = vperm.xlu0 %4307, %v6041_v51   ;;  %v1109_v61 = vadd.f32 %v5161_v32, %v1073_v63  ;;  %v1039_v31 = vadd.f32 %v5783_v27, %v843_v28  ;;  %v1587_v45 = vmul.f32 %v8288_v62, %v5288_v10  ;;  %v8291_v27 = vld [vmem:[#allocation92_spill] sm:$0xff] }
 0x20e   : > { %v1943_v2 = vadd.f32 %v1942_v17, %v1941_v16  ;;  %2323 = vperm.xlu1 %4262, %v8290_v33   ;;  %v1944_v36 = vsel %vm1154_vm2, %v1910_v50, 0.0  ;;  %v1880_v34 = vadd.f32 %v8266_v29, %v1844_v25  ;;  %v1588_v63 = vmul.f32 %v5728_v15, %v5288_v10  ;;  %v8292_v16 = vld [vmem:[#allocation93_spill] sm:$0xff]  ;;  %v8294_v25 = vld [vmem:[#allocation94_spill] sm:$0xff]  ;;  %v8296_v33 = vld [vmem:[#allocation35_spill] sm:$0xff] }
 0x20f   : > { %v1810_v26 = vadd.f32 %v1778_v5, %v1618_v53  ;;  %v6081_v28 = vmul.f32 %v8291_v27, %v5311_v55  ;;  %v6085_v41 = vmul.f32 %v8292_v16, %v5300_v43  ;;  %v8293_v17 = vld [vmem:[#allocation121_spill] sm:$0xff]  ;;  %v1589_v50 = vmul.f32 %v5785_v59, %v5288_v10  ;;  %v6098_v6 = vpop.permute.xlu1 %1532 }
 0x210   : > { %v813_v62 = vmul.f32 %v5288_v10, %v8293_v17  ;;  %v6093_v53 = vmul.f32 %v8294_v25, %v5311_v55  ;;  %v1911_v15 = vmax.f32 %v1879_v39, 0.0  ;;  %v1845_v5 = vmul.f32 %v8260_v44, %v1809_v1  ;;  %v8297_v59 = vld [vmem:[#allocation125_spill] sm:$0xff]  ;;  %v8298_v25 = vld [vmem:[#allocation24_spill] sm:$0xff] }
 0x211   : > { %v1779_v27 = vmul.f32 %v8296_v33, %v5311_v55  ;;  %2278 = vperm.xlu0 %4307, %v6073_v37   ;;  %v1189_v16 = vadd.f32 %v1188_v30, %v1187_v3  ;;  %v1141_v57 = vmax.f32 %v1109_v61, 0.0  ;;  %v1075_v17 = vmul.f32 %v8139_v22, %v1039_v31  ;;  %v8300_v3 = vld [vmem:[#allocation96_spill] sm:$0xff]  ;;  %v8301_v61 = vld [vmem:[#allocation13_spill] sm:$0xff] }
 0x212   : > { %8295 = vst [vmem:[#allocation57_spill] sm:$0xff] %v6093_v53  ;;  %v1945_v51 = vadd.f32 %v1944_v36, %v1943_v2  ;;  %2333 = vperm.xlu1 %4262, %v8297_v59   ;;  %v1619_v39 = vadd.f32 %v1587_v45, %v8298_v25  ;;  %v1912_v53 = vmax.f32 %v1880_v34, 0.0  ;;  %v1846_v1 = vmul.f32 %v8260_v44, %v1810_v26  ;;  %v8302_v2 = vld [vmem:[#allocation25_spill] sm:$0xff]  ;;  %v6119_v59 = vpop.permute.xlu0 %1732 }
 0x213   : > { %v1620_v33 = vadd.f32 %v1588_v63, %v5990_v54  ;;  %v6111_v47 = vmul.f32 %v8299_v58, %v5300_v43  ;;  %v6115_v30 = vmul.f32 %v8300_v3, %v5300_v43  ;;  %v845_v31 = vadd.f32 %v813_v62, %v8301_v61  ;;  %v6125_v26 = vpop.permute.xlu1 %1536  ;;  %v8303_v3 = vld [vmem:[#allocation12_spill] sm:$0xff]  ;;  %v8304_v61 = vld [vmem:[#allocation97_spill] sm:$0xff] }
 0x214   : > { %v1621_v36 = vadd.f32 %v1589_v50, %v8302_v2  ;;  %v1946_v45 = vsel %vm1154_vm2, %v1911_v15, 0.0  ;;  %v1881_v34 = vadd.f32 %v8266_v29, %v1845_v5  ;;  %v1811_v54 = vadd.f32 %v1779_v27, %v1619_v39  ;;  %v6133_v15 = vld [vmem:[%s4540_s14 + $0x298] sm:$0xff] }
 0x215   : > { %v1780_v58 = vmul.f32 %v5628_v52, %v5311_v55  ;;  %2288 = vperm.xlu0 %4307, %v6104_v40   ;;  %v1191_v63 = vadd.f32 %v6007_v13, %v1189_v16  ;;  %v1192_v62 = vsel %vm1154_vm2, %v1141_v57, 0.0  ;;  %v1111_v50 = vadd.f32 %v5161_v32, %v1075_v17  ;;  %v8305_v57 = vld [vmem:[#allocation98_spill] sm:$0xff]  ;;  %v8306_v16 = vld [vmem:[#allocation124_spill] sm:$0xff] }
 0x216   : > { %v1947_v25 = vadd.f32 %v1946_v45, %v1945_v51  ;;  %2343 = vperm.xlu1 %4262, %v8303_v3   ;;  %v1948_v5 = vsel %vm1154_vm2, %v1912_v53, 0.0  ;;  %v1882_v27 = vadd.f32 %v8266_v29, %v1846_v1  ;;  %v1590_v52 = vmul.f32 %v5666_v7, %v5288_v10 }
 0x217   : > { %v1812_v39 = vadd.f32 %v1780_v58, %v1620_v33  ;;  %v6141_v13 = vmul.f32 %v8304_v61, %v5300_v43  ;;  %v6145_v51 = vmul.f32 %v8305_v57, %v5300_v43  ;;  %v815_v17 = vmul.f32 %v5288_v10, %v8306_v16  ;;  %v6157_v57 = vpop.permute.xlu0 %1744  ;;  %v8307_v16 = vld [vmem:[#allocation18_spill] sm:$0xff] }
 0x218   : > { %v1813_v53 = vadd.f32 %v5868_v0, %v1621_v36  ;;  %v1913_v2 = vmax.f32 %v1881_v34, 0.0  ;;  %v1847_v1 = vmul.f32 %v8260_v44, %v1811_v54  ;;  %v1591_v7 = vmul.f32 %v5692_v48, %v5288_v10  ;;  %v6160_v0 = vpop.permute.xlu1 %1724  ;;  %v6163_v36 = vld [vmem:[%s4540_s14 + $0x2a8] sm:$0xff] }
 0x219   : > { %v1782_v33 = vmul.f32 %v5730_v49, %v5311_v55  ;;  %2298 = vperm.xlu0 %4307, %v6133_v15   ;;  %v1193_v45 = vadd.f32 %v1192_v62, %v1191_v63  ;;  %v1143_v58 = vmax.f32 %v1111_v50, 0.0  ;;  %v1041_v3 = vadd.f32 %v5801_v9, %v845_v31  ;;  %v8308_v63 = vld [vmem:[#allocation100_spill] sm:$0xff]  ;;  %v8309_v31 = vld [vmem:[#allocation14_spill] sm:$0xff] }
 0x21a   : > { %v1949_v61 = vadd.f32 %v1948_v5, %v1947_v25  ;;  %2353 = vperm.xlu1 %4262, %v8307_v16   ;;  %v1914_v34 = vmax.f32 %v1882_v27, 0.0  ;;  %v1622_v48 = vadd.f32 %v1590_v52, %v6050_v4  ;;  %v1848_v49 = vmul.f32 %v8260_v44, %v1812_v39  ;;  %v8310_v27 = vld [vmem:[#allocation33_spill] sm:$0xff] }
 0x21b   : > { %v1783_v54 = vmul.f32 %v5760_v20, %v5311_v55  ;;  %v6171_v9 = vmul.f32 %v8308_v63, %v5300_v43  ;;  %v847_v62 = vadd.f32 %v815_v17, %v8309_v31  ;;  %v1849_v50 = vmul.f32 %v8260_v44, %v1813_v53 }
 0x21c   : > { %v1592_v25 = vmul.f32 %v5842_v8, %v5288_v10  ;;  %v1950_v5 = vsel %vm1154_vm2, %v1913_v2, 0.0  ;;  %v1883_v4 = vadd.f32 %v8266_v29, %v1847_v1  ;;  %v1623_v52 = vadd.f32 %v1591_v7, %v8310_v27  ;;  %v6185_v31 = vpop.permute.xlu1 %1728  ;;  %v6188_v8 = vld [vmem:[%s4540_s14 + $0x2b8] sm:$0xff] }
 0x21d   : > { %v1814_v39 = vadd.f32 %v1782_v33, %v1622_v48  ;;  %2308 = vperm.xlu0 %4307, %v6163_v36   ;;  %v1195_v20 = vadd.f32 %v6021_v56, %v1193_v45  ;;  %v1196_v16 = vsel %vm1154_vm2, %v1143_v58, 0.0  ;;  %v1077_v17 = vmul.f32 %v8139_v22, %v1041_v3  ;;  %8312 = vst [vmem:[#allocation59_spill] sm:$0xff] %v6188_v8  ;;  %v8313_v56 = vld [vmem:[#allocation102_spill] sm:$0xff] }
 0x21e   : > { %v1951_v63 = vadd.f32 %v1950_v5, %v1949_v61  ;;  %v8311_v53 = vmov 1   ;;  %v1952_v2 = vsel %vm1154_vm2, %v1914_v34, 0.0  ;;  %v1884_v1 = vadd.f32 %v8266_v29, %v1848_v49  ;;  %v6202_v34 = vpop.permute.xlu0 %1756 }
 0x21f   : > { %4263 = vset.pattern.permute.xlu1 %v8311_v53  ;;  %v1815_v7 = vadd.f32 %v1783_v54, %v1623_v52  ;;  %v1593_v33 = vmul.f32 %v5809_v46, %v5288_v10  ;;  %v6197_v45 = vmul.f32 %v8313_v56, %v5300_v43  ;;  %v1043_v58 = vadd.f32 %v5817_v42, %v847_v62  ;;  %v8315_v62 = vld [vmem:[#allocation11_spill] sm:$0xff]  ;;  %v8317_v56 = vld [vmem:[#allocation40_spill] sm:$0xff] }
 0x220   : > { %2398 = vperm.xlu1 %4263, %v5863_v60   ;;  %v1885_v3 = vadd.f32 %v8266_v29, %v1849_v50  ;;  %v1624_v61 = vadd.f32 %v1592_v25, %v6054_v19  ;;  %v1915_v48 = vmax.f32 %v1883_v4, 0.0  ;;  %v1850_v49 = vmul.f32 %v8260_v44, %v1814_v39  ;;  %v8314_v60 = vld [vmem:[#allocation63_spill] sm:$0xff]  ;;  %v6214_v25 = vld [vmem:[%s4540_s14 + $0x2c8] sm:$0xff] }
 0x221   : > { %v1594_v46 = vmul.f32 %v5849_v11, %v5288_v10  ;;  %v1785_v54 = vmul.f32 %v8314_v60, %v5311_v55  ;;  %2318 = vperm.xlu0 %4307, %v6188_v8   ;;  %v1197_v5 = vadd.f32 %v1196_v16, %v1195_v20  ;;  %v1113_v42 = vadd.f32 %v5161_v32, %v1077_v17  ;;  %v8316_v52 = vld [vmem:[#allocation27_spill] sm:$0xff]  ;;  %v6221_v20 = vpop.permute.xlu1 %1544 }
 0x222   : > { %v817_v50 = vmul.f32 %v5288_v10, %v8315_v62  ;;  %v1953_v19 = vadd.f32 %v1952_v2, %v1951_v63  ;;  %v1916_v4 = vmax.f32 %v1884_v1, 0.0  ;;  %v1851_v27 = vmul.f32 %v8260_v44, %v1815_v7  ;;  %v8318_v60 = vld [vmem:[#allocation47_spill] sm:$0xff]  ;;  %v8319_v2 = vld [vmem:[#allocation41_spill] sm:$0xff]  ;;  %v6233_v8 = vpop.permute.xlu0 %1576 }
 0x223   : > { %v1625_v39 = vadd.f32 %v1593_v33, %v8316_v52  ;;  %v1786_v11 = vmul.f32 %v5928_v18, %v5311_v55  ;;  %v1079_v16 = vmul.f32 %v8139_v22, %v1043_v58  ;;  %v1917_v17 = vmax.f32 %v1885_v3, 0.0  ;;  %v8320_v53 = vld [vmem:[#allocation43_spill] sm:$0xff] }
 0x224   : > { %2406 = vperm.xlu1 %4263, %v8317_v56   ;;  %v1816_v63 = vadd.f32 %v8318_v60, %v1624_v61  ;;  %v1595_v1 = vmul.f32 %v8319_v2, %v5288_v10  ;;  %v1954_v7 = vsel %vm1154_vm2, %v1915_v48, 0.0  ;;  %v1886_v33 = vadd.f32 %v8266_v29, %v1850_v49  ;;  %v6236_v61 = vld [vmem:[%s4540_s14 + $0x2d8] sm:$0xff] }
 0x225   : > { %v1626_v62 = vadd.f32 %v1594_v46, %v6085_v41  ;;  %v1817_v18 = vadd.f32 %v1785_v54, %v1625_v39  ;;  %2328 = vperm.xlu0 %4307, %v6214_v25   ;;  %v1199_v52 = vadd.f32 %v6024_v23, %v1197_v5  ;;  %v1145_v56 = vmax.f32 %v1113_v42, 0.0  ;;  %v6243_v23 = vpop.permute.xlu1 %1548  ;;  %v8321_v5 = vld [vmem:[#allocation28_spill] sm:$0xff] }
 0x226   : > { %v849_v58 = vadd.f32 %v817_v50, %v8320_v53  ;;  %v1955_v3 = vadd.f32 %v1954_v7, %v1953_v19  ;;  %v1956_v60 = vsel %vm1154_vm2, %v1916_v4, 0.0  ;;  %v1887_v48 = vadd.f32 %v8266_v29, %v1851_v27  ;;  %v8322_v27 = vld [vmem:[#allocation5_spill] sm:$0xff]  ;;  %v8324_v7 = vld [vmem:[#allocation46_spill] sm:$0xff] }
 0x227   : > { %v1818_v49 = vadd.f32 %v1786_v11, %v1626_v62  ;;  %v1596_v41 = vmul.f32 %v5966_v14, %v5288_v10  ;;  %v1115_v53 = vadd.f32 %v5161_v32, %v1079_v16  ;;  %v1958_v46 = vsel %vm1154_vm2, %v1917_v17, 0.0  ;;  %v8323_v11 = vld [vmem:[#allocation17_spill] sm:$0xff] }
 0x228   : > { %2410 = vperm.xlu1 %4263, %v5897_v21   ;;  %v1852_v54 = vmul.f32 %v8260_v44, %v1816_v63  ;;  %v1627_v42 = vadd.f32 %v1595_v1, %v8321_v5  ;;  %v1918_v50 = vmax.f32 %v1886_v33, 0.0  ;;  %v1853_v19 = vmul.f32 %v8260_v44, %v1817_v18  ;;  %v6260_v63 = vld [vmem:[%s4540_s14 + $0x2e8] sm:$0xff]  ;;  %v8327_v5 = vld [vmem:[#allocation16_spill] sm:$0xff] }
 0x229   : > { %v1597_v4 = vmul.f32 %v5994_v24, %v5288_v10  ;;  %v1788_v14 = vmul.f32 %v6028_v12, %v5311_v55  ;;  %2338 = vperm.xlu0 %4307, %v6236_v61   ;;  %v1200_v21 = vsel %vm1154_vm2, %v1145_v56, 0.0  ;;  %v1045_v39 = vadd.f32 %v8322_v27, %v849_v58  ;;  %v8325_v56 = vld [vmem:[#allocation49_spill] sm:$0xff]  ;;  %v6282_v27 = vld [vmem:[%s4540_s14 + $0x2f8] sm:$0xff] }
 0x22a   : > { %v819_v16 = vmul.f32 %v5288_v10, %v8323_v11  ;;  %v1957_v17 = vadd.f32 %v1956_v60, %v1955_v3  ;;  %v1919_v2 = vmax.f32 %v1887_v48, 0.0  ;;  %v1854_v1 = vmul.f32 %v8260_v44, %v1818_v49  ;;  %v6271_v3 = vpop.permute.xlu0 %2402  ;;  %v6273_v60 = vpop.permute.xlu1 %1736 }
 0x22b   : > { %v1628_v24 = vadd.f32 %v1596_v41, %v6111_v47  ;;  %v1789_v12 = vmul.f32 %v6057_v35, %v5311_v55  ;;  %v1888_v62 = vadd.f32 %v8266_v29, %v1852_v54  ;;  %v1819_v18 = vadd.f32 %v6081_v28, %v1627_v42  ;;  %v8326_v35 = vld [vmem:[#allocation30_spill] sm:$0xff] }
 0x22c   : > { %2418 = vperm.xlu1 %4263, %v8324_v7   ;;  %v1959_v33 = vadd.f32 %v1958_v46, %v1957_v17  ;;  %v1598_v58 = vmul.f32 %v8325_v56, %v5288_v10  ;;  %v1960_v47 = vsel %vm1154_vm2, %v1918_v50, 0.0  ;;  %v1889_v48 = vadd.f32 %v8266_v29, %v1853_v19 }
 0x22d   : > { %v1629_v49 = vadd.f32 %v1597_v4, %v8326_v35  ;;  %v1820_v41 = vadd.f32 %v1788_v14, %v1628_v24  ;;  %2348 = vperm.xlu0 %4307, %v6260_v63   ;;  %v1201_v46 = vadd.f32 %v1200_v21, %v1199_v52  ;;  %v1147_v54 = vmax.f32 %v1115_v53, 0.0 }
 0x22e   : > { %v1081_v28 = vmul.f32 %v8139_v22, %v1045_v39  ;;  %v851_v42 = vadd.f32 %v819_v16, %v8327_v5  ;;  %v1962_v11 = vsel %vm1154_vm2, %v1919_v2, 0.0  ;;  %v1890_v17 = vadd.f32 %v8266_v29, %v1854_v1  ;;  %v1741_v21 = vpop.permute.xlu1 %1740 }
 0x22f   : > { %v1821_v50 = vadd.f32 %v1789_v12, %v1629_v49  ;;  %v1599_v19 = vmul.f32 %v6098_v6, %v5288_v10  ;;  %v1961_v4 = vadd.f32 %v1960_v47, %v1959_v33  ;;  %v1920_v52 = vmax.f32 %v1888_v62, 0.0  ;;  %v6303_v33 = vld [vmem:[%s4540_s14 + $0x300] sm:$0xff] }
 0x230   : > { %2426 = vperm.xlu1 %4263, %v5961_v38   ;;  %v1855_v53 = vmul.f32 %v8260_v44, %v1819_v18  ;;  %v1630_v14 = vadd.f32 %v1598_v58, %v6115_v30  ;;  %v1921_v39 = vmax.f32 %v1889_v48, 0.0  ;;  %v1856_v16 = vmul.f32 %v8260_v44, %v1820_v41  ;;  %v8328_v38 = vld [vmem:[#allocation52_spill] sm:$0xff]  ;;  %v6300_v30 = vpop.permute.xlu0 %2414  ;;  %v8332_v41 = vld [vmem:[#allocation57_spill] sm:$0xff] }
 0x231   : > { %v1600_v2 = vmul.f32 %v6125_v26, %v5288_v10  ;;  %v1791_v1 = vmul.f32 %v6160_v0, %v5311_v55  ;;  %2358 = vperm.xlu0 %4307, %v6282_v27   ;;  %v1203_v6 = vadd.f32 %v8328_v38, %v1201_v46  ;;  %v1204_v24 = vsel %vm1154_vm2, %v1147_v54, 0.0  ;;  %v8329_v26 = vld [vmem:[#allocation61_spill] sm:$0xff]  ;;  %v8330_v58 = vld [vmem:[#allocation48_spill] sm:$0xff] }
 0x232   : > { %v1117_v12 = vadd.f32 %v5161_v32, %v1081_v28  ;;  %v1963_v7 = vadd.f32 %v1962_v11, %v1961_v4  ;;  %v1922_v62 = vmax.f32 %v1890_v17, 0.0  ;;  %v1857_v18 = vmul.f32 %v8260_v44, %v1821_v50  ;;  %v8331_v47 = vld [vmem:[#allocation36_spill] sm:$0xff]  ;;  %v8333_v50 = vld [vmem:[#allocation31_spill] sm:$0xff] }
 0x233   : > { %v1631_v56 = vadd.f32 %v1599_v19, %v8329_v26  ;;  %v1792_v0 = vmul.f32 %v6185_v31, %v5311_v55  ;;  %v1047_v48 = vadd.f32 %v8331_v47, %v851_v42  ;;  %v1964_v35 = vsel %vm1154_vm2, %v1920_v52, 0.0  ;;  %v1557_v17 = vpop.permute.xlu1 %1556  ;;  %v8334_v19 = vld [vmem:[#allocation53_spill] sm:$0xff] }
 0x234   : > { %2434 = vperm.xlu1 %4263, %v8330_v58   ;;  %v1891_v49 = vadd.f32 %v8266_v29, %v1855_v53  ;;  %v1822_v46 = vadd.f32 %v8332_v41, %v1630_v14  ;;  %v1966_v54 = vsel %vm1154_vm2, %v1921_v39, 0.0  ;;  %v1892_v28 = vadd.f32 %v8266_v29, %v1856_v16  ;;  %v6323_v53 = vld [vmem:[%s4540_s14 + $0x328] sm:$0xff]  ;;  %v6344_v41 = vld [vmem:[%s4540_s14 + $0x330] sm:$0xff] }
 0x235   : > { %v1632_v5 = vadd.f32 %v1600_v2, %v6141_v13  ;;  %v1823_v11 = vadd.f32 %v1791_v1, %v1631_v56  ;;  %2998 = vperm.xlu0 %4307, %v6303_v33   ;;  %v1205_v31 = vadd.f32 %v1204_v24, %v1203_v6  ;;  %v821_v42 = vmul.f32 %v5288_v10, %v8333_v50  ;;  %v8335_v2 = vld [vmem:[#allocation55_spill] sm:$0xff] }
 0x236   : > { %v1601_v4 = vmul.f32 %v8334_v19, %v5288_v10  ;;  %v1965_v52 = vadd.f32 %v1964_v35, %v1963_v7  ;;  %v1968_v14 = vsel %vm1154_vm2, %v1922_v62, 0.0  ;;  %v1893_v39 = vadd.f32 %v8266_v29, %v1857_v18  ;;  %v6333_v7 = vpop.permute.xlu0 %2422  ;;  %v8336_v35 = vld [vmem:[#allocation62_spill] sm:$0xff] }
 0x237   : > { %v1824_v16 = vadd.f32 %v1792_v0, %v1632_v5  ;;  %v1602_v13 = vmul.f32 %v6221_v20, %v5288_v10  ;;  %v1923_v1 = vmax.f32 %v1891_v49, 0.0  ;;  %v1858_v38 = vmul.f32 %v8260_v44, %v1822_v46  ;;  %v1561_v56 = vpop.permute.xlu1 %1560  ;;  %v8337_v5 = vld [vmem:[#allocation54_spill] sm:$0xff] }
 0x238   : > { %2442 = vperm.xlu1 %4263, %v8335_v2   ;;  %v1967_v6 = vadd.f32 %v1966_v54, %v1965_v52  ;;  %v1793_v24 = vmul.f32 %v6119_v59, %v5311_v55  ;;  %v1924_v26 = vmax.f32 %v1892_v28, 0.0  ;;  %v1859_v62 = vmul.f32 %v8260_v44, %v1823_v11  ;;  %v8339_v52 = vld [vmem:[#allocation32_spill] sm:$0xff] }
 0x239   : > { %v1603_v18 = vmul.f32 %v6243_v23, %v5288_v10  ;;  %v1794_v20 = vmul.f32 %v6273_v60, %v5311_v55  ;;  %3023 = vperm.xlu0 %4307, %v6323_v53   ;;  %v1149_v0 = vmax.f32 %v1117_v12, 0.0  ;;  %v1083_v47 = vmul.f32 %v8139_v22, %v1047_v48  ;;  %v8338_v60 = vld [vmem:[#allocation19_spill] sm:$0xff] }
 0x23a   : > { %v1633_v49 = vadd.f32 %v1601_v4, %v8336_v35  ;;  %v1969_v59 = vadd.f32 %v1968_v14, %v1967_v6  ;;  %v1925_v46 = vmax.f32 %v1893_v39, 0.0  ;;  %v1860_v54 = vmul.f32 %v8260_v44, %v1824_v16  ;;  %v6361_v6 = vpop.permute.xlu0 %2430 }
 0x23b   : > { %v1634_v28 = vadd.f32 %v1602_v13, %v6145_v51  ;;  %v1795_v23 = vmul.f32 %v1741_v21, %v5311_v55  ;;  %v853_v11 = vadd.f32 %v821_v42, %v8338_v60  ;;  %v1970_v12 = vsel %vm1154_vm2, %v1923_v1, 0.0  ;;  %v8340_v51 = vld [vmem:[#allocation64_spill] sm:$0xff]  ;;  %v8341_v42 = vld [vmem:[#allocation50_spill] sm:$0xff] }
 0x23c   : > { %2450 = vperm.xlu1 %4263, %v8337_v5   ;;  %v1894_v48 = vadd.f32 %v8266_v29, %v1858_v38  ;;  %v1825_v50 = vadd.f32 %v1793_v24, %v1633_v49  ;;  %v1972_v19 = vsel %vm1154_vm2, %v1924_v26, 0.0  ;;  %v1895_v4 = vadd.f32 %v8266_v29, %v1859_v62  ;;  %v1749_v38 = vpop.permute.xlu1 %1748  ;;  %v6364_v24 = vld [vmem:[%s4540_s14 + $0x350] sm:$0xff] }
 0x23d   : > { %v1635_v14 = vadd.f32 %v1603_v18, %v8339_v52  ;;  %v1826_v39 = vadd.f32 %v1794_v20, %v1634_v28  ;;  %3028 = vperm.xlu0 %4307, %v6344_v41   ;;  %v1207_v21 = vadd.f32 %v8340_v51, %v1205_v31  ;;  %v1208_v16 = vsel %vm1154_vm2, %v1149_v0, 0.0  ;;  %v6381_v52 = vld [vmem:[%s4540_s14 + $0x358] sm:$0xff] }
 0x23e   : > { %v1604_v13 = vmul.f32 %v8341_v42, %v5288_v10  ;;  %v1971_v1 = vadd.f32 %v1970_v12, %v1969_v59  ;;  %v1974_v26 = vsel %vm1154_vm2, %v1925_v46, 0.0  ;;  %v1896_v62 = vadd.f32 %v8266_v29, %v1860_v54  ;;  %v6390_v42 = vpop.permute.xlu0 %2438 }
 0x23f   : > { %v1827_v18 = vadd.f32 %v1795_v23, %v1635_v14  ;;  %v1605_v20 = vmul.f32 %v1557_v17, %v5288_v10  ;;  %v1926_v31 = vmax.f32 %v1894_v48, 0.0  ;;  %v1861_v0 = vmul.f32 %v8260_v44, %v1825_v50  ;;  %v8342_v23 = vld [vmem:[#allocation39_spill] sm:$0xff] }
 0x240   : > { %2458 = vperm.xlu1 %4263, %v6073_v37   ;;  %v1796_v35 = vmul.f32 %v6157_v57, %v5311_v55  ;;  %v1973_v49 = vadd.f32 %v1972_v19, %v1971_v1  ;;  %v1927_v59 = vmax.f32 %v1895_v4, 0.0  ;;  %v1862_v28 = vmul.f32 %v8260_v44, %v1826_v39  ;;  %v1753_v50 = vpop.permute.xlu1 %1752  ;;  %v8343_v4 = vld [vmem:[#allocation34_spill] sm:$0xff]  ;;  %v8344_v39 = vld [vmem:[#allocation51_spill] sm:$0xff] }
 0x241   : > { %v1606_v46 = vmul.f32 %v1561_v56, %v5288_v10  ;;  %v1797_v54 = vmul.f32 %v1749_v38, %v5311_v55  ;;  %3048 = vperm.xlu0 %4307, %v6364_v24   ;;  %v1119_v17 = vadd.f32 %v5161_v32, %v1083_v47  ;;  %v1049_v60 = vadd.f32 %v8342_v23, %v853_v11  ;;  %v6399_v23 = vld [vmem:[%s4540_s14 + $0x378] sm:$0xff] }
 0x242   : > { %v1636_v12 = vadd.f32 %v1604_v13, %v6171_v9  ;;  %v1975_v48 = vadd.f32 %v1974_v26, %v1973_v49  ;;  %v1928_v57 = vmax.f32 %v1896_v62, 0.0  ;;  %v1863_v19 = vmul.f32 %v8260_v44, %v1827_v18 }
 0x243   : > { %v1637_v14 = vadd.f32 %v1605_v20, %v8343_v4  ;;  %v1798_v56 = vmul.f32 %v1753_v50, %v5311_v55  ;;  %v1150_v47 = vmax.f32 %v8344_v39, 0.0  ;;  %v1976_v11 = vsel %vm1154_vm2, %v1926_v31, 0.0  ;;  %v8345_v20 = vld [vmem:[#allocation65_spill] sm:$0xff] }
 0x244   : > { %2466 = vperm.xlu1 %4263, %v6104_v40   ;;  %v1897_v9 = vadd.f32 %v8266_v29, %v1861_v0  ;;  %v1828_v51 = vadd.f32 %v1796_v35, %v1636_v12  ;;  %v1978_v13 = vsel %vm1154_vm2, %v1927_v59, 0.0  ;;  %v1898_v1 = vadd.f32 %v8266_v29, %v1862_v28 }
 0x245   : > { %v1638_v38 = vadd.f32 %v1606_v46, %v6197_v45  ;;  %v1829_v26 = vadd.f32 %v1797_v54, %v1637_v14  ;;  %3053 = vperm.xlu0 %4307, %v6381_v52   ;;  %v1209_v62 = vadd.f32 %v1208_v16, %v1207_v21  ;;  %v1151_v18 = vmax.f32 %v1119_v17, 0.0  ;;  %v1569_v45 = vpop.permute.xlu1 %1568  ;;  %v8346_v46 = vld [vmem:[#allocation44_spill] sm:$0xff]  ;;  %v6414_v14 = vpop.permute.xlu0 %2446 }
 0x246   : > { %v1607_v49 = vmul.f32 %v8345_v20, %v5288_v10  ;;  %v1977_v31 = vadd.f32 %v1976_v11, %v1975_v48  ;;  %v1085_v0 = vmul.f32 %v8139_v22, %v1049_v60  ;;  %v1980_v35 = vsel %vm1154_vm2, %v1928_v57, 0.0  ;;  %v8347_v57 = vld [vmem:[#allocation38_spill] sm:$0xff] }
 0x247   : > { %v1899_v59 = vadd.f32 %v8266_v29, %v1863_v19  ;;  %v1830_v28 = vadd.f32 %v1798_v56, %v1638_v38  ;;  %v1120_v21 = vadd.f32 %v5161_v32, %v8346_v46  ;;  %v1864_v16 = vmul.f32 %v8260_v44, %v1828_v51  ;;  %v6417_v56 = vld [vmem:[%s4540_s14 + $0x380] sm:$0xff]  ;;  %v8349_v46 = vld [vmem:[#allocation59_spill] sm:$0xff] }
 0x248   : > { %2474 = vperm.xlu1 %4263, %v6133_v15   ;;  %v1799_v54 = vmul.f32 %v6202_v34, %v5311_v55  ;;  %v1979_v17 = vadd.f32 %v1978_v13, %v1977_v31  ;;  %v1210_v22 = vsel %vm1154_vm2, %v1150_v47, 0.0  ;;  %v1929_v60 = vmax.f32 %v1897_v9, 0.0  ;;  %v8348_v31 = vld [vmem:[#allocation104_spill] sm:$0xff] }
 0x249   : > { %v1930_v12 = vmax.f32 %v1898_v1, 0.0  ;;  %v1865_v48 = vmul.f32 %v8260_v44, %v1829_v26  ;;  %3073 = vperm.xlu0 %4307, %v6399_v23   ;;  %v1211_v50 = vadd.f32 %v1210_v22, %v1209_v62  ;;  %v1639_v19 = vadd.f32 %v1607_v49, %v8347_v57  ;;  %v1573_v9 = vpop.permute.xlu1 %1572  ;;  %v6430_v49 = vld [vmem:[%s4540_s14 + $0x3a0] sm:$0xff] }
 0x24a   : > { %v1981_v4 = vadd.f32 %v1980_v35, %v1979_v17  ;;  %v1212_v39 = vsel %vm1154_vm2, %v1151_v18, 0.0  ;;  %v1121_v34 = vadd.f32 %v5161_v32, %v1085_v0  ;;  %v1931_v47 = vmax.f32 %v1899_v59, 0.0 }
 0x24b   : > { %v1866_v11 = vmul.f32 %v8260_v44, %v1830_v28  ;;  %v1152_v51 = vmax.f32 %v1120_v21, 0.0  ;;  %v1900_v13 = vadd.f32 %v8266_v29, %v1864_v16  ;;  %v1831_v1 = vadd.f32 %v1799_v54, %v1639_v19  ;;  %v6439_v54 = vpop.permute.xlu0 %2454 }
 0x24c   : > { %2482 = vperm.xlu1 %4263, %v6163_v36   ;;  %v1982_v38 = vsel %vm1154_vm2, %v1929_v60, 0.0  ;;  %v1984_v26 = vsel %vm1154_vm2, %v1930_v12, 0.0  ;;  %v1901_v62 = vadd.f32 %v8266_v29, %v1865_v48  ;;  %v1608_v18 = vmul.f32 %v1569_v45, %v5288_v10 }
 0x24d   : > { %3078 = vperm.xlu0 %4307, %v6417_v56   ;;  %v1213_v32 = vadd.f32 %v1212_v39, %v1211_v50  ;;  %v1983_v20 = vadd.f32 %v1982_v38, %v1981_v4  ;;  %v1448_v0 = vmul.f32 %v8348_v31, %v5300_v43  ;;  %v1153_v35 = vmax.f32 %v1121_v34, 0.0  ;;  %v6445_v4 = vld [vmem:[%s4540_s14 + $0x3a8] sm:$0xff] }
 0x24e   : > { %v1986_v59 = vsel %vm1154_vm2, %v1931_v47, 0.0  ;;  %v1902_v28 = vadd.f32 %v8266_v29, %v1866_v11  ;;  %v1214_v21 = vsel %vm1154_vm2, %v1152_v51, 0.0  ;;  %v1932_v45 = vmax.f32 %v1900_v13, 0.0  ;;  %v1761_v22 = vpop.permute.xlu1 %1760  ;;  %v8350_v39 = vld [vmem:[#allocation58_spill] sm:$0xff] }
 0x24f   : > { %v1867_v16 = vmul.f32 %v8260_v44, %v1831_v1  ;;  %v1985_v17 = vadd.f32 %v1984_v26, %v1983_v20  ;;  %v1933_v60 = vmax.f32 %v1901_v62, 0.0  ;;  %v1640_v12 = vadd.f32 %v1608_v18, %v1448_v0  ;;  %v8351_v20 = vld [vmem:[#allocation106_spill] sm:$0xff]  ;;  %v6461_v0 = vpop.permute.xlu0 %2462 }
 0x250   : > { %2490 = vperm.xlu1 %4263, %v8349_v46   ;;  %v1609_v48 = vmul.f32 %v1573_v9, %v5288_v10  ;;  %v1800_v50 = vmul.f32 %v1761_v22, %v5311_v55  ;;  %v1215_v57 = vadd.f32 %v1214_v21, %v1213_v32  ;;  %v1449_v34 = vmul.f32 %v8350_v39, %v5300_v43 }
 0x251   : > { %3098 = vperm.xlu0 %4307, %v6430_v49   ;;  %v1987_v19 = vadd.f32 %v1986_v59, %v1985_v17  ;;  %v1216_v47 = vsel %vm1154_vm2, %v1153_v35, 0.0  ;;  %v1934_v11 = vmax.f32 %v1902_v28, 0.0  ;;  %v1988_v9 = vsel %vm1154_vm2, %v1932_v45, 0.0  ;;  %v6464_v59 = vld [vmem:[%s4540_s14 + $0x3c0] sm:$0xff] }
 0x252   : > { %v1832_v51 = vadd.f32 %v1800_v50, %v1640_v12  ;;  %v1903_v13 = vadd.f32 %v8266_v29, %v1867_v16  ;;  %v1610_v1 = vmul.f32 %v6233_v8, %v5288_v10  ;;  %v1765_v38 = vpop.permute.xlu1 %1764  ;;  %v1990_v26 = vsel %vm1154_vm2, %v1933_v60, 0.0 }
 0x253   : > { %v1641_v62 = vadd.f32 %v1609_v48, %v1449_v34  ;;  %v1801_v32 = vmul.f32 %v1765_v38, %v5311_v55  ;;  %v1217_v31 = vadd.f32 %v1216_v47, %v1215_v57  ;;  %v1989_v35 = vadd.f32 %v1988_v9, %v1987_v19  ;;  %v6473_v48 = vld [vmem:[%s4540_s14 + $0x3d0] sm:$0xff]  ;;  %v6486_v9 = vld [vmem:[%s4540_s14 + $0x3e0] sm:$0xff] }
 0x254   : > { %2498 = vperm.xlu1 %4263, %v6214_v25   ;;  %v1868_v18 = vmul.f32 %v8260_v44, %v1832_v51  ;;  %v1450_v25 = vmul.f32 %v8351_v20, %v5300_v43  ;;  %v1992_v10 = vsel %vm1154_vm2, %v1934_v11, 0.0  ;;  %v1935_v16 = vmax.f32 %v1903_v13, 0.0 }
 0x255   : > { %3103 = vperm.xlu0 %4307, %v6445_v4   ;;  %v1833_v28 = vadd.f32 %v1801_v32, %v1641_v62  ;;  %v1991_v21 = vadd.f32 %v1990_v26, %v1989_v35  ;;  %v1218_v60 = vrot.slane %v1217_v31, 4  ;;  %v6497_v32 = vld [vmem:[%s4540_s14 + $0x3f0] sm:$0xff] }
 0x256   : > { %v1904_v8 = vadd.f32 %v8266_v29, %v1868_v18  ;;  %v1642_v46 = vadd.f32 %v1610_v1, %v1450_v25  ;;  %v1994_v19 = vsel %vm1154_vm2, %v1935_v16, 0.0  ;;  %v8353_v25 = vmov 2  }
 0x257   : > { %v1769_v45 = vpop.permute.xlu1 %1768  ;;  %v1869_v43 = vmul.f32 %v8260_v44, %v1833_v28  ;;  %v1993_v12 = vadd.f32 %v1992_v10, %v1991_v21  ;;  %v1219_v51 = vadd.f32 %v1218_v60, %v1217_v31 }
 0x258   : > { %2506 = vperm.xlu1 %4263, %v6236_v61   ;;  %v1936_v17 = vmax.f32 %v1904_v8, 0.0  ;;  %v1802_v22 = vmul.f32 %v1769_v45, %v5311_v55  ;;  %v6477_v61 = vpop.permute.xlu0 %2470 }
 0x259   : > { %3118 = vperm.xlu0 %4307, %v6464_v59   ;;  %v1905_v50 = vadd.f32 %v8266_v29, %v1869_v43  ;;  %v1995_v11 = vadd.f32 %v1994_v19, %v1993_v12  ;;  %v1220_v18 = vrot.slane %v1219_v51, 2  ;;  %v4333_v43 = vld [vmem:[%s4540_s14 + $0x220] sm:$0xff]  ;;  %v4334_v19 = vld [vmem:[%s4540_s14 + $0x218] sm:$0xff] }
 0x25a   : > { %v1834_v57 = vadd.f32 %v1802_v22, %v1642_v46  ;;  %v1996_v39 = vsel %vm1154_vm2, %v1936_v17, 0.0  ;;  %v4331_v46 = vld [vmem:[%s4540_s14 + $0x210] sm:$0xff]  ;;  %v4332_v17 = vld [vmem:[%s4540_s14 + $0x200] sm:$0xff] }
 0x25b   : > { %v1937_v34 = vmax.f32 %v1905_v50, 0.0  ;;  %v1997_v1 = vadd.f32 %v1996_v39, %v1995_v11  ;;  %v1221_v10 = vadd.f32 %v1220_v18, %v1219_v51  ;;  %v4335_v39 = vld [vmem:[%s4540_s14 + $0x230] sm:$0xff]  ;;  %v4338_v18 = vld [vmem:[%s4540_s14 + $0x238] sm:$0xff] }
 0x25c   : > { %2514 = vperm.xlu1 %4263, %v6260_v63   ;;  %v1870_v55 = vmul.f32 %v8260_v44, %v1834_v57  ;;  %v6494_v44 = vpop.permute.xlu0 %2478 }
 0x25d   : > { %v6482_v47 = vpop.permute.xlu1 %2208  ;;  %3128 = vperm.xlu0 %4307, %v6473_v48   ;;  %v1998_v63 = vsel %vm1154_vm2, %v1937_v34, 0.0  ;;  %v1222_v45 = vrot.slane %v1221_v10, 1 }
 0x25e   : > { %v1906_v13 = vadd.f32 %v8266_v29, %v1870_v55  ;;  %v1999_v62 = vadd.f32 %v1998_v63, %v1997_v1  ;;  %v4336_v63 = vld [vmem:[%s4540_s14 + $0x228] sm:$0xff]  ;;  %v4337_v1 = vld [vmem:[%s4540_s14 + $0x240] sm:$0xff] }
 0x25f   : > { %v1223_v50 = vadd.f32 %v1222_v45, %v1221_v10 }
 0x260   : > { %2522 = vperm.xlu1 %4263, %v6282_v27   ;;  %v1938_v38 = vmax.f32 %v1906_v13, 0.0  ;;  %v4330_v27 = vld [vmem:[%s4540_s14 + $0x208] sm:$0xff]  ;;  %v6505_v8 = vpop.permute.xlu0 %2486 }
 0x261   : > { %v6491_v26 = vpop.permute.xlu1 %2213  ;;  %3138 = vperm.xlu0 %4307, %v6486_v9   ;;  %v1225_v11 = vmul.f32 0.00390625, %v1223_v50  ;;  %v4344_v50 = vld [vmem:[%s4540_s14 + $0x2a0] sm:$0xff] }
 0x262   : > { %8352 = vst [vmem:[#allocation60_spill] sm:$0xff] %v6491_v26  ;;  %v2000_v20 = vsel %vm1154_vm2, %v1938_v38, 0.0 }
 0x263   : > { %v2001_v29 = vadd.f32 %v2000_v20, %v1999_v62  ;;  %v4339_v20 = vld [vmem:[%s4540_s14 + $0x250] sm:$0xff] }
 0x264   : > { %4264 = vset.pattern.permute.xlu1 %v8353_v25  ;;  %v6515_v12 = vpop.permute.xlu0 %2494 }
 0x265   : > { %2598 = vperm.xlu1 %4264, %v4330_v27   ;;  %v6502_v31 = vpop.permute.xlu1 %2223  ;;  %3148 = vperm.xlu0 %4307, %v6497_v32   ;;  %v2002_v35 = vrot.slane %v2001_v29, 4 }
 0x267   : > { %v2003_v28 = vadd.f32 %v2002_v35, %v2001_v29  ;;  %v4340_v35 = vld [vmem:[%s4540_s14 + $0x260] sm:$0xff] }
 0x268   : > { %v6522_v13 = vpop.permute.xlu0 %2502 }
 0x269   : > { %2602 = vperm.xlu1 %4264, %v4331_v46   ;;  %v6508_v21 = vpop.permute.xlu1 %2233  ;;  %4324 = vset.pattern.permute.xlu0 %v8353_v25  ;;  %v2004_v16 = vrot.slane %v2003_v28, 2  ;;  %v4341_v46 = vld [vmem:[%s4540_s14 + $0x270] sm:$0xff] }
 0x26a   : > { %2594 = vperm.xlu0 %4324, %v4332_v17  }
 0x26b   : > { %v2005_v22 = vadd.f32 %v2004_v16, %v2003_v28  ;;  %v4342_v16 = vld [vmem:[%s4540_s14 + $0x280] sm:$0xff] }
 0x26c   : > { %v6533_v27 = vpop.permute.xlu0 %2510 }
 0x26d   : > { %2610 = vperm.xlu1 %4264, %v4333_v43   ;;  %v6513_v60 = vpop.permute.xlu1 %2243  ;;  %v2006_v57 = vrot.slane %v2005_v22, 1 }
 0x26e   : > { %2606 = vperm.xlu0 %4324, %v4334_v19  }
 0x26f   : > { %v2007_v34 = vadd.f32 %v2006_v57, %v2005_v22  ;;  %v4345_v57 = vld [vmem:[%s4540_s14 + $0x2b0] sm:$0xff] }
 0x270   : > { %v6540_v28 = vpop.permute.xlu0 %2518 }
 0x271   : > { %2618 = vperm.xlu1 %4264, %v4335_v39   ;;  %v6519_v55 = vpop.permute.xlu1 %2253  ;;  %v2008_v51 = vmul.f32 0.00390625, %v2007_v34  ;;  %v8360_v39 = vmov 0  }
 0x272   : > { %2614 = vperm.xlu0 %4324, %v4336_v63   ;;  %v4035_v63 = vld [vmem:[%s4540_s14 + $0x310] sm:$0xff] }
 0x273   : > { %v2010_v38 = vsel %vm2009_vm3, %v1225_v11, %v2008_v51 }
 0x274   : > { %4123 = vmatmul.mubr.msk.f32.vlgmr.msra.gmra.mrb[2].mxu1 %vm1154_vm2, %v2010_v38 }
 0x275   : > { %2626 = vperm.xlu1 %4264, %v4337_v1   ;;  %v6526_v62 = vpop.permute.xlu1 %2263 }
 0x276   : > { %2622 = vperm.xlu0 %4324, %v4338_v18  }
 0x279   : > { %2634 = vperm.xlu1 %4264, %v4339_v20   ;;  %v6531_v29 = vpop.permute.xlu1 %2273 }
 0x27a   : > { %2630 = vperm.xlu0 %4324, %v8330_v58   ;;  %v6549_v58 = vpop.permute.xlu0 %3193 }
 0x27d   : > { %2642 = vperm.xlu1 %4264, %v4340_v35   ;;  %v6537_v10 = vpop.permute.xlu1 %2283 }
 0x27e   : > { %8354 = vst [vmem:[#allocation66_spill] sm:$0xff] %v6537_v10  ;;  %2638 = vperm.xlu0 %4324, %v8335_v2   ;;  %v4343_v2 = vld [vmem:[%s4540_s14 + $0x290] sm:$0xff]  ;;  %v6556_v22 = vpop.permute.xlu0 %3201 }
 0x281   : > { %2650 = vperm.xlu1 %4264, %v4341_v46   ;;  %v6543_v45 = vpop.permute.xlu1 %2293  ;;  %v4347_v46 = vld [vmem:[%s4540_s14 + $0x318] sm:$0xff] }
 0x282   : > { %8355 = vst [vmem:[#allocation56_spill] sm:$0xff] %v6543_v45  ;;  %2646 = vperm.xlu0 %4324, %v8337_v5  }
 0x285   : > { %2658 = vperm.xlu1 %4264, %v4342_v16   ;;  %v6547_v17 = vpop.permute.xlu1 %2303 }
 0x286   : > { %8356 = vst [vmem:[#allocation67_spill] sm:$0xff] %v6547_v17  ;;  %2654 = vperm.xlu0 %4324, %v6073_v37   ;;  %v6565_v37 = vpop.permute.xlu0 %3205  ;;  %v4058_v17 = vld [vmem:[%s4540_s14 + $0x3c8] sm:$0xff] }
 0x289   : > { %2666 = vperm.xlu1 %4264, %v4343_v2   ;;  %v6553_v43 = vpop.permute.xlu1 %2313 }
 0x28a   : > { %8357 = vst [vmem:[#allocation68_spill] sm:$0xff] %v6553_v43  ;;  %2662 = vperm.xlu0 %4324, %v6104_v40   ;;  %v4346_v40 = vld [vmem:[%s4540_s14 + $0x308] sm:$0xff]  ;;  %v6573_v11 = vpop.permute.xlu0 %3221 }
 0x28b   : > { %8362 = vst [vmem:[#allocation71_spill] sm:$0xff] %v6573_v11 }
 0x28d   : > { %2674 = vperm.xlu1 %4264, %v4344_v50   ;;  %v6559_v5 = vpop.permute.xlu1 %2323 }
 0x28e   : > { %8358 = vst [vmem:[#allocation69_spill] sm:$0xff] %v6559_v5  ;;  %2670 = vperm.xlu0 %4324, %v6133_v15   ;;  %v8363_v15 = vmov 1   ;;  %v8437_v5 = vld [vmem:[#allocation42_spill] sm:$0xff] }
 0x291   : > { %2682 = vperm.xlu1 %4264, %v4345_v57   ;;  %v6563_v19 = vpop.permute.xlu1 %2333  ;;  %v4348_v57 = vld [vmem:[%s4540_s14 + $0x320] sm:$0xff] }
 0x292   : > { %8359 = vst [vmem:[#allocation70_spill] sm:$0xff] %v6563_v19  ;;  %2678 = vperm.xlu0 %4324, %v6163_v36   ;;  %v6581_v36 = vpop.permute.xlu0 %3225 }
 0x293   : > { %8365 = vst [vmem:[#allocation99_spill] sm:$0xff] %v6581_v36 }
 0x295   : > { %4265 = vset.pattern.permute.xlu1 %v8360_v39  ;;  %v6570_v34 = vpop.permute.xlu1 %2343 }
 0x296   : > { %3003 = vperm.xlu1 %4265, %v4346_v40   ;;  %8361 = vst [vmem:[#allocation6_spill] sm:$0xff] %v6570_v34  ;;  %3381 = vperm.xlu0 %4324, %v6303_v33  }
 0x299   : > { %v6576_v51 = vpop.permute.xlu1 %2353 }
 0x29a   : > { %4266 = vset.pattern.permute.xlu1 %v8363_v15  ;;  %8364 = vst [vmem:[#allocation72_spill] sm:$0xff] %v6576_v51  ;;  %3401 = vperm.xlu0 %4324, %v6323_v53  }
 0x29b   : > { %3189 = vperm.xlu1 %4266, %v6303_v33   ;;  %v6591_v33 = vpop.permute.xlu0 %3241 }
 0x29e   : > { %3405 = vperm.xlu0 %4324, %v6344_v41  }
 0x29f   : > { %4267 = vset.pattern.permute.xlu1 %v8360_v39  ;;  %v6584_v1 = vpop.permute.xlu1 %2398  ;;  %v6597_v20 = vpop.permute.xlu0 %3245 }
 0x2a0   : > { %8366 = vst [vmem:[#allocation73_spill] sm:$0xff] %v6584_v1  ;;  %3008 = vperm.xlu1 %4267, %v4035_v63   ;;  %v4352_v1 = vld [vmem:[%s4540_s14 + $0x370] sm:$0xff] }
 0x2a2   : > { %3421 = vperm.xlu0 %4324, %v6364_v24  }
 0x2a3   : > { %v6587_v38 = vpop.permute.xlu1 %2406 }
 0x2a4   : > { %8367 = vst [vmem:[#allocation108_spill] sm:$0xff] %v6587_v38  ;;  %4268 = vset.pattern.permute.xlu1 %v8363_v15 }
 0x2a5   : > { %3197 = vperm.xlu1 %4268, %v4035_v63  }
 0x2a6   : > { %3425 = vperm.xlu0 %4324, %v6381_v52  }
 0x2a7   : > { %v6593_v18 = vpop.permute.xlu1 %2410 }
 0x2a8   : > { %8368 = vst [vmem:[#allocation74_spill] sm:$0xff] %v6593_v18 }
 0x2a9   : > { %4269 = vset.pattern.permute.xlu1 %v8353_v25 }
 0x2aa   : > { %3385 = vperm.xlu1 %4269, %v4346_v40   ;;  %3441 = vperm.xlu0 %4324, %v6399_v23  }
 0x2ab   : > { %v6599_v35 = vpop.permute.xlu1 %2418 }
 0x2ac   : > { %8369 = vst [vmem:[#allocation75_spill] sm:$0xff] %v6599_v35 }
 0x2ae   : > { %4270 = vset.pattern.permute.xlu1 %v8360_v39 }
 0x2af   : > { %3013 = vperm.xlu1 %4270, %v4347_v46   ;;  %v6604_v16 = vpop.permute.xlu1 %2426 }
 0x2b0   : > { %8370 = vst [vmem:[#allocation76_spill] sm:$0xff] %v6604_v16 }
 0x2b3   : > { %4271 = vset.pattern.permute.xlu1 %v8353_v25  ;;  %v6607_v2 = vpop.permute.xlu1 %2434 }
 0x2b4   : > { %8371 = vst [vmem:[#allocation101_spill] sm:$0xff] %v6607_v2  ;;  %3389 = vperm.xlu1 %4271, %v4035_v63   ;;  %v331_v2 = vld [vmem:[%s4551_s17 + $0x18] sm:$0xff] }
 0x2b7   : > { %v6609_v50 = vpop.permute.xlu1 %2442 }
 0x2b8   : > { %8372 = vst [vmem:[#allocation77_spill] sm:$0xff] %v6609_v50  ;;  %4272 = vset.pattern.permute.xlu1 %v8360_v39  ;;  %v330_v50 = vld [vmem:[%s4551_s17 + $0x10] sm:$0xff] }
 0x2b9   : > { %3018 = vperm.xlu1 %4272, %v4348_v57   ;;  %v4171_v35 = vpack.c.bf16 %v331_v2, %v330_v50  ;;  %v4040_v50 = vld [vmem:[%s4540_s14 + $0x338] sm:$0xff] }
 0x2bb   : > { %v6613_v40 = vpop.permute.xlu1 %2450  ;;  %4172 = vmatpush3.bf16.msra.mxu0 %v4171_v35 }
 0x2bc   : > { %8373 = vst [vmem:[#allocation79_spill] sm:$0xff] %v6613_v40  ;;  %v8377_v40 = vmov 0.0|0.0  }
 0x2bd   : > { %4273 = vset.pattern.permute.xlu1 %v8353_v25  ;;  %4173 = vmatprep.subr.bf16.mxu0 %v8377_v40 }
 0x2be   : > { %3393 = vperm.xlu1 %4273, %v4347_v46   ;;  %v332_v46 = vld [vmem:[%s4551_s17 + $0x20] sm:$0xff] }
 0x2bf   : > { %v6616_v16 = vpop.permute.xlu1 %2458 }
 0x2c0   : > { %8374 = vst [vmem:[#allocation80_spill] sm:$0xff] %v6616_v16  ;;  %v333_v16 = vld [vmem:[%s4551_s17 + $0x28] sm:$0xff]  ;;  %s300_s17 = sand.u32 1, %s4420_s22  }
 0x2c1   : > { %s3956_s26 = sshll.u32 %s300_s17, 1 }
 0x2c2   : > { %4274 = vset.pattern.permute.xlu1 %v8363_v15 }
 0x2c3   : > { %3209 = vperm.xlu1 %4274, %v6323_v53   ;;  %v6620_v63 = vpop.permute.xlu1 %2466  ;;  %v4174_v53 = vpack.c.bf16 %v333_v16, %v332_v46 }
 0x2c4   : > { %8375 = vst [vmem:[#allocation7_spill] sm:$0xff] %v6620_v63 }
 0x2c5   : > { %4175 = vmatpush3.bf16.msra.mxu0 %v4174_v53 }
 0x2c6   : > { %4176 = vmatprep.subr.bf16.mxu0 %v8377_v40  ;;  %v4350_v40 = vld [vmem:[%s4540_s14 + $0x348] sm:$0xff] }
 0x2c7   : > { %4275 = vset.pattern.permute.xlu1 %v8353_v25  ;;  %v6625_v18 = vpop.permute.xlu1 %2474 }
 0x2c8   : > { %8376 = vst [vmem:[#allocation110_spill] sm:$0xff] %v6625_v18  ;;  %3397 = vperm.xlu1 %4275, %v4348_v57   ;;  %v4349_v57 = vld [vmem:[%s4540_s14 + $0x340] sm:$0xff] }
 0x2cb   : > { %v6630_v38 = vpop.permute.xlu1 %2482 }
 0x2cc   : > { %8378 = vst [vmem:[#allocation78_spill] sm:$0xff] %v6630_v38  ;;  %4276 = vset.pattern.permute.xlu1 %v8363_v15 }
 0x2cd   : > { %3213 = vperm.xlu1 %4276, %v6344_v41  }
 0x2cf   : > { %v6635_v2 = vpop.permute.xlu1 %2490 }
 0x2d1   : > { %4277 = vset.pattern.permute.xlu1 %v8360_v39 }
 0x2d2   : > { %3033 = vperm.xlu1 %4277, %v4040_v50  }
 0x2d3   : > { %v6639_v35 = vpop.permute.xlu1 %2498 }
 0x2d4   : > { %8379 = vst [vmem:[#allocation81_spill] sm:$0xff] %v6639_v35 }
 0x2d6   : > { %4278 = vset.pattern.permute.xlu1 %v8363_v15 }
 0x2d7   : > { %3217 = vperm.xlu1 %4278, %v4040_v50   ;;  %v6642_v16 = vpop.permute.xlu1 %2506 }
 0x2d8   : > { %8380 = vst [vmem:[#allocation103_spill] sm:$0xff] %v6642_v16  ;;  %v6658_v16 = vpop.permute.xlu0 %3261 }
 0x2db   : > { %4279 = vset.pattern.permute.xlu1 %v8360_v39  ;;  %v6645_v41 = vpop.permute.xlu1 %2514 }
 0x2dc   : > { %8381 = vst [vmem:[#allocation84_spill] sm:$0xff] %v6645_v41  ;;  %3038 = vperm.xlu1 %4279, %v4349_v57  }
 0x2df   : > { %v6648_v46 = vpop.permute.xlu1 %2522 }
 0x2e0   : > { %8382 = vst [vmem:[#allocation86_spill] sm:$0xff] %v6648_v46  ;;  %4280 = vset.pattern.permute.xlu1 %v8353_v25 }
 0x2e1   : > { %3409 = vperm.xlu1 %4280, %v4040_v50  }
 0x2e4   : > { %v6651_v53 = vpop.permute.xlu1 %2598 }
 0x2e5   : > { %8383 = vst [vmem:[#allocation21_spill] sm:$0xff] %v6651_v53  ;;  %4281 = vset.pattern.permute.xlu1 %v8360_v39  ;;  %v6666_v53 = vpop.permute.xlu0 %3265 }
 0x2e6   : > { %3043 = vperm.xlu1 %4281, %v4350_v40  }
 0x2e8   : > { %v6655_v35 = vpop.permute.xlu1 %2602 }
 0x2e9   : > { %8384 = vst [vmem:[#allocation111_spill] sm:$0xff] %v6655_v35  ;;  %v6671_v35 = vpop.permute.xlu0 %3281 }
 0x2ea   : > { %4282 = vset.pattern.permute.xlu1 %v8353_v25 }
 0x2eb   : > { %3413 = vperm.xlu1 %4282, %v4349_v57  }
 0x2ec   : > { %v6660_v41 = vpop.permute.xlu1 %2610 }
 0x2ed   : > { %8385 = vst [vmem:[#allocation8_spill] sm:$0xff] %v6660_v41  ;;  %v6677_v57 = vpop.permute.xlu0 %2203 }
 0x2ee   : > { %8389 = vst [vmem:[#allocation85_spill] sm:$0xff] %v6677_v57 }
 0x2ef   : > { %4283 = vset.pattern.permute.xlu1 %v8363_v15 }
 0x2f0   : > { %3229 = vperm.xlu1 %4283, %v6364_v24   ;;  %v6664_v50 = vpop.permute.xlu1 %2618 }
 0x2f1   : > { %8386 = vst [vmem:[#allocation82_spill] sm:$0xff] %v6664_v50  ;;  %v4045_v50 = vld [vmem:[%s4540_s14 + $0x360] sm:$0xff] }
 0x2f4   : > { %4284 = vset.pattern.permute.xlu1 %v8353_v25  ;;  %v6669_v46 = vpop.permute.xlu1 %2626 }
 0x2f5   : > { %8387 = vst [vmem:[#allocation83_spill] sm:$0xff] %v6669_v46  ;;  %3417 = vperm.xlu1 %4284, %v4350_v40   ;;  %v6685_v40 = vpop.permute.xlu0 %2218 }
 0x2f6   : > { %8392 = vst [vmem:[#allocation87_spill] sm:$0xff] %v6685_v40 }
 0x2f8   : > { %v6673_v38 = vpop.permute.xlu1 %2634 }
 0x2f9   : > { %8388 = vst [vmem:[#allocation105_spill] sm:$0xff] %v6673_v38  ;;  %4285 = vset.pattern.permute.xlu1 %v8363_v15  ;;  %v6690_v46 = vpop.permute.xlu0 %2228 }
 0x2fa   : > { %3233 = vperm.xlu1 %4285, %v6381_v52   ;;  %8394 = vst [vmem:[#allocation107_spill] sm:$0xff] %v6690_v46  ;;  %v8423_v46 = vmov 0.0  }
 0x2fc   : > { %v6679_v24 = vpop.permute.xlu1 %2642 }
 0x2fd   : > { %8390 = vst [vmem:[#allocation113_spill] sm:$0xff] %v6679_v24  ;;  %v4351_v24 = vld [vmem:[%s4540_s14 + $0x368] sm:$0xff]  ;;  %v6698_v63 = vpop.permute.xlu0 %2238 }
 0x2fe   : > { %4286 = vset.pattern.permute.xlu1 %v8360_v39  ;;  %8397 = vst [vmem:[#allocation20_spill] sm:$0xff] %v6698_v63 }
 0x2ff   : > { %3058 = vperm.xlu1 %4286, %v4045_v50  }
 0x300   : > { %v6683_v41 = vpop.permute.xlu1 %2650 }
 0x301   : > { %8391 = vst [vmem:[#allocation9_spill] sm:$0xff] %v6683_v41 }
 0x303   : > { %4287 = vset.pattern.permute.xlu1 %v8363_v15 }
 0x304   : > { %3237 = vperm.xlu1 %4287, %v4045_v50   ;;  %v6688_v38 = vpop.permute.xlu1 %2658 }
 0x305   : > { %8393 = vst [vmem:[#allocation15_spill] sm:$0xff] %v6688_v38  ;;  %v6704_v38 = vpop.permute.xlu0 %2248 }
 0x306   : > { %8399 = vst [vmem:[#allocation109_spill] sm:$0xff] %v6704_v38 }
 0x308   : > { %4288 = vset.pattern.permute.xlu1 %v8360_v39  ;;  %v6693_v52 = vpop.permute.xlu1 %2666 }
 0x309   : > { %8395 = vst [vmem:[#allocation45_spill] sm:$0xff] %v6693_v52  ;;  %3063 = vperm.xlu1 %4288, %v4351_v24  }
 0x30c   : > { %v6696_v18 = vpop.permute.xlu1 %2674 }
 0x30d   : > { %8396 = vst [vmem:[#allocation116_spill] sm:$0xff] %v6696_v18  ;;  %4289 = vset.pattern.permute.xlu1 %v8353_v25  ;;  %v6710_v18 = vpop.permute.xlu0 %2258 }
 0x30e   : > { %3429 = vperm.xlu1 %4289, %v4045_v50   ;;  %8401 = vst [vmem:[#allocation22_spill] sm:$0xff] %v6710_v18 }
 0x310   : > { %v6701_v41 = vpop.permute.xlu1 %2682 }
 0x311   : > { %8398 = vst [vmem:[#allocation114_spill] sm:$0xff] %v6701_v41  ;;  %v6716_v50 = vpop.permute.xlu0 %2268 }
 0x312   : > { %4290 = vset.pattern.permute.xlu1 %v8360_v39  ;;  %8403 = vst [vmem:[#allocation112_spill] sm:$0xff] %v6716_v50 }
 0x313   : > { %3068 = vperm.xlu1 %4290, %v4352_v1  }
 0x315   : > { %v6707_v51 = vpop.permute.xlu1 %3003  ;;  %v6723_v38 = vpop.permute.xlu0 %2278 }
 0x316   : > { %8400 = vst [vmem:[#allocation90_spill] sm:$0xff] %v6707_v51  ;;  %8406 = vst [vmem:[#allocation26_spill] sm:$0xff] %v6723_v38 }
 0x317   : > { %4291 = vset.pattern.permute.xlu1 %v8353_v25 }
 0x318   : > { %3433 = vperm.xlu1 %4291, %v4351_v24  }
 0x31a   : > { %v6712_v52 = vpop.permute.xlu1 %3189 }
 0x31b   : > { %8402 = vst [vmem:[#allocation10_spill] sm:$0xff] %v6712_v52  ;;  %v4050_v52 = vld [vmem:[%s4540_s14 + $0x388] sm:$0xff] }
 0x31c   : > { %4292 = vset.pattern.permute.xlu1 %v8363_v15 }
 0x31d   : > { %3249 = vperm.xlu1 %4292, %v6399_v23   ;;  %v6730_v23 = vpop.permute.xlu0 %2288 }
 0x31e   : > { %8408 = vst [vmem:[#allocation115_spill] sm:$0xff] %v6730_v23 }
 0x31f   : > { %v6718_v41 = vpop.permute.xlu1 %3008 }
 0x320   : > { %8404 = vst [vmem:[#allocation88_spill] sm:$0xff] %v6718_v41 }
 0x321   : > { %4293 = vset.pattern.permute.xlu1 %v8353_v25 }
 0x322   : > { %3437 = vperm.xlu1 %4293, %v4352_v1   ;;  %v6736_v1 = vpop.permute.xlu0 %2298 }
 0x323   : > { %8410 = vst [vmem:[#allocation29_spill] sm:$0xff] %v6736_v1  ;;  %v4354_v1 = vld [vmem:[%s4540_s14 + $0x398] sm:$0xff] }
 0x324   : > { %v6721_v51 = vpop.permute.xlu1 %3197 }
 0x325   : > { %8405 = vst [vmem:[#allocation120_spill] sm:$0xff] %v6721_v51 }
 0x326   : > { %4294 = vset.pattern.permute.xlu1 %v8363_v15  ;;  %v6742_v38 = vpop.permute.xlu0 %2308 }
 0x327   : > { %3253 = vperm.xlu1 %4294, %v6417_v56   ;;  %8412 = vst [vmem:[#allocation89_spill] sm:$0xff] %v6742_v38  ;;  %v6759_v38 = vld [vmem:[%s4908_s29] sm:$0x7]  ;;  %s302_s29 = scalar_lea.vmem [#allocation2], %s3956_s26 }
 0x329   : > { %v6727_v24 = vpop.permute.xlu1 %3385 }
 0x32a   : > { %8407 = vst [vmem:[#allocation118_spill] sm:$0xff] %v6727_v24  ;;  %v4353_v24 = vld [vmem:[%s4540_s14 + $0x390] sm:$0xff] }
 0x32b   : > { %4295 = vset.pattern.permute.xlu1 %v8360_v39 }
 0x32c   : > { %3083 = vperm.xlu1 %4295, %v4050_v52  }
 0x32e   : > { %v6733_v41 = vpop.permute.xlu1 %3013 }
 0x32f   : > { %8409 = vst [vmem:[#allocation23_spill] sm:$0xff] %v6733_v41  ;;  %v6747_v41 = vpop.permute.xlu0 %2318 }
 0x330   : > { %4296 = vset.pattern.permute.xlu1 %v8363_v15 }
 0x331   : > { %3257 = vperm.xlu1 %4296, %v4050_v52  }
 0x333   : > { %v6738_v51 = vpop.permute.xlu1 %3389  ;;  %v6755_v18 = vpop.permute.xlu0 %2328 }
 0x334   : > { %8411 = vst [vmem:[#allocation119_spill] sm:$0xff] %v6738_v51  ;;  %8416 = vst [vmem:[#allocation92_spill] sm:$0xff] %v6755_v18 }
 0x335   : > { %4297 = vset.pattern.permute.xlu1 %v8360_v39 }
 0x336   : > { %3088 = vperm.xlu1 %4297, %v4353_v24  }
 0x338   : > { %v6744_v23 = vpop.permute.xlu1 %3018 }
 0x339   : > { %8413 = vst [vmem:[#allocation91_spill] sm:$0xff] %v6744_v23  ;;  %v8417_v23 = vld [vmem:[#allocation117_spill] sm:$0xff] }
 0x33a   : > { %4298 = vset.pattern.permute.xlu1 %v8353_v25 }
 0x33b   : > { %3449 = vperm.xlu1 %4298, %v4050_v52   ;;  %v6763_v52 = vrot.slane %v6759_v38, %v8417_v23 }
 0x33d   : > { %v6749_v50 = vpop.permute.xlu1 %3393  ;;  %8418 = vst [vmem:[#allocation93_spill] sm:$0xff] %v6763_v52 }
 0x33e   : > { %8414 = vst [vmem:[#allocation123_spill] sm:$0xff] %v6749_v50  ;;  %v6767_v50 = vpop.permute.xlu0 %2338 }
 0x33f   : > { %4299 = vset.pattern.permute.xlu1 %v8360_v39  ;;  %8420 = vst [vmem:[#allocation94_spill] sm:$0xff] %v6767_v50 }
 0x340   : > { %3093 = vperm.xlu1 %4299, %v4354_v1  }
 0x342   : > { %v6753_v51 = vpop.permute.xlu1 %3209 }
 0x343   : > { %8415 = vst [vmem:[#allocation122_spill] sm:$0xff] %v6753_v51 }
 0x344   : > { %4300 = vset.pattern.permute.xlu1 %v8353_v25 }
 0x345   : > { %3453 = vperm.xlu1 %4300, %v4353_v24  }
 0x347   : > { %v6765_v63 = vpop.permute.xlu1 %3397  ;;  %v2084_v34 = vpop.f32.mrb[2].mxu1 }
 0x348   : > { %8419 = vst [vmem:[#allocation121_spill] sm:$0xff] %v6765_v63  ;;  %v6771_v51 = vadd.f32 %v2084_v34, %v6763_v52  ;;  %v4124_v24 = vpop.f32.mrb[3].mxu1  ;;  %v6781_v63 = vpop.permute.xlu0 %2348 }
 0x349   : > { %4301 = vset.pattern.permute.xlu1 %v8363_v15  ;;  %8424 = vst [vmem:[#allocation24_spill] sm:$0xff] %v6781_v63  ;;  %v8435_v63 = vld [vmem:[#allocation37_spill] sm:$0xff] }
 0x34a   : > { %8421 = vst [vmem:[#allocation35_spill] sm:$0xff] %v6771_v51  ;;  %3269 = vperm.xlu1 %4301, %v6430_v49   ;;  %4134 = vmatmul.mubr.msk.f32.vlgmr.msra.gmra.mrb[0].mxu0 %vm2092_vm4, %v6771_v51  ;;  %v4055_v51 = vld [vmem:[%s4540_s14 + $0x3b0] sm:$0xff] }
 0x34b   : > { %4152 = vmatprep.mubr.msk.f32.mxu0 %vm4432_vm0, %v8423_v46 }
 0x34c   : > { %v6776_v18 = vpop.permute.xlu1 %3213  ;;  %v6787_v34 = vpop.permute.xlu0 %2358 }
 0x34d   : > { %8422 = vst [vmem:[#allocation125_spill] sm:$0xff] %v6776_v18  ;;  %8426 = vst [vmem:[#allocation96_spill] sm:$0xff] %v6787_v34 }
 0x34e   : > { %4302 = vset.pattern.permute.xlu1 %v8353_v25 }
 0x34f   : > { %3457 = vperm.xlu1 %4302, %v4354_v1  }
 0x350   : > { %v6793_v46 = vpop.permute.xlu0 %2998 }
 0x351   : > { %v6783_v50 = vpop.permute.xlu1 %3033  ;;  %8428 = vst [vmem:[#allocation25_spill] sm:$0xff] %v6793_v46  ;;  %v4000_v46 = vld [vmem:[%s5275_s15 + $0x4] sm:$0x7]  ;;  %s3832_s15 = scalar_lea.sflag [#allocation3], %s300_s17 }
 0x352   : > { %8425 = vst [vmem:[#allocation95_spill] sm:$0xff] %v6783_v50  ;;  %v6813_v19 = vrot.slane %v4000_v46, %v8435_v63  ;;  %v6817_v40 = vrot.slane %v4000_v46, %v8437_v5 }
 0x353   : > { %4303 = vset.pattern.permute.xlu1 %v8363_v15 }
 0x354   : > { %3273 = vperm.xlu1 %4303, %v6445_v4   ;;  %v6800_v50 = vpop.permute.xlu0 %3023  ;;  %8436 = vst [vmem:[#allocation14_spill] sm:$0xff] %v6813_v19 }
 0x355   : > { %8431 = vst [vmem:[#allocation98_spill] sm:$0xff] %v6800_v50 }
 0x356   : > { %v6789_v24 = vpop.permute.xlu1 %3217 }
 0x357   : > { %8427 = vst [vmem:[#allocation13_spill] sm:$0xff] %v6789_v24  ;;  %v4356_v24 = vld [vmem:[%s4540_s14 + $0x3b8] sm:$0xff] }
 0x358   : > { %4304 = vset.pattern.permute.xlu1 %v8360_v39  ;;  %v6806_v34 = vpop.permute.xlu0 %3028 }
 0x359   : > { %3108 = vperm.xlu1 %4304, %v4055_v51   ;;  %8433 = vst [vmem:[#allocation18_spill] sm:$0xff] %v6806_v34 }
 0x35b   : > { %v6795_v1 = vpop.permute.xlu1 %3038 }
 0x35c   : > { %8429 = vst [vmem:[#allocation12_spill] sm:$0xff] %v6795_v1  ;;  %v3049_v50 = vpop.permute.xlu0 %3048 }
 0x35d   : > { %4305 = vset.pattern.permute.xlu1 %v8363_v15 }
 0x35e   : > { %3277 = vperm.xlu1 %4305, %v4055_v51  }
 0x360   : > { %v6798_v52 = vpop.permute.xlu1 %3409 }
 0x361   : > { %8430 = vst [vmem:[#allocation97_spill] sm:$0xff] %v6798_v52  ;;  %v4357_v52 = vld [vmem:[%s4540_s14 + $0x2b8] sm:$0xff] }
 0x362   : > { %4306 = vset.pattern.permute.xlu1 %v8360_v39 }
 0x363   : > { %3113 = vperm.xlu1 %4306, %v4356_v24  }
 0x365   : > { %v6804_v18 = vpop.permute.xlu1 %3043 }
 0x366   : > { %8432 = vst [vmem:[#allocation124_spill] sm:$0xff] %v6804_v18  ;;  %v3166_v18 = vmul.f32 %v3049_v50, %v6813_v19 }
 0x367   : > { %4308 = vset.pattern.permute.xlu1 %v8353_v25 }
 0x368   : > { %3469 = vperm.xlu1 %4308, %v4055_v51  }
 0x36a   : > { %v6810_v1 = vpop.permute.xlu1 %3413 }
 0x36b   : > { %8434 = vst [vmem:[#allocation100_spill] sm:$0xff] %v6810_v1 }
 0x36c   : > { %2686 = vperm.xlu1 %4308, %v4357_v52   ;;  %v3054_v52 = vpop.permute.xlu0 %3053 }
 0x36d   : > { %v3167_v57 = vmul.f32 %v3054_v52, %v6813_v19 }
 0x36f   : > { %v3230_v43 = vpop.permute.xlu1 %3229 }
 0x370   : > { %4309 = vset.pattern.permute.xlu1 %v8363_v15  ;;  %v3326_v51 = vmul.f32 %v3230_v43, %v6817_v40 }
 0x371   : > { %3285 = vperm.xlu1 %4309, %v6464_v59  }
 0x372   : > { %v6823_v1 = vadd.f32 %v3326_v51, %v3166_v18 }
 0x374   : > { %8438 = vst [vmem:[#allocation33_spill] sm:$0xff] %v6823_v1  ;;  %v6825_v34 = vpop.permute.xlu1 %3417  ;;  %v4358_v1 = vld [vmem:[%s4540_s14 + $0x2c8] sm:$0xff] }
 0x375   : > { %8439 = vst [vmem:[#allocation102_spill] sm:$0xff] %v6825_v34  ;;  %4310 = vset.pattern.permute.xlu1 %v8353_v25 }
 0x376   : > { %3473 = vperm.xlu1 %4310, %v4356_v24  }
 0x379   : > { %v3234_v50 = vpop.permute.xlu1 %3233 }
 0x37a   : > { %4311 = vset.pattern.permute.xlu1 %v8360_v39  ;;  %v3327_v45 = vmul.f32 %v3234_v50, %v6817_v40 }
 0x37b   : > { %3123 = vperm.xlu1 %4311, %v4058_v17  }
 0x37c   : > { %v6832_v43 = vadd.f32 %v3327_v45, %v3167_v57  ;;  %v6842_v45 = vrot.slane %v4000_v46, %v8417_v23  ;;  %v3329_v23 = vmul.f32 %v6591_v33, %v6817_v40  ;;  %v3330_v33 = vmul.f32 %v6597_v20, %v6817_v40 }
 0x37e   : > { %8440 = vst [vmem:[#allocation63_spill] sm:$0xff] %v6832_v43  ;;  %v3059_v18 = vpop.permute.xlu1 %3058 }
 0x37f   : > { %4312 = vset.pattern.permute.xlu1 %v8363_v15  ;;  %v3168_v51 = vmul.f32 %v3059_v18, %v6813_v19 }
 0x380   : > { %3289 = vperm.xlu1 %4312, %v4058_v17  }
 0x383   : > { %v3238_v24 = vpop.permute.xlu1 %3237 }
 0x384   : > { %4313 = vset.pattern.permute.xlu1 %v8353_v25  ;;  %v3328_v52 = vmul.f32 %v3238_v24, %v6817_v40  ;;  %v6849_v24 = vld [vmem:[%s4540_s14 + $0x3d8] sm:$0xff] }
 0x385   : > { %2694 = vperm.xlu1 %4313, %v4358_v1  }
 0x386   : > { %v3360_v34 = vadd.f32 %v3328_v52, %v3168_v51 }
 0x388   : > { %v3064_v26 = vpop.permute.xlu1 %3063 }
 0x389   : > { %4314 = vset.pattern.permute.xlu1 %v8363_v15  ;;  %v3169_v51 = vmul.f32 %v3064_v26, %v6813_v19 }
 0x38a   : > { %3293 = vperm.xlu1 %4314, %v6473_v48  }
 0x38b   : > { %v3361_v52 = vadd.f32 %v3329_v23, %v3169_v51 }
 0x38d   : > { %v3430_v57 = vpop.permute.xlu1 %3429 }
 0x38e   : > { %v3520_v50 = vmul.f32 %v3430_v57, %v6842_v45  ;;  %4315 = vset.pattern.permute.xlu1 %v8353_v25 }
 0x38f   : > { %3481 = vperm.xlu1 %4315, %v4058_v17   ;;  %v3074_v17 = vpop.permute.xlu0 %3073 }
 0x390   : > { %v6846_v18 = vadd.f32 %v3520_v50, %v3360_v34  ;;  %v3171_v50 = vmul.f32 %v3074_v17, %v6813_v19 }
 0x392   : > { %8441 = vst [vmem:[#allocation11_spill] sm:$0xff] %v6846_v18  ;;  %v3069_v1 = vpop.permute.xlu1 %3068 }
 0x393   : > { %4316 = vset.pattern.permute.xlu1 %v8360_v39  ;;  %v3170_v26 = vmul.f32 %v3069_v1, %v6813_v19  ;;  %v3079_v36 = vpop.permute.xlu0 %3078 }
 0x394   : > { %3133 = vperm.xlu1 %4316, %v6849_v24  }
 0x395   : > { %v3362_v23 = vadd.f32 %v3330_v33, %v3170_v26 }
 0x397   : > { %v3434_v46 = vpop.permute.xlu1 %3433 }
 0x398   : > { %v3521_v57 = vmul.f32 %v3434_v46, %v6842_v45  ;;  %4317 = vset.pattern.permute.xlu1 %v8363_v15 }
 0x39a   : > { %v6858_v34 = vadd.f32 %v3521_v57, %v3361_v52  ;;  %v3172_v52 = vmul.f32 %v3079_v36, %v6813_v19 }
 0x39c   : > { %8442 = vst [vmem:[#allocation27_spill] sm:$0xff] %v6858_v34  ;;  %v3250_v18 = vpop.permute.xlu1 %3249 }
 0x39d   : > { %v3331_v43 = vmul.f32 %v3250_v18, %v6817_v40 }
 0x39f   : > { %v6863_v10 = vadd.f32 %v3331_v43, %v3171_v50 }
 0x3a1   : > { %8443 = vst [vmem:[#allocation40_spill] sm:$0xff] %v6863_v10  ;;  %v3438_v51 = vpop.permute.xlu1 %3437 }
 0x3a2   : > { %v3522_v46 = vmul.f32 %v3438_v51, %v6842_v45 }
 0x3a4   : > { %v6868_v11 = vadd.f32 %v3522_v46, %v3362_v23 }
 0x3a6   : > { %8444 = vst [vmem:[#allocation47_spill] sm:$0xff] %v6868_v11  ;;  %v3254_v57 = vpop.permute.xlu1 %3253 }
 0x3a7   : > { %v3332_v17 = vmul.f32 %v3254_v57, %v6817_v40 }
 0x3a9   : > { %v6872_v18 = vadd.f32 %v3332_v17, %v3172_v52  ;;  %v3334_v52 = vmul.f32 %v6658_v16, %v6817_v40 }
 0x3ab   : > { %8445 = vst [vmem:[#allocation41_spill] sm:$0xff] %v6872_v18  ;;  %v3084_v1 = vpop.permute.xlu1 %3083  ;;  %v3099_v18 = vpop.permute.xlu0 %3098 }
 0x3ac   : > { %v3173_v43 = vmul.f32 %v3084_v1, %v6813_v19 }
 0x3b0   : > { %v3258_v50 = vpop.permute.xlu1 %3257 }
 0x3b1   : > { %v3333_v20 = vmul.f32 %v3258_v50, %v6817_v40 }
 0x3b3   : > { %v3365_v34 = vadd.f32 %v3333_v20, %v3173_v43  ;;  %v3176_v43 = vmul.f32 %v3099_v18, %v6813_v19 }
 0x3b5   : > { %v3089_v26 = vpop.permute.xlu1 %3088 }
 0x3b6   : > { %v3174_v36 = vmul.f32 %v3089_v26, %v6813_v19  ;;  %v3335_v26 = vmul.f32 %v6666_v53, %v6817_v40 }
 0x3b8   : > { %v3366_v17 = vadd.f32 %v3334_v52, %v3174_v36  ;;  %v3104_v52 = vpop.permute.xlu0 %3103 }
 0x3ba   : > { %v3450_v33 = vpop.permute.xlu1 %3449 }
 0x3bb   : > { %v3525_v51 = vmul.f32 %v3450_v33, %v6842_v45 }
 0x3bd   : > { %v6877_v23 = vadd.f32 %v3525_v51, %v3365_v34 }
 0x3bf   : > { %8446 = vst [vmem:[#allocation43_spill] sm:$0xff] %v6877_v23  ;;  %v3094_v46 = vpop.permute.xlu1 %3093 }
 0x3c0   : > { %v3175_v34 = vmul.f32 %v3094_v46, %v6813_v19 }
 0x3c2   : > { %v3367_v51 = vadd.f32 %v3335_v26, %v3175_v34 }
 0x3c4   : > { %v3454_v57 = vpop.permute.xlu1 %3453 }
 0x3c5   : > { %v3526_v1 = vmul.f32 %v3454_v57, %v6842_v45 }
 0x3c7   : > { %v6883_v11 = vadd.f32 %v3526_v1, %v3366_v17  ;;  %v3177_v17 = vmul.f32 %v3104_v52, %v6813_v19 }
 0x3c9   : > { %8447 = vst [vmem:[#allocation28_spill] sm:$0xff] %v6883_v11  ;;  %v3270_v50 = vpop.permute.xlu1 %3269 }
 0x3ca   : > { %v3336_v20 = vmul.f32 %v3270_v50, %v6817_v40 }
 0x3cc   : > { %v6888_v33 = vadd.f32 %v3336_v20, %v3176_v43 }
 0x3ce   : > { %8448 = vst [vmem:[#allocation5_spill] sm:$0xff] %v6888_v33  ;;  %v3458_v16 = vpop.permute.xlu1 %3457 }
 0x3cf   : > { %v3527_v36 = vmul.f32 %v3458_v16, %v6842_v45  ;;  %v2388_v16 = vmul.f32 %v6813_v19, %v6747_v41 }
 0x3d1   : > { %v6893_v57 = vadd.f32 %v3527_v36, %v3367_v51  ;;  %v2552_v51 = vmul.f32 %v6817_v40, %v6635_v2  ;;  %v3339_v2 = vmul.f32 %v6671_v35, %v6817_v40 }
 0x3d3   : > { %8449 = vst [vmem:[#allocation17_spill] sm:$0xff] %v6893_v57  ;;  %v3274_v18 = vpop.permute.xlu1 %3273 }
 0x3d4   : > { %v3337_v1 = vmul.f32 %v3274_v18, %v6817_v40  ;;  %v2584_v18 = vadd.f32 %v2552_v51, %v2388_v16 }
 0x3d6   : > { %v6897_v50 = vadd.f32 %v3337_v1, %v3177_v17 }
 0x3d8   : > { %8450 = vst [vmem:[#allocation46_spill] sm:$0xff] %v6897_v50  ;;  %v3109_v46 = vpop.permute.xlu1 %3108 }
 0x3d9   : > { %v3178_v43 = vmul.f32 %v3109_v46, %v6813_v19  ;;  %v3119_v46 = vpop.permute.xlu0 %3118 }
 0x3dd   : > { %v3278_v20 = vpop.permute.xlu1 %3277 }
 0x3de   : > { %v3338_v53 = vmul.f32 %v3278_v20, %v6817_v40 }
 0x3e0   : > { %v3370_v33 = vadd.f32 %v3338_v53, %v3178_v43  ;;  %v3180_v43 = vmul.f32 %v3119_v46, %v6813_v19  ;;  %v6923_v46 = vpop.permute.xlu0 %3128 }
 0x3e2   : > { %v3114_v34 = vpop.permute.xlu1 %3113 }
 0x3e3   : > { %v3179_v41 = vmul.f32 %v3114_v34, %v6813_v19 }
 0x3e7   : > { %v3470_v26 = vpop.permute.xlu1 %3469 }
 0x3e8   : > { %v3530_v36 = vmul.f32 %v3470_v26, %v6842_v45  ;;  %v3371_v26 = vadd.f32 %v3339_v2, %v3179_v41  ;;  %v4363_v41 = vld [vmem:[%s4540_s14 + $0x2e8] sm:$0xff] }
 0x3ea   : > { %v6906_v52 = vadd.f32 %v3530_v36, %v3370_v33  ;;  %v2091_v36 = vrot.slane %v6759_v38, %v8437_v5 }
 0x3eb   : > { %v2687_v17 = vpop.permute.xlu1 %2686 }
 0x3ec   : > { %8451 = vst [vmem:[#allocation49_spill] sm:$0xff] %v6906_v52  ;;  %v2748_v1 = vmul.f32 %v6842_v45, %v2687_v17  ;;  %v8480_v52 = vld [vmem:[#allocation108_spill] sm:$0xff] }
 0x3ee   : > { %v6909_v50 = vadd.f32 %v2748_v1, %v2584_v18 }
 0x3f0   : > { %8452 = vst [vmem:[#allocation30_spill] sm:$0xff] %v6909_v50  ;;  %v3286_v20 = vpop.permute.xlu1 %3285  ;;  %v8487_v50 = vld [vmem:[#allocation75_spill] sm:$0xff] }
 0x3f1   : > { %v3340_v53 = vmul.f32 %v3286_v20, %v6817_v40  ;;  %v4062_v20 = vld [vmem:[%s4540_s14 + $0x3e8] sm:$0xff] }
 0x3f3   : > { %v6914_v57 = vadd.f32 %v3340_v53, %v3180_v43  ;;  %v6935_v43 = vpop.permute.xlu0 %3138 }
 0x3f5   : > { %8453 = vst [vmem:[#allocation16_spill] sm:$0xff] %v6914_v57  ;;  %v3474_v33 = vpop.permute.xlu1 %3473  ;;  %v8478_v57 = vld [vmem:[#allocation73_spill] sm:$0xff] }
 0x3f6   : > { %v3531_v16 = vmul.f32 %v3474_v33, %v6842_v45  ;;  %v4364_v33 = vld [vmem:[%s4540_s14 + $0x2f0] sm:$0xff] }
 0x3f7   : > { %v6941_v38 = vpop.permute.xlu0 %3148 }
 0x3f8   : > { %v6919_v51 = vadd.f32 %v3531_v16, %v3371_v26  ;;  %v4064_v26 = vld [vmem:[%s4540_s14 + $0x3f8] sm:$0xff] }
 0x3fa   : > { %8454 = vst [vmem:[#allocation52_spill] sm:$0xff] %v6919_v51  ;;  %v8479_v51 = vld [vmem:[#allocation109_spill] sm:$0xff] }
 0x41d   : > { %v2162_v17 = vpop.f32.mrb[0].mxu0 }
 0x41e   : > { %v2163_v18 = vadd.f32 %v2162_v17, %v2091_v36  ;;  %v4135_v1 = vpop.f32.mrb[1].mxu0  ;;  %v2530_v36 = vmul.f32 %v6817_v40, %v6271_v3  ;;  %v2537_v17 = vmul.f32 %v6817_v40, %v6361_v6  ;;  %v2543_v3 = vmul.f32 %v6817_v40, %v6439_v54 }
 0x41f   : > { %v2541_v1 = vmul.f32 %v6817_v40, %v6414_v14  ;;  %v2549_v6 = vmul.f32 %v6817_v40, %v6494_v44  ;;  %v2366_v14 = vmul.f32 %v6813_v19, %v6482_v47  ;;  %v2555_v54 = vmul.f32 %v6817_v40, %v6522_v13 }
 0x420   : > { %v6926_v34 = vrot.slane %v2163_v18, %v8435_v63  ;;  %v6929_v35 = vrot.slane %v2163_v18, %v8437_v5  ;;  %v4359_v5 = vld [vmem:[%s4540_s14 + $0x2d8] sm:$0xff]  ;;  %v6947_v63 = vpop.permute.xlu0 %2594  ;;  %v2371_v44 = vmul.f32 %v6813_v19, %v6508_v21  ;;  %v2373_v47 = vmul.f32 %v6813_v19, %v6513_v60 }
 0x421   : > { %v4365_v18 = vld [vmem:[%s4540_s14 + $0x2f8] sm:$0xff]  ;;  %v2375_v13 = vmul.f32 %v6813_v19, %v6519_v55  ;;  %v7038_v21 = vmul.f32 %v6565_v37, %v6817_v40 }
 0x422   : > { %8455 = vst [vmem:[#allocation61_spill] sm:$0xff] %v6926_v34  ;;  %8456 = vst [vmem:[#allocation48_spill] sm:$0xff] %v6929_v35  ;;  %2826 = vrot.lane.b32.xlu1 %v6926_v34, %s4436_s10  ;;  %3609 = vrot.lane.b32.xlu0 %v6929_v35, %s4436_s10  ;;  %v8460_v60 = vld [vmem:[#allocation71_spill] sm:$0xff]  ;;  %v8488_v35 = vld [vmem:[#allocation26_spill] sm:$0xff]  ;;  %s3845_s10 = sshll.u32 %s302_s29, 4  ;;  %s7886_s10 = int_to_ptr.vmem [resolvable:$true] %s3845_s10 }
 0x423   : > { %8459 = vst [vmem:[#allocation31_spill] sm:$0xff] %v7038_v21  ;;  %v8462_v55 = vld [vmem:[#allocation99_spill] sm:$0xff]  ;;  %v8492_v34 = vld [vmem:[#allocation29_spill] sm:$0xff]  ;;  %s4366_s25 = scalar_lea.vmem %s7886_s10, 32  ;;  %p4373_p0 = scmp.lt.s32.totalorder %s7886_s10, %s4371_s18 }
 0x424   : > { %p4367_p11 = scmp.ne.s32.totalorder %s7886_s10, %s4366_s25  ;;  %p4374_p1 = scmp.lt.s32.totalorder %s4372_s19, %s4366_s25 }
 0x426   : > { %3297 = vperm.xlu1 %4317, %v6849_v24   ;;  %3445 = vperm.xlu0 %4324, %v6417_v56   ;;  %v4360_v56 = vld [vmem:[%s4540_s14 + $0x2c0] sm:$0xff]  ;;  %p4368_p12 = pnand %p4367_p11, %p4513_p5  ;;  %p4375_p2 = por %p4374_p1, %p4373_p0 }
 0x428   : > { %p4369_p13 = pneg %p4368_p12 }
 0x42a   : > { %4318 = vset.pattern.permute.xlu1 %v8353_v25  ;;  %3461 = vperm.xlu0 %4324, %v6430_v49   ;;  %v6953_v49 = vpop.permute.xlu0 %2606  ;;  %p4376_p3 = pnand %p4375_p2, %p4369_p13 }
 0x42b   : > { %2702 = vperm.xlu1 %4318, %v4359_v5   ;;  %v7046_v5 = vmul.f32 %v8460_v60, %v6817_v40  ;;  %v8467_v60 = vld [vmem:[#allocation67_spill] sm:$0xff] }
 0x42d   : > { %8461 = vst [vmem:[#allocation53_spill] sm:$0xff] %v7046_v5 }
 0x42e   : > { %3465 = vperm.xlu0 %4324, %v6445_v4   ;;  %v4361_v4 = vld [vmem:[%s4540_s14 + $0x2d0] sm:$0xff]  ;;  %v6958_v53 = vpop.permute.xlu0 %2614 }
 0x42f   : > { %4319 = vset.pattern.permute.xlu1 %v8363_v15 }
 0x430   : > { %3301 = vperm.xlu1 %4319, %v6486_v9  }
 0x432   : > { %2690 = vperm.xlu0 %4324, %v4360_v56   ;;  %v7050_v56 = vmul.f32 %v8462_v55, %v6817_v40 }
 0x434   : > { %4320 = vset.pattern.permute.xlu1 %v8353_v25  ;;  %8463 = vst [vmem:[#allocation55_spill] sm:$0xff] %v7050_v56 }
 0x435   : > { %3489 = vperm.xlu1 %4320, %v6849_v24   ;;  %v4362_v24 = vld [vmem:[%s4540_s14 + $0x2e0] sm:$0xff]  ;;  %s4438_s14 = smov 32  }
 0x436   : > { %3477 = vperm.xlu0 %4324, %v6464_v59   ;;  %v6963_v59 = vpop.permute.xlu0 %2622 }
 0x439   : > { %4321 = vset.pattern.permute.xlu1 %v8360_v39 }
 0x43a   : > { %3143 = vperm.xlu1 %4321, %v4062_v20   ;;  %2698 = vperm.xlu0 %4324, %v4361_v4   ;;  %v6969_v2 = vpop.permute.xlu0 %2630  ;;  %v8465_v4 = vld [vmem:[#allocation60_spill] sm:$0xff] }
 0x43e   : > { %4322 = vset.pattern.permute.xlu1 %v8363_v15  ;;  %3485 = vperm.xlu0 %4324, %v6473_v48   ;;  %v6975_v48 = vpop.permute.xlu0 %2638 }
 0x43f   : > { %3305 = vperm.xlu1 %4322, %v4062_v20  }
 0x442   : > { %2706 = vperm.xlu0 %4324, %v4362_v24   ;;  %v2367_v24 = vmul.f32 %v6813_v19, %v8465_v4 }
 0x443   : > { %4323 = vset.pattern.permute.xlu1 %v8353_v25 }
 0x444   : > { %2710 = vperm.xlu1 %4323, %v4363_v41  }
 0x446   : > { %3493 = vperm.xlu0 %4324, %v6486_v9   ;;  %v6979_v9 = vpop.permute.xlu0 %2646 }
 0x448   : > { %4325 = vset.pattern.permute.xlu1 %v8363_v15 }
 0x449   : > { %3309 = vperm.xlu1 %4325, %v6497_v32  }
 0x44a   : > { %2714 = vperm.xlu0 %4324, %v4364_v33   ;;  %v6982_v16 = vpop.permute.xlu0 %2654 }
 0x44d   : > { %4326 = vset.pattern.permute.xlu1 %v8353_v25 }
 0x44e   : > { %3497 = vperm.xlu1 %4326, %v4062_v20   ;;  %3501 = vperm.xlu0 %4324, %v6497_v32   ;;  %v2533_v32 = vmul.f32 %v6817_v40, %v6300_v30  ;;  %v2545_v30 = vmul.f32 %v6817_v40, %v6461_v0  ;;  %v2557_v0 = vmul.f32 %v6817_v40, %v6533_v27  ;;  %v7030_v27 = vpop.permute.xlu0 %2662  ;;  %v8464_v20 = vld [vmem:[#allocation66_spill] sm:$0xff] }
 0x44f   : > { %v2381_v37 = vmul.f32 %v6813_v19, %v8464_v20 }
 0x452   : > { %4327 = vset.pattern.permute.xlu1 %v8360_v39  ;;  %3505 = vperm.xlu0 %4324, %v4064_v26   ;;  %v2535_v39 = vmul.f32 %v6817_v40, %v6333_v7  ;;  %v2547_v7 = vmul.f32 %v6817_v40, %v6477_v61  ;;  %v2369_v61 = vmul.f32 %v6813_v19, %v6502_v31 }
 0x453   : > { %3153 = vperm.xlu1 %4327, %v4064_v26   ;;  %v7034_v31 = vmul.f32 %v6556_v22, %v6817_v40  ;;  %v7052_v22 = vadd.f32 %v2530_v36, %v2366_v14  ;;  %v2385_v36 = vmul.f32 %v6813_v19, %v8467_v60  ;;  %v8468_v14 = vld [vmem:[#allocation85_spill] sm:$0xff]  ;;  %v8473_v60 = vld [vmem:[#allocation107_spill] sm:$0xff] }
 0x454   : > { %v7060_v41 = vadd.f32 %v2535_v39, %v2371_v44  ;;  %v2365_v55 = vmul.f32 %v6813_v19, %v8468_v14 }
 0x455   : > { %8458 = vst [vmem:[#allocation57_spill] sm:$0xff] %v7034_v31 }
 0x457   : > { %4328 = vset.pattern.permute.xlu1 %v8363_v15  ;;  %v2539_v15 = vmul.f32 %v6817_v40, %v6390_v42  ;;  %v2551_v42 = vmul.f32 %v6817_v40, %v6505_v8  ;;  %v2559_v8 = vmul.f32 %v6817_v40, %v6540_v28  ;;  %v2377_v28 = vmul.f32 %v6813_v19, %v6526_v62 }
 0x458   : > { %3313 = vperm.xlu1 %4328, %v4064_v26   ;;  %v7058_v62 = vadd.f32 %v2533_v32, %v2369_v61  ;;  %v7064_v26 = vadd.f32 %v2537_v17, %v2373_v47  ;;  %v8469_v32 = vld [vmem:[#allocation68_spill] sm:$0xff]  ;;  %v8470_v61 = vld [vmem:[#allocation87_spill] sm:$0xff]  ;;  %v7080_v17 = vadd.f32 %v2545_v30, %v2381_v37 }
 0x459   : > { %v7072_v20 = vadd.f32 %v2541_v1, %v2377_v28  ;;  %v2387_v39 = vmul.f32 %v6813_v19, %v8469_v32  ;;  %v2368_v44 = vmul.f32 %v6813_v19, %v8470_v61  ;;  %v2370_v1 = vmul.f32 %v6813_v19, %v8473_v60  ;;  %v7088_v28 = vpop.permute.xlu0 %2670  ;;  %v8475_v32 = vld [vmem:[#allocation72_spill] sm:$0xff] }
 0x45a   : > { %v2395_v30 = vmul.f32 %v6813_v19, %v8475_v32  ;;  %v8476_v37 = vld [vmem:[#allocation20_spill] sm:$0xff]  ;;  %v2374_v60 = vmul.f32 %v6813_v19, %v8479_v51  ;;  %v8483_v32 = vld [vmem:[#allocation74_spill] sm:$0xff]  ;;  %v2534_v51 = vmul.f32 %v6817_v40, %v8487_v50 }
 0x45b   : > { %v2372_v61 = vmul.f32 %v6813_v19, %v8476_v37  ;;  %v2532_v23 = vmul.f32 %v6817_v40, %v8483_v32  ;;  %v8484_v37 = vld [vmem:[#allocation112_spill] sm:$0xff] }
 0x45c   : > { %4329 = vset.pattern.permute.xlu1 %v8353_v25  ;;  %v2553_v25 = vmul.f32 %v6817_v40, %v6515_v12  ;;  %v7024_v12 = vmul.f32 %v6549_v58, %v6817_v40  ;;  %v2379_v58 = vmul.f32 %v6813_v19, %v6531_v29  ;;  %v8466_v29 = vld [vmem:[#allocation56_spill] sm:$0xff] }
 0x45d   : > { %2718 = vperm.xlu1 %4329, %v4365_v18   ;;  %v2383_v33 = vmul.f32 %v6813_v19, %v8466_v29  ;;  %v7066_v18 = vadd.f32 %v2539_v15, %v2375_v13  ;;  %v8471_v15 = vld [vmem:[#allocation69_spill] sm:$0xff]  ;;  %v8472_v13 = vld [vmem:[#allocation70_spill] sm:$0xff] }
 0x45e   : > { %8457 = vst [vmem:[#allocation36_spill] sm:$0xff] %v7024_v12  ;;  %v7074_v4 = vadd.f32 %v2543_v3, %v2379_v58  ;;  %v2389_v47 = vmul.f32 %v6813_v19, %v8471_v15  ;;  %v2391_v29 = vmul.f32 %v6813_v19, %v8472_v13  ;;  %v8474_v58 = vld [vmem:[#allocation6_spill] sm:$0xff]  ;;  %v7098_v15 = vadd.f32 %v2549_v6, %v2385_v36  ;;  %v8508_v12 = vld [vmem:[#allocation96_spill] sm:$0xff] }
 0x45f   : > { %v7090_v3 = vadd.f32 %v2547_v7, %v2383_v33  ;;  %v2393_v14 = vmul.f32 %v6813_v19, %v8474_v58  ;;  %v2529_v13 = vmul.f32 %v6817_v40, %v8478_v57  ;;  %v2531_v7 = vmul.f32 %v6817_v40, %v8480_v52  ;;  %v8482_v58 = vld [vmem:[#allocation22_spill] sm:$0xff] }
 0x460   : > { %8477 = vst [vmem:[#allocation62_spill] sm:$0xff] %v7098_v15  ;;  %v7106_v33 = vadd.f32 %v2551_v42, %v2387_v39  ;;  %v2376_v11 = vmul.f32 %v6813_v19, %v8482_v58  ;;  %v2378_v6 = vmul.f32 %v6813_v19, %v8484_v37  ;;  %v7114_v36 = vadd.f32 %v2553_v25, %v2389_v47  ;;  %v8491_v58 = vld [vmem:[#allocation115_spill] sm:$0xff] }
 0x461   : > { %v7116_v57 = vadd.f32 %v2555_v54, %v2391_v29  ;;  %v2380_v52 = vmul.f32 %v6813_v19, %v8488_v35  ;;  %v7122_v42 = vadd.f32 %v2557_v0, %v2393_v14  ;;  %v7124_v39 = vadd.f32 %v2559_v8, %v2395_v30  ;;  %v8493_v54 = vld [vmem:[#allocation76_spill] sm:$0xff]  ;;  %v8495_v0 = vld [vmem:[#allocation101_spill] sm:$0xff] }
 0x462   : > { %8481 = vst [vmem:[#allocation54_spill] sm:$0xff] %v7106_v33  ;;  %8485 = vst [vmem:[#allocation19_spill] sm:$0xff] %v7114_v36  ;;  %v2382_v32 = vmul.f32 %v6813_v19, %v8491_v58  ;;  %v2384_v37 = vmul.f32 %v6813_v19, %v8492_v34  ;;  %v2561_v25 = vadd.f32 %v2529_v13, %v2365_v55  ;;  %v7134_v36 = vpop.permute.xlu0 %2678  ;;  %v8496_v14 = vld [vmem:[#allocation77_spill] sm:$0xff]  ;;  %v8497_v58 = vld [vmem:[#allocation92_spill] sm:$0xff] }
 0x463   : > { %8486 = vst [vmem:[#allocation32_spill] sm:$0xff] %v7116_v57  ;;  %8489 = vst [vmem:[#allocation64_spill] sm:$0xff] %v7122_v42  ;;  %v2563_v47 = vadd.f32 %v2531_v7, %v2367_v24  ;;  %v2536_v29 = vmul.f32 %v6817_v40, %v8493_v54  ;;  %v8494_v57 = vld [vmem:[#allocation89_spill] sm:$0xff]  ;;  %v2564_v35 = vadd.f32 %v2532_v23, %v2368_v44  ;;  %v8498_v24 = vld [vmem:[#allocation79_spill] sm:$0xff] }
 0x464   : > { %8490 = vst [vmem:[#allocation50_spill] sm:$0xff] %v7124_v39  ;;  %v2386_v50 = vmul.f32 %v6813_v19, %v8494_v57  ;;  %v2538_v8 = vmul.f32 %v6817_v40, %v8495_v0  ;;  %v2540_v30 = vmul.f32 %v6817_v40, %v8496_v14  ;;  %v2390_v34 = vmul.f32 %v6813_v19, %v8497_v58  ;;  %v8499_v7 = vld [vmem:[#allocation94_spill] sm:$0xff]  ;;  %v8500_v57 = vld [vmem:[#allocation24_spill] sm:$0xff]  ;;  %v8502_v0 = vld [vmem:[#allocation7_spill] sm:$0xff] }
 0x465   : > { %v2566_v55 = vadd.f32 %v2534_v51, %v2370_v1  ;;  %v2542_v13 = vmul.f32 %v6817_v40, %v8498_v24  ;;  %v2392_v54 = vmul.f32 %v6813_v19, %v8499_v7  ;;  %v2394_v39 = vmul.f32 %v6813_v19, %v8500_v57  ;;  %v8501_v23 = vld [vmem:[#allocation80_spill] sm:$0xff]  ;;  %v8503_v14 = vld [vmem:[#allocation110_spill] sm:$0xff]  ;;  %v8505_v24 = vld [vmem:[#allocation81_spill] sm:$0xff] }
 0x466   : > { %v2544_v44 = vmul.f32 %v6817_v40, %v8501_v23  ;;  %v2546_v42 = vmul.f32 %v6817_v40, %v8502_v0  ;;  %v2548_v10 = vmul.f32 %v6817_v40, %v8503_v14  ;;  %v8504_v58 = vld [vmem:[#allocation78_spill] sm:$0xff]  ;;  %v2568_v51 = vadd.f32 %v2536_v29, %v2372_v61  ;;  %v8506_v7 = vld [vmem:[#allocation103_spill] sm:$0xff]  ;;  %v8507_v57 = vld [vmem:[#allocation84_spill] sm:$0xff]  ;;  %v7162_v23 = vpop.permute.xlu0 %3381 }
 0x467   : > { %v2550_v1 = vmul.f32 %v6817_v40, %v8504_v58  ;;  %v2554_v56 = vmul.f32 %v6817_v40, %v8505_v24  ;;  %v2556_v5 = vmul.f32 %v6817_v40, %v8506_v7  ;;  %v2558_v21 = vmul.f32 %v6817_v40, %v8507_v57  ;;  %v8509_v33 = vld [vmem:[#allocation25_spill] sm:$0xff]  ;;  %v8510_v29 = vld [vmem:[#allocation98_spill] sm:$0xff] }
 0x468   : > { %v2570_v31 = vadd.f32 %v2538_v8, %v2374_v60  ;;  %v2572_v0 = vadd.f32 %v2540_v30, %v2376_v11  ;;  %v2396_v14 = vmul.f32 %v6813_v19, %v8508_v12  ;;  %v7168_v58 = vmul.f32 %v8509_v33, %v6813_v19  ;;  %v8511_v7 = vld [vmem:[#allocation18_spill] sm:$0xff] }
 0x469   : > { %v2574_v61 = vadd.f32 %v2542_v13, %v2378_v6  ;;  %v7172_v24 = vmul.f32 %v8510_v29, %v6813_v19  ;;  %v7176_v15 = vmul.f32 %v8511_v7, %v6813_v19  ;;  %v8513_v57 = vld [vmem:[#allocation86_spill] sm:$0xff]  ;;  %v7180_v11 = vadd.f32 %v2544_v44, %v2380_v52  ;;  %v7188_v6 = vpop.permute.xlu1 %3123  ;;  %v8516_v7 = vld [vmem:[#allocation21_spill] sm:$0xff]  ;;  %v8517_v52 = vld [vmem:[#allocation111_spill] sm:$0xff] }
 0x46a   : > { %v2560_v60 = vmul.f32 %v6817_v40, %v8513_v57  ;;  %v7182_v8 = vadd.f32 %v2546_v42, %v2382_v32  ;;  %v7184_v12 = vadd.f32 %v2548_v10, %v2384_v37  ;;  %v7186_v33 = vadd.f32 %v2550_v1, %v2386_v50  ;;  %v7198_v57 = vpop.permute.xlu0 %3401  ;;  %v8518_v10 = vld [vmem:[#allocation8_spill] sm:$0xff] }
 0x46b   : > { %8512 = vst [vmem:[#allocation39_spill] sm:$0xff] %v7176_v15  ;;  %v7190_v30 = vadd.f32 %v2554_v56, %v2390_v34  ;;  %v7192_v13 = vadd.f32 %v2556_v5, %v2392_v54  ;;  %v7194_v29 = vadd.f32 %v2558_v21, %v2394_v39  ;;  %v2726_v15 = vmul.f32 %v6842_v45, %v8516_v7  ;;  %v8520_v56 = vld [vmem:[#allocation82_spill] sm:$0xff]  ;;  %v8522_v54 = vld [vmem:[#allocation83_spill] sm:$0xff] }
 0x46c   : > { %v2727_v42 = vmul.f32 %v6842_v45, %v8517_v52  ;;  %v2729_v32 = vmul.f32 %v6842_v45, %v8518_v10  ;;  %v7206_v37 = vmul.f32 %v6923_v46, %v6813_v19  ;;  %v2725_v5 = vmul.f32 %v6842_v45, %v6947_v63 }
 0x46d   : > { %8514 = vst [vmem:[#allocation34_spill] sm:$0xff] %v7192_v13  ;;  %8515 = vst [vmem:[#allocation51_spill] sm:$0xff] %v7194_v29  ;;  %v7210_v21 = vadd.f32 %v2560_v60, %v2396_v14  ;;  %v2731_v39 = vmul.f32 %v6842_v45, %v8520_v56  ;;  %v7216_v50 = vmul.f32 %v6935_v43, %v6813_v19  ;;  %v8524_v43 = vld [vmem:[#allocation105_spill] sm:$0xff]  ;;  %v7250_v10 = vpop.permute.xlu1 %3289 }
 0x46e   : > { %v2728_v34 = vmul.f32 %v6842_v45, %v6953_v49  ;;  %v2733_v44 = vmul.f32 %v6842_v45, %v8522_v54  ;;  %v7224_v46 = vmul.f32 %v6941_v38, %v6813_v19  ;;  %v2730_v63 = vmul.f32 %v6842_v45, %v6958_v53  ;;  %v8525_v49 = vld [vmem:[#allocation113_spill] sm:$0xff]  ;;  %v7239_v52 = vpop.permute.xlu0 %3405 }
 0x46f   : > { %8519 = vst [vmem:[#allocation65_spill] sm:$0xff] %v7210_v21  ;;  %8521 = vst [vmem:[#allocation44_spill] sm:$0xff] %v7216_v50  ;;  %v2732_v1 = vmul.f32 %v6842_v45, %v6963_v59  ;;  %v7231_v14 = vadd.f32 %v2726_v15, %v7052_v22  ;;  %v2735_v60 = vmul.f32 %v6842_v45, %v8524_v43  ;;  %v8541_v21 = vld [vmem:[#allocation62_spill] sm:$0xff] }
 0x470   : > { %8523 = vst [vmem:[#allocation38_spill] sm:$0xff] %v7224_v46  ;;  %v2737_v7 = vmul.f32 %v6842_v45, %v8525_v49  ;;  %v2734_v38 = vmul.f32 %v6842_v45, %v6969_v2  ;;  %v7241_v53 = vadd.f32 %v2727_v42, %v2563_v47  ;;  %v7244_v59 = vadd.f32 %v2729_v32, %v7058_v62  ;;  %v8526_v2 = vld [vmem:[#allocation9_spill] sm:$0xff]  ;;  %v8527_v47 = vld [vmem:[#allocation15_spill] sm:$0xff] }
 0x471   : > { %v7246_v22 = vadd.f32 %v2725_v5, %v2561_v25  ;;  %v2736_v15 = vmul.f32 %v6842_v45, %v6975_v48  ;;  %v7253_v56 = vadd.f32 %v2731_v39, %v7060_v41  ;;  %v2739_v54 = vmul.f32 %v6842_v45, %v8526_v2  ;;  %v343_v41 = vld [vmem:[%s5772_s20 + $0x40] sm:$0xff]  ;;  %v344_v5 = vld [vmem:[%s5772_s20 + $0x48] sm:$0xff]  ;;  %v345_v39 = vld [vmem:[%s5772_s20 + $0x50] sm:$0xff] }
 0x472   : > { %v7257_v43 = vadd.f32 %v2728_v34, %v2564_v35  ;;  %v2738_v62 = vmul.f32 %v6842_v45, %v6979_v9  ;;  %v7262_v25 = vadd.f32 %v2733_v44, %v7064_v26  ;;  %v2741_v48 = vmul.f32 %v6842_v45, %v8527_v47  ;;  %v7281_v26 = vpop.permute.xlu0 %3421  ;;  %v346_v44 = vld [vmem:[%s5772_s20 + $0x58] sm:$0xff]  ;;  %v8528_v2 = vld [vmem:[#allocation45_spill] sm:$0xff]  ;;  %v8532_v47 = vld [vmem:[#allocation114_spill] sm:$0xff] }
 0x473   : > { %v7266_v42 = vadd.f32 %v2730_v63, %v2566_v55  ;;  %v7268_v32 = vadd.f32 %v2732_v1, %v2568_v51  ;;  %v7274_v49 = vadd.f32 %v2735_v60, %v7066_v18  ;;  %v7277_v35 = vadd.f32 %v2737_v7, %v7072_v20  ;;  %v8529_v63 = vld [vmem:[#allocation10_spill] sm:$0xff] }
 0x474   : > { %v7279_v9 = vadd.f32 %v2734_v38, %v2570_v31  ;;  %v4177_v34 = vpack.c.bf16 %v344_v5, %v343_v41  ;;  %v2743_v55 = vmul.f32 %v6842_v45, %v8528_v2  ;;  %v7286_v51 = vadd.f32 %v2736_v15, %v2572_v0  ;;  %v8531_v0 = vld [vmem:[#allocation116_spill] sm:$0xff] }
 0x475   : > { %v3316_v18 = vmul.f32 %v8529_v63, %v6817_v40  ;;  %v2740_v20 = vmul.f32 %v6842_v45, %v6982_v16  ;;  %v7293_v31 = vadd.f32 %v2739_v54, %v7074_v4  ;;  %v7295_v1 = vadd.f32 %v2738_v62, %v2574_v61  ;;  %v7308_v4 = vpop.permute.xlu1 %2694  ;;  %v347_v54 = vld [vmem:[%s5772_s20 + $0x60] sm:$0xff]  ;;  %v8534_v62 = vld [vmem:[#allocation90_spill] sm:$0xff] }
 0x476   : > { %v2742_v60 = vmul.f32 %v6842_v45, %v7030_v27  ;;  %4178 = vmatpush3.bf16.msra.mxu0 %v4177_v34  ;;  %v4180_v7 = vpack.c.bf16 %v346_v44, %v345_v39  ;;  %v7300_v38 = vadd.f32 %v2741_v48, %v7080_v17  ;;  %v2745_v15 = vmul.f32 %v6842_v45, %v8531_v0  ;;  %v348_v27 = vld [vmem:[%s5772_s20 + $0x68] sm:$0xff]  ;;  %v8535_v17 = vld [vmem:[#allocation88_spill] sm:$0xff] }
 0x477   : > { %v2747_v41 = vmul.f32 %v6842_v45, %v8532_v47  ;;  %v2744_v16 = vmul.f32 %v6842_v45, %v7088_v28  ;;  %v8533_v61 = vmov 0.0|0.0   ;;  %v3157_v5 = vmul.f32 %v8534_v62, %v6813_v19  ;;  %v8536_v39 = vld [vmem:[#allocation120_spill] sm:$0xff]  ;;  %v8539_v62 = vld [vmem:[#allocation118_spill] sm:$0xff] }
 0x478   : > { %8530 = vst [vmem:[#allocation104_spill] sm:$0xff] %v7300_v38  ;;  %4179 = vmatprep.subr.bf16.mxu0 %v8533_v61  ;;  %v3158_v48 = vmul.f32 %v8535_v17, %v6813_v19  ;;  %v3318_v34 = vmul.f32 %v8536_v39, %v6817_v40  ;;  %v2746_v44 = vmul.f32 %v6842_v45, %v7134_v36  ;;  %v8540_v36 = vld [vmem:[#allocation23_spill] sm:$0xff]  ;;  %v8569_v38 = vld [vmem:[#allocation40_spill] sm:$0xff] }
 0x479   : > { %v7322_v28 = vadd.f32 %v2743_v55, %v7090_v3  ;;  %v3348_v2 = vadd.f32 %v3316_v18, %v7168_v58  ;;  %v7326_v63 = vadd.f32 %v2740_v20, %v7180_v11  ;;  %v3508_v0 = vmul.f32 %v7162_v23, %v6842_v45  ;;  %v3426_v3 = vpop.permute.xlu0 %3425  ;;  %v8543_v11 = vld [vmem:[#allocation54_spill] sm:$0xff]  ;;  %v3294_v50 = vpop.permute.xlu1 %3293 }
 0x47a   : > { %v7331_v47 = vadd.f32 %v2742_v60, %v7182_v8  ;;  %v3509_v17 = vmul.f32 %v8539_v62, %v6842_v45  ;;  %v3159_v39 = vmul.f32 %v8540_v36, %v6813_v19  ;;  %4181 = vmatpush3.bf16.msra.mxu0 %v4180_v7  ;;  %v4183_v55 = vpack.c.bf16 %v348_v27, %v347_v54  ;;  %v8546_v8 = vld [vmem:[#allocation91_spill] sm:$0xff]  ;;  %v8547_v36 = vld [vmem:[#allocation36_spill] sm:$0xff] }
 0x47b   : > { %8537 = vst [vmem:[#allocation59_spill] sm:$0xff] %v7322_v28  ;;  %v7338_v58 = vadd.f32 %v2745_v15, %v8541_v21  ;;  %v7341_v18 = vadd.f32 %v2747_v41, %v8543_v11  ;;  %v7344_v23 = vadd.f32 %v2744_v16, %v7184_v12  ;;  %v3160_v20 = vmul.f32 %v8546_v8, %v6813_v19  ;;  %v349_v60 = vld [vmem:[%s5772_s20 + $0x70] sm:$0xff]  ;;  %v350_v62 = vld [vmem:[%s5772_s20 + $0x78] sm:$0xff]  ;;  %v8550_v41 = vld [vmem:[#allocation125_spill] sm:$0xff] }
 0x47c   : > { %8538 = vst [vmem:[#allocation58_spill] sm:$0xff] %v7331_v47  ;;  %4182 = vmatprep.subr.bf16.mxu0 %v8533_v61  ;;  %v3349_v29 = vadd.f32 %v8547_v36, %v3157_v5  ;;  %v3350_v7 = vadd.f32 %v3318_v34, %v3158_v48  ;;  %v7353_v54 = vadd.f32 %v2746_v44, %v7186_v33  ;;  %v8549_v21 = vld [vmem:[#allocation122_spill] sm:$0xff]  ;;  %v8551_v16 = vld [vmem:[#allocation95_spill] sm:$0xff]  ;;  %v8552_v11 = vld [vmem:[#allocation13_spill] sm:$0xff] }
 0x47d   : > { %8542 = vst [vmem:[#allocation106_spill] sm:$0xff] %v7338_v58  ;;  %8544 = vst [vmem:[#allocation117_spill] sm:$0xff] %v7341_v18  ;;  %v3321_v15 = vmul.f32 %v8549_v21, %v6817_v40  ;;  %v3322_v12 = vmul.f32 %v8550_v41, %v6817_v40  ;;  %v3163_v27 = vmul.f32 %v8551_v16, %v6813_v19  ;;  %v8553_v5 = vld [vmem:[#allocation57_spill] sm:$0xff]  ;;  %v8554_v33 = vld [vmem:[#allocation12_spill] sm:$0xff] }
 0x47e   : > { %8545 = vst [vmem:[#allocation37_spill] sm:$0xff] %v7344_v23  ;;  %8548 = vst [vmem:[#allocation42_spill] sm:$0xff] %v7353_v54  ;;  %v3323_v8 = vmul.f32 %v8552_v11, %v6817_v40  ;;  %v3540_v46 = vadd.f32 %v3508_v0, %v3348_v2  ;;  %v3541_v13 = vadd.f32 %v3509_v17, %v3349_v29  ;;  %4184 = vmatpush3.bf16.msra.mxu0 %v4183_v55  ;;  %v8555_v36 = vld [vmem:[#allocation119_spill] sm:$0xff]  ;;  %v8558_v2 = vld [vmem:[#allocation93_spill] sm:$0xff] }
 0x47f   : > { %v3351_v48 = vadd.f32 %v8553_v5, %v3159_v39  ;;  %v3164_v34 = vmul.f32 %v8554_v33, %v6813_v19  ;;  %v4186_v44 = vpack.c.bf16 %v350_v62, %v349_v60  ;;  %v3510_v21 = vmul.f32 %v8555_v36, %v6842_v45  ;;  %v8556_v41 = vld [vmem:[#allocation31_spill] sm:$0xff]  ;;  %4185 = vmatprep.subr.bf16.mxu0 %v8533_v61  ;;  %v8559_v0 = vld [vmem:[#allocation121_spill] sm:$0xff]  ;;  %v3442_v39 = vpop.permute.xlu0 %3441  ;;  %v8561_v61 = vld [vmem:[#allocation124_spill] sm:$0xff] }
 0x480   : > { %v3352_v18 = vadd.f32 %v8556_v41, %v3160_v20  ;;  %v8557_v16 = vld [vmem:[#allocation123_spill] sm:$0xff]  ;;  %3748 = vrot.lane.b32.xlu1 %v8558_v2, %s4437_s9  ;;  %v3353_v29 = vadd.f32 %v3321_v15, %v7172_v24  ;;  %v3512_v17 = vmul.f32 %v8559_v0, %v6842_v45  ;;  %v3181_v55 = vmul.f32 %v7188_v6, %v6813_v19  ;;  %v3482_v24 = vpop.permute.xlu1 %3481  ;;  %v8562_v15 = vld [vmem:[#allocation53_spill] sm:$0xff]  ;;  %v8564_v6 = vld [vmem:[#allocation100_spill] sm:$0xff] }
 0x481   : > { %v3511_v54 = vmul.f32 %v8557_v16, %v6842_v45  ;;  %v3341_v20 = vmul.f32 %v7250_v10, %v6817_v40  ;;  %v8560_v60 = vld [vmem:[#allocation39_spill] sm:$0xff]  ;;  %v3355_v11 = vadd.f32 %v3323_v8, %v3163_v27  ;;  %v3165_v5 = vmul.f32 %v8561_v61, %v6813_v19  ;;  %v8563_v41 = vld [vmem:[#allocation97_spill] sm:$0xff] }
 0x482   : > { %v3354_v62 = vadd.f32 %v3322_v12, %v8560_v60  ;;  %v3513_v33 = vmul.f32 %v7198_v57, %v6842_v45  ;;  %v3356_v36 = vadd.f32 %v8562_v15, %v3164_v34  ;;  %v3515_v16 = vmul.f32 %v8563_v41, %v6842_v45  ;;  %4187 = vmatpush3.bf16.msra.mxu0 %v4186_v44  ;;  %v8565_v12 = vld [vmem:[#allocation102_spill] sm:$0xff]  ;;  %v8567_v47 = vld [vmem:[#allocation33_spill] sm:$0xff] }
 0x483   : > { %v3516_v2 = vmul.f32 %v8564_v6, %v6842_v45  ;;  %v3514_v10 = vmul.f32 %v7239_v52, %v6842_v45  ;;  %v3517_v27 = vmul.f32 %v8565_v12, %v6842_v45  ;;  %v3518_v8 = vmul.f32 %v7281_v26, %v6842_v45  ;;  %v8566_v6 = vld [vmem:[#allocation55_spill] sm:$0xff] }
 0x484   : > { %v3519_v57 = vmul.f32 %v3426_v3, %v6842_v45  ;;  %v3523_v34 = vmul.f32 %v3442_v39, %v6842_v45  ;;  %v3373_v0 = vadd.f32 %v3341_v20, %v3181_v55  ;;  %v2750_v60 = vmul.f32 %v6842_v45, %v7308_v4  ;;  %v8568_v55 = vld [vmem:[#allocation63_spill] sm:$0xff] }
 0x485   : > { %v3342_v61 = vmul.f32 %v3294_v50, %v6817_v40  ;;  %v3533_v15 = vmul.f32 %v3482_v24, %v6842_v45  ;;  %v3542_v52 = vadd.f32 %v3510_v21, %v3350_v7  ;;  %v3543_v44 = vadd.f32 %v3511_v54, %v3351_v48  ;;  %v3134_v50 = vpop.permute.xlu1 %3133  ;;  %v8571_v48 = vld [vmem:[#allocation61_spill] sm:$0xff] }
 0x486   : > { %v3544_v41 = vadd.f32 %v3512_v17, %v3352_v18  ;;  %v3357_v12 = vadd.f32 %v8566_v6, %v3165_v5  ;;  %v3547_v58 = vadd.f32 %v3515_v16, %v3355_v11  ;;  %v3548_v23 = vadd.f32 %v3516_v2, %v3356_v36  ;;  %v8574_v16 = vld [vmem:[#allocation58_spill] sm:$0xff]  ;;  %v8575_v2 = vld [vmem:[#allocation59_spill] sm:$0xff] }
 0x487   : > { %v3545_v26 = vadd.f32 %v3513_v33, %v3353_v29  ;;  %v3546_v28 = vadd.f32 %v3514_v10, %v3354_v62  ;;  %v3550_v39 = vadd.f32 %v3518_v8, %v8567_v47  ;;  %v3551_v20 = vadd.f32 %v3519_v57, %v8568_v55  ;;  %v8572_v29 = vld [vmem:[#allocation48_spill] sm:$0xff]  ;;  %v8576_v10 = vld [vmem:[#allocation37_spill] sm:$0xff]  ;;  %v8580_v6 = vld [vmem:[#allocation30_spill] sm:$0xff] }
 0x488   : > { %v3549_v3 = vadd.f32 %v3517_v27, %v3357_v12  ;;  %v7406_v4 = vadd.f32 %v3523_v34, %v8569_v38  ;;  %v2782_v24 = vadd.f32 %v2750_v60, %v7190_v30  ;;  %v7410_v7 = vadd.f32 %v3342_v61, %v7206_v37  ;;  %v8573_v33 = vld [vmem:[#allocation104_spill] sm:$0xff]  ;;  %v8577_v27 = vld [vmem:[#allocation106_spill] sm:$0xff] }
 0x489   : > { %v7412_v18 = vadd.f32 %v3533_v15, %v3373_v0  ;;  %v7415_v54 = vmul.f32 %v3134_v50, %v6813_v19  ;;  %v7419_v21 = vmul.f32 %v8571_v48, %v7246_v22  ;;  %v7423_v47 = vmul.f32 %v8571_v48, %v7231_v14  ;;  %v8578_v61 = vld [vmem:[#allocation42_spill] sm:$0xff] }
 0x48a   : > { %8570 = vst [vmem:[#allocation71_spill] sm:$0xff] %v7410_v7  ;;  %v7427_v38 = vmul.f32 %v8571_v48, %v7241_v53  ;;  %v7431_v30 = vmul.f32 %v8571_v48, %v7257_v43  ;;  %v7435_v37 = vmul.f32 %v8571_v48, %v7244_v59  ;;  %v7439_v22 = vmul.f32 %v8571_v48, %v7266_v42 }
 0x48b   : > { %v3576_v17 = vmul.f32 %v8572_v29, %v3540_v46  ;;  %v3577_v14 = vmul.f32 %v8572_v29, %v3541_v13  ;;  %v7445_v53 = vmul.f32 %v8571_v48, %v7253_v56  ;;  %v7449_v43 = vmul.f32 %v8571_v48, %v7268_v32 }
 0x48c   : > { %v7453_v59 = vmul.f32 %v8571_v48, %v7262_v25  ;;  %v7457_v42 = vmul.f32 %v8571_v48, %v7279_v9  ;;  %v7463_v13 = vmul.f32 %v8571_v48, %v7274_v49  ;;  %v3578_v46 = vmul.f32 %v8572_v29, %v3542_v52  ;;  %v8579_v52 = vld [vmem:[#allocation117_spill] sm:$0xff] }
 0x48d   : > { %v7470_v25 = vmul.f32 %v8571_v48, %v7286_v51  ;;  %v7474_v9 = vmul.f32 %v8571_v48, %v7277_v35  ;;  %v7478_v11 = vmul.f32 %v8571_v48, %v7295_v1  ;;  %v7482_v49 = vmul.f32 %v8571_v48, %v7293_v31 }
 0x48e   : > { %v7486_v5 = vmul.f32 %v8571_v48, %v7326_v63  ;;  %v7490_v51 = vmul.f32 %v8571_v48, %v8573_v33  ;;  %v3579_v36 = vmul.f32 %v8572_v29, %v3543_v44  ;;  %v7496_v1 = vmul.f32 %v8571_v48, %v8574_v16 }
 0x48f   : > { %v7500_v31 = vmul.f32 %v8571_v48, %v8575_v2  ;;  %v7504_v63 = vmul.f32 %v8571_v48, %v8576_v10  ;;  %v7508_v8 = vmul.f32 %v8571_v48, %v8577_v27  ;;  %v3580_v57 = vmul.f32 %v8572_v29, %v3544_v41  ;;  %v8582_v2 = vld [vmem:[#allocation11_spill] sm:$0xff] }
 0x490   : > { %v7514_v15 = vmul.f32 %v8571_v48, %v8578_v61  ;;  %v7518_v44 = vmul.f32 %v8571_v48, %v8579_v52  ;;  %v7522_v12 = vmul.f32 %v8571_v48, %v8580_v6  ;;  %v7525_v55 = vmul.f32 %v8571_v48, %v2782_v24  ;;  %v8583_v10 = vld [vmem:[#allocation27_spill] sm:$0xff]  ;;  %v8586_v61 = vld [vmem:[#allocation28_spill] sm:$0xff] }
 0x491   : > { %v3581_v41 = vmul.f32 %v8572_v29, %v3545_v26  ;;  %v3582_v50 = vmul.f32 %v8572_v29, %v3546_v28  ;;  %v3586_v33 = vmul.f32 %v8572_v29, %v3550_v39  ;;  %v3587_v28 = vmul.f32 %v8572_v29, %v3551_v20  ;;  %v8584_v27 = vld [vmem:[#allocation47_spill] sm:$0xff] }
 0x492   : > { %8581 = vst [vmem:[#allocation99_spill] sm:$0xff] %v7525_v55  ;;  %v3594_v52 = vmul.f32 %v8572_v29, %v8586_v61 }
 0x494   : > { %v7459_v62 = vpop.permute.xlu0 %3609  ;;  %v7552_v6 = vpop.permute.xlu1 %2826 }
 0x495   : > { %v3612_v56 = vadd.f32 %v7459_v62, %v3576_v17  ;;  %v3613_v32 = vadd.f32 %v7459_v62, %v3577_v14  ;;  %v3614_v35 = vadd.f32 %v7459_v62, %v3578_v46  ;;  %v3615_v34 = vadd.f32 %v7459_v62, %v3579_v36 }
 0x496   : > { %v3616_v17 = vadd.f32 %v7459_v62, %v3580_v57  ;;  %v3583_v46 = vmul.f32 %v8572_v29, %v3547_v58  ;;  %v3617_v36 = vadd.f32 %v7459_v62, %v3581_v41  ;;  %v3589_v58 = vmul.f32 %v8572_v29, %v8583_v10  ;;  %v8589_v10 = vld [vmem:[#allocation52_spill] sm:$0xff] }
 0x497   : > { %v3644_v0 = vmax.f32 %v3612_v56, 0.0  ;;  %v3645_v60 = vmax.f32 %v3613_v32, 0.0  ;;  %v3646_v14 = vmax.f32 %v3614_v35, 0.0  ;;  %v3584_v56 = vmul.f32 %v8572_v29, %v3548_v23 }
 0x498   : > { %v3585_v32 = vmul.f32 %v8572_v29, %v3549_v3  ;;  %v3647_v16 = vmax.f32 %v3615_v34, 0.0  ;;  %v3588_v35 = vmul.f32 %v8572_v29, %v8582_v2  ;;  %v3590_v3 = vmul.f32 %v8572_v29, %v8584_v27  ;;  %v8588_v2 = vld [vmem:[#allocation49_spill] sm:$0xff] }
 0x499   : > { %v3676_v24 = vsel %vm1154_vm2, %v3644_v0, 0.0  ;;  %v3677_v26 = vsel %vm1154_vm2, %v3645_v60, 0.0  ;;  %v3618_v39 = vadd.f32 %v7459_v62, %v3582_v50  ;;  %v3648_v57 = vmax.f32 %v3616_v17, 0.0  ;;  %v8585_v60 = vld [vmem:[#allocation43_spill] sm:$0xff] }
 0x49a   : > { %v3678_v23 = vadd.f32 %v3677_v26, %v3676_v24  ;;  %v3679_v34 = vsel %vm1154_vm2, %v3646_v14, 0.0  ;;  %v3591_v0 = vmul.f32 %v8572_v29, %v7406_v4  ;;  %v3593_v20 = vmul.f32 %v8572_v29, %v8585_v60  ;;  %v8587_v24 = vld [vmem:[#allocation17_spill] sm:$0xff] }
 0x49b   : > { %v3595_v26 = vmul.f32 %v8572_v29, %v8587_v24  ;;  %v3619_v50 = vadd.f32 %v7459_v62, %v3583_v46  ;;  %v3649_v17 = vmax.f32 %v3617_v36, 0.0  ;;  %v3681_v14 = vsel %vm1154_vm2, %v3647_v16, 0.0 }
 0x49c   : > { %v3680_v41 = vadd.f32 %v3679_v34, %v3678_v23  ;;  %v3598_v4 = vmul.f32 %v8572_v29, %v8588_v2  ;;  %v7562_v27 = vmul.f32 %v8572_v29, %v8589_v10  ;;  %v7566_v60 = vmul.f32 %v8572_v29, %v7412_v18 }
 0x49d   : > { %v3620_v34 = vadd.f32 %v7459_v62, %v3584_v56  ;;  %v3650_v61 = vmax.f32 %v3618_v39, 0.0  ;;  %v3683_v46 = vsel %vm1154_vm2, %v3648_v57, 0.0  ;;  %v7572_v36 = vadd.f32 %v7552_v6, %v7419_v21 }
 0x49e   : > { %8590 = vst [vmem:[#allocation66_spill] sm:$0xff] %v7562_v27  ;;  %8591 = vst [vmem:[#allocation60_spill] sm:$0xff] %v7566_v60  ;;  %v3682_v23 = vadd.f32 %v3681_v14, %v3680_v41  ;;  %v3621_v24 = vadd.f32 %v7459_v62, %v3585_v32  ;;  %v3622_v2 = vadd.f32 %v7459_v62, %v3586_v33  ;;  %v3651_v56 = vmax.f32 %v3619_v50, 0.0  ;;  %v8592_v27 = vld [vmem:[#allocation41_spill] sm:$0xff] }
 0x49f   : > { %v3623_v10 = vadd.f32 %v7459_v62, %v3587_v28  ;;  %v3624_v18 = vadd.f32 %v7459_v62, %v3588_v35  ;;  %v3625_v41 = vadd.f32 %v7459_v62, %v3589_v58  ;;  %v3685_v39 = vsel %vm1154_vm2, %v3649_v17, 0.0 }
 0x4a0   : > { %v3684_v55 = vadd.f32 %v3683_v46, %v3682_v23  ;;  %v3626_v14 = vadd.f32 %v7459_v62, %v3590_v3  ;;  %v3627_v21 = vadd.f32 %v7459_v62, %v3591_v0  ;;  %v7584_v32 = vadd.f32 %v7552_v6, %v7423_v47 }
 0x4a1   : > { %v3652_v33 = vmax.f32 %v3620_v34, 0.0  ;;  %v3687_v28 = vsel %vm1154_vm2, %v3650_v61, 0.0  ;;  %v7590_v58 = vadd.f32 %v7552_v6, %v7427_v38  ;;  %v3629_v50 = vadd.f32 %v7459_v62, %v3593_v20 }
 0x4a2   : > { %v3686_v19 = vadd.f32 %v3685_v39, %v3684_v55  ;;  %v3653_v17 = vmax.f32 %v3621_v24, 0.0  ;;  %v3654_v3 = vmax.f32 %v3622_v2, 0.0  ;;  %v3655_v0 = vmax.f32 %v3623_v10, 0.0 }
 0x4a3   : > { %v3656_v55 = vmax.f32 %v3624_v18, 0.0  ;;  %v3657_v46 = vmax.f32 %v3625_v41, 0.0  ;;  %v3689_v47 = vsel %vm1154_vm2, %v3651_v56, 0.0  ;;  %v3658_v34 = vmax.f32 %v3626_v14, 0.0 }
 0x4a4   : > { %v3688_v23 = vadd.f32 %v3687_v28, %v3686_v19  ;;  %v3659_v7 = vmax.f32 %v3627_v21, 0.0  ;;  %v3691_v38 = vsel %vm1154_vm2, %v3652_v33, 0.0  ;;  %v3631_v20 = vadd.f32 %v7459_v62, %v3595_v26 }
 0x4a5   : > { %v3298_v16 = vpop.permute.xlu1 %3297  ;;  %v3446_v57 = vpop.permute.xlu0 %3445  ;;  %v7600_v19 = vadd.f32 %v7552_v6, %v7431_v30  ;;  %v3661_v24 = vmax.f32 %v3629_v50, 0.0  ;;  %v3693_v10 = vsel %vm1154_vm2, %v3653_v17, 0.0  ;;  %v3634_v18 = vadd.f32 %v7459_v62, %v3598_v4 }
 0x4a6   : > { %v3524_v35 = vmul.f32 %v3446_v57, %v6842_v45  ;;  %v3690_v61 = vadd.f32 %v3689_v47, %v3688_v23  ;;  %v3630_v57 = vadd.f32 %v7459_v62, %v3594_v52  ;;  %v3695_v41 = vsel %vm1154_vm2, %v3654_v3, 0.0 }
 0x4a7   : > { %v3697_v52 = vsel %vm1154_vm2, %v3655_v0, 0.0  ;;  %v3699_v56 = vsel %vm1154_vm2, %v3656_v55, 0.0  ;;  %v3703_v21 = vsel %vm1154_vm2, %v3658_v34, 0.0  ;;  %v3705_v30 = vsel %vm1154_vm2, %v3659_v7, 0.0 }
 0x4a8   : > { %v3556_v48 = vadd.f32 %v3524_v35, %v8592_v27  ;;  %v3692_v2 = vadd.f32 %v3691_v38, %v3690_v61  ;;  %v3701_v27 = vsel %vm1154_vm2, %v3657_v46, 0.0  ;;  %v3662_v33 = vmax.f32 %v3630_v57, 0.0  ;;  %v8593_v57 = vld [vmem:[#allocation5_spill] sm:$0xff] }
 0x4a9   : > { %v3462_v39 = vpop.permute.xlu0 %3461  ;;  %v3343_v28 = vmul.f32 %v3298_v16, %v6817_v40  ;;  %v3663_v4 = vmax.f32 %v3631_v20, 0.0  ;;  %v3709_v23 = vsel %vm1154_vm2, %v3661_v24, 0.0  ;;  %v3666_v0 = vmax.f32 %v3634_v18, 0.0 }
 0x4aa   : > { %v2703_v60 = vpop.permute.xlu1 %2702  ;;  %v3694_v26 = vadd.f32 %v3693_v10, %v3692_v2  ;;  %v3592_v35 = vmul.f32 %v8572_v29, %v3556_v48  ;;  %v3528_v50 = vmul.f32 %v3462_v39, %v6842_v45  ;;  %v7616_v55 = vadd.f32 %v7552_v6, %v7435_v37  ;;  %v8594_v2 = vld [vmem:[#allocation46_spill] sm:$0xff] }
 0x4ab   : > { %v7621_v7 = vadd.f32 %v7552_v6, %v7439_v22  ;;  %v7625_v48 = vadd.f32 %v7552_v6, %v7445_v53  ;;  %v7629_v16 = vadd.f32 %v7552_v6, %v7449_v43  ;;  %v3711_v37 = vsel %vm1154_vm2, %v3662_v33, 0.0 }
 0x4ac   : > { %v3696_v3 = vadd.f32 %v3695_v41, %v3694_v26  ;;  %v7636_v34 = vadd.f32 %v7552_v6, %v7453_v59  ;;  %v7640_v22 = vadd.f32 %v7552_v6, %v7457_v42  ;;  %v7643_v53 = vadd.f32 %v3343_v28, %v7415_v54 }
 0x4ad   : > { %v3466_v14 = vpop.permute.xlu0 %3465  ;;  %v3628_v61 = vadd.f32 %v7459_v62, %v3592_v35  ;;  %v7647_v43 = vsel %vm1154_vm2, %v3663_v4, 0.0  ;;  %v3560_v38 = vadd.f32 %v3528_v50, %v8593_v57  ;;  %v7651_v24 = vsel %vm1154_vm2, %v3666_v0, 0.0  ;;  %v8595_v50 = vld [vmem:[#allocation34_spill] sm:$0xff] }
 0x4ae   : > { %v3529_v46 = vmul.f32 %v3466_v14, %v6842_v45  ;;  %v3698_v39 = vadd.f32 %v3697_v52, %v3696_v3  ;;  %v7655_v59 = vadd.f32 %v7552_v6, %v7463_v13  ;;  %v7659_v42 = vadd.f32 %v7552_v6, %v7470_v25 }
 0x4af   : > { %v3302_v17 = vpop.permute.xlu1 %3301  ;;  %v7664_v18 = vadd.f32 %v7552_v6, %v7474_v9  ;;  %v2861_v41 = vmax.f32 %v7572_v36, 0.0  ;;  %v2862_v52 = vmax.f32 %v7584_v32, 0.0  ;;  %v2752_v13 = vmul.f32 %v6842_v45, %v2703_v60 }
 0x4b0   : > { %v3700_v20 = vadd.f32 %v3699_v56, %v3698_v39  ;;  %v3561_v10 = vadd.f32 %v3529_v46, %v8594_v2  ;;  %v7671_v26 = vadd.f32 %v7552_v6, %v7478_v11  ;;  %v7675_v25 = vadd.f32 %v7552_v6, %v7482_v49 }
 0x4b1   : > { %v7631_v47 = vpop.permute.xlu0 %2690  ;;  %v3660_v33 = vmax.f32 %v3628_v61, 0.0  ;;  %v3596_v9 = vmul.f32 %v8572_v29, %v3560_v38  ;;  %v7680_v36 = vadd.f32 %v7552_v6, %v7486_v5  ;;  %v2863_v32 = vmax.f32 %v7590_v58, 0.0 }
 0x4b2   : > { %v3702_v14 = vadd.f32 %v3701_v27, %v3700_v20  ;;  %v7685_v60 = vadd.f32 %v7552_v6, %v7490_v51  ;;  %v7689_v11 = vadd.f32 %v7552_v6, %v7496_v1  ;;  %v7693_v49 = vadd.f32 %v7552_v6, %v7500_v31 }
 0x4b3   : > { %v3597_v28 = vmul.f32 %v8572_v29, %v3561_v10  ;;  %v2864_v5 = vmax.f32 %v7600_v19, 0.0  ;;  %v2893_v35 = vsel %vm1154_vm2, %v2861_v41, 0.0  ;;  %v2894_v58 = vsel %vm1154_vm2, %v2862_v52, 0.0 }
 0x4b4   : > { %v3490_v54 = vpop.permute.xlu1 %3489  ;;  %v3704_v27 = vadd.f32 %v3703_v21, %v3702_v14  ;;  %v2784_v1 = vadd.f32 %v2752_v13, %v8595_v50  ;;  %v7706_v3 = vadd.f32 %v7552_v6, %v7504_v63  ;;  %v2895_v31 = vadd.f32 %v2894_v58, %v2893_v35 }
 0x4b5   : > { %v3478_v56 = vpop.permute.xlu0 %3477  ;;  %v3707_v0 = vsel %vm1154_vm2, %v3660_v33, 0.0  ;;  %v3632_v19 = vadd.f32 %v7459_v62, %v3596_v9  ;;  %v2865_v46 = vmax.f32 %v7616_v55, 0.0  ;;  %v2896_v39 = vsel %vm1154_vm2, %v2863_v32, 0.0  ;;  %v8597_v32 = vld [vmem:[#allocation44_spill] sm:$0xff] }
 0x4b6   : > { %v3706_v4 = vadd.f32 %v3705_v30, %v3704_v27  ;;  %v3344_v57 = vmul.f32 %v3302_v17, %v6817_v40  ;;  %v7715_v30 = vadd.f32 %v7552_v6, %v7508_v8  ;;  %v2897_v38 = vadd.f32 %v2896_v39, %v2895_v31 }
 0x4b7   : > { %v3633_v63 = vadd.f32 %v7459_v62, %v3597_v28  ;;  %v7720_v20 = vadd.f32 %v7552_v6, %v7514_v15  ;;  %v2866_v2 = vmax.f32 %v7621_v7, 0.0  ;;  %v2898_v55 = vsel %vm1154_vm2, %v2864_v5, 0.0  ;;  %v8596_v15 = vld [vmem:[#allocation61_spill] sm:$0xff] }
 0x4b8   : > { %v3708_v61 = vadd.f32 %v3707_v0, %v3706_v4  ;;  %v7726_v17 = vadd.f32 %v7552_v6, %v7518_v44  ;;  %v7730_v8 = vadd.f32 %v7552_v6, %v7522_v12  ;;  %v2899_v52 = vadd.f32 %v2898_v55, %v2897_v38 }
 0x4b9   : > { %v7699_v21 = vpop.permute.xlu1 %3143  ;;  %v7701_v51 = vpop.permute.xlu0 %2698  ;;  %v3664_v13 = vmax.f32 %v3632_v19, 0.0  ;;  %v7735_v33 = vmul.f32 %v8596_v15, %v2784_v1  ;;  %v2867_v7 = vmax.f32 %v7625_v48, 0.0  ;;  %v2900_v9 = vsel %vm1154_vm2, %v2865_v46, 0.0  ;;  %v8598_v1 = vld [vmem:[#allocation66_spill] sm:$0xff] }
 0x4ba   : > { %v3710_v41 = vadd.f32 %v3709_v23, %v3708_v61  ;;  %v7740_v27 = vadd.f32 %v3344_v57, %v8597_v32  ;;  %v2868_v44 = vmax.f32 %v7629_v16, 0.0  ;;  %v2901_v28 = vadd.f32 %v2900_v9, %v2899_v52  ;;  %v8599_v61 = vld [vmem:[#allocation16_spill] sm:$0xff] }
 0x4bb   : > { %v3665_v12 = vmax.f32 %v3633_v63, 0.0  ;;  %v2869_v5 = vmax.f32 %v7636_v34, 0.0  ;;  %v2902_v35 = vsel %vm1154_vm2, %v2866_v2, 0.0  ;;  %v3535_v58 = vmul.f32 %v3490_v54, %v6842_v45 }
 0x4bc   : > { %v3712_v23 = vadd.f32 %v3711_v37, %v3710_v41  ;;  %v2903_v50 = vadd.f32 %v2902_v35, %v2901_v28  ;;  %v3635_v37 = vadd.f32 %v7459_v62, %v8598_v1  ;;  %v3532_v31 = vmul.f32 %v3478_v56, %v6842_v45 }
 0x4bd   : > { %v3486_v10 = vpop.permute.xlu0 %3485  ;;  %v3715_v16 = vsel %vm1154_vm2, %v3664_v13, 0.0  ;;  %v2870_v0 = vmax.f32 %v7640_v22, 0.0  ;;  %v2904_v34 = vsel %vm1154_vm2, %v2867_v7, 0.0  ;;  %v3567_v19 = vadd.f32 %v3535_v58, %v7643_v53 }
 0x4be   : > { %v7732_v14 = vpop.permute.xlu1 %3305  ;;  %v3714_v48 = vadd.f32 %v7647_v43, %v3712_v23  ;;  %v2871_v39 = vmax.f32 %v7655_v59, 0.0  ;;  %v2905_v43 = vadd.f32 %v2904_v34, %v2903_v50  ;;  %v3564_v57 = vadd.f32 %v3532_v31, %v8599_v61  ;;  %v8601_v31 = vld [vmem:[#allocation71_spill] sm:$0xff] }
 0x4bf   : > { %v3717_v38 = vsel %vm1154_vm2, %v3665_v12, 0.0  ;;  %v2872_v56 = vmax.f32 %v7659_v42, 0.0  ;;  %v2906_v63 = vsel %vm1154_vm2, %v2868_v44, 0.0  ;;  %v3667_v2 = vmax.f32 %v3635_v37, 0.0  ;;  %v8600_v44 = vld [vmem:[#allocation60_spill] sm:$0xff] }
 0x4c0   : > { %v3716_v54 = vadd.f32 %v3715_v16, %v3714_v48  ;;  %v2873_v55 = vmax.f32 %v7664_v18, 0.0  ;;  %v2907_v41 = vadd.f32 %v2906_v63, %v2905_v43  ;;  %v3600_v53 = vmul.f32 %v8572_v29, %v3564_v57 }
 0x4c1   : > { %v7746_v4 = vpop.permute.xlu0 %2706  ;;  %v2874_v13 = vmax.f32 %v7671_v26, 0.0  ;;  %v2875_v59 = vmax.f32 %v7675_v25, 0.0  ;;  %v2908_v7 = vsel %vm1154_vm2, %v2869_v5, 0.0  ;;  %v3603_v9 = vmul.f32 %v8572_v29, %v3567_v19 }
 0x4c2   : > { %v3718_v22 = vadd.f32 %v3717_v38, %v3716_v54  ;;  %v2909_v23 = vadd.f32 %v2908_v7, %v2907_v41  ;;  %v3636_v32 = vadd.f32 %v7459_v62, %v3600_v53  ;;  %v3637_v18 = vadd.f32 %v7459_v62, %v8600_v44 }
 0x4c3   : > { %v7756_v46 = vpop.permute.xlu1 %2710  ;;  %v2876_v12 = vmax.f32 %v7680_v36, 0.0  ;;  %v2910_v35 = vsel %vm1154_vm2, %v2870_v0, 0.0  ;;  %v3721_v26 = vsel %vm1154_vm2, %v3667_v2, 0.0  ;;  %v3534_v25 = vmul.f32 %v3486_v10, %v6842_v45  ;;  %v8602_v2 = vld [vmem:[#allocation14_spill] sm:$0xff] }
 0x4c4   : > { %v3720_v42 = vadd.f32 %v7651_v24, %v3718_v22  ;;  %v2911_v5 = vadd.f32 %v2910_v35, %v2909_v23  ;;  %v3668_v48 = vmax.f32 %v3636_v32, 0.0  ;;  %v3669_v50 = vmax.f32 %v3637_v18, 0.0 }
 0x4c5   : > { %v3494_v52 = vpop.permute.xlu0 %3493  ;;  %v2877_v24 = vmax.f32 %v7685_v60, 0.0  ;;  %v2878_v1 = vmax.f32 %v7689_v11, 0.0  ;;  %v2912_v37 = vsel %vm1154_vm2, %v2871_v39, 0.0  ;;  %v3566_v16 = vadd.f32 %v3534_v25, %v8601_v31 }
 0x4c6   : > { %v3722_v58 = vadd.f32 %v3721_v26, %v3720_v42  ;;  %v2879_v36 = vmax.f32 %v7693_v49, 0.0  ;;  %v2913_v34 = vadd.f32 %v2912_v37, %v2911_v5  ;;  %v3639_v0 = vadd.f32 %v7459_v62, %v3603_v9 }
 0x4c7   : > { %v3723_v19 = vsel %vm1154_vm2, %v3668_v48, 0.0  ;;  %v2914_v54 = vsel %vm1154_vm2, %v2872_v56, 0.0  ;;  %v3602_v60 = vmul.f32 %v8572_v29, %v3566_v16  ;;  %v3345_v11 = vmul.f32 %v7732_v14, %v6817_v40 }
 0x4c8   : > { %v3310_v28 = vpop.permute.xlu1 %3309  ;;  %v3724_v43 = vadd.f32 %v3723_v19, %v3722_v58  ;;  %v2880_v61 = vmax.f32 %v7706_v3, 0.0  ;;  %v2915_v57 = vadd.f32 %v2914_v54, %v2913_v34  ;;  %v3725_v49 = vsel %vm1154_vm2, %v3669_v50, 0.0  ;;  %v8604_v34 = vld [vmem:[#allocation19_spill] sm:$0xff] }
 0x4c9   : > { %v7784_v10 = vpop.permute.xlu0 %2714  ;;  %v3536_v38 = vmul.f32 %v3494_v52, %v6842_v45  ;;  %v2916_v63 = vsel %vm1154_vm2, %v2873_v55, 0.0  ;;  %v3185_v22 = vmul.f32 %v7699_v21, %v8602_v2  ;;  %v3638_v41 = vadd.f32 %v7459_v62, %v3602_v60 }
 0x4ca   : > { %v3726_v56 = vadd.f32 %v3725_v49, %v3724_v43  ;;  %v2917_v53 = vadd.f32 %v2916_v63, %v2915_v57  ;;  %v2918_v7 = vsel %vm1154_vm2, %v2874_v13, 0.0  ;;  %v3671_v14 = vmax.f32 %v3639_v0, 0.0 }
 0x4cb   : > { %v3568_v9 = vadd.f32 %v3536_v38, %v7740_v27  ;;  %v3670_v42 = vmax.f32 %v3638_v41, 0.0  ;;  %v3377_v23 = vadd.f32 %v3345_v11, %v3185_v22  ;;  %v3346_v32 = vmul.f32 %v3310_v28, %v6817_v40 }
 0x4cc   : > { %v2881_v55 = vmax.f32 %v7715_v30, 0.0  ;;  %v2919_v44 = vadd.f32 %v2918_v7, %v2917_v53  ;;  %v2749_v21 = vmul.f32 %v6842_v45, %v7631_v47  ;;  %v2882_v13 = vmax.f32 %v7720_v20, 0.0  ;;  %v8603_v47 = vld [vmem:[#allocation38_spill] sm:$0xff] }
 0x4cd   : > { %v3498_v39 = vpop.permute.xlu1 %3497  ;;  %v3604_v18 = vmul.f32 %v8572_v29, %v3568_v9  ;;  %v3502_v35 = vpop.permute.xlu0 %3501  ;;  %v2920_v27 = vsel %vm1154_vm2, %v2875_v59, 0.0  ;;  %v3727_v25 = vsel %vm1154_vm2, %v3670_v42, 0.0  ;;  %v2922_v58 = vsel %vm1154_vm2, %v2876_v12, 0.0 }
 0x4ce   : > { %v3537_v52 = vmul.f32 %v3498_v39, %v6842_v45  ;;  %v2921_v28 = vadd.f32 %v2920_v27, %v2919_v44  ;;  %v3728_v48 = vadd.f32 %v3727_v25, %v3726_v56  ;;  %v3729_v50 = vsel %vm1154_vm2, %v3671_v14, 0.0 }
 0x4cf   : > { %v3640_v30 = vadd.f32 %v7459_v62, %v3604_v18  ;;  %v3378_v37 = vadd.f32 %v3346_v32, %v8603_v47  ;;  %v3538_v16 = vmul.f32 %v3502_v35, %v6842_v45  ;;  %v2781_v59 = vadd.f32 %v2749_v21, %v8604_v34 }
 0x4d0   : > { %v3569_v5 = vadd.f32 %v3537_v52, %v3377_v23  ;;  %v2923_v20 = vadd.f32 %v2922_v58, %v2921_v28  ;;  %v3730_v0 = vadd.f32 %v3729_v50, %v3728_v48  ;;  %v2924_v54 = vsel %vm1154_vm2, %v2877_v24, 0.0  ;;  %v8606_v28 = vld [vmem:[#allocation64_spill] sm:$0xff] }
 0x4d1   : > { %v3672_v19 = vmax.f32 %v3640_v30, 0.0  ;;  %v2751_v12 = vmul.f32 %v6842_v45, %v7701_v51  ;;  %v3570_v60 = vadd.f32 %v3538_v16, %v3378_v37  ;;  %v2883_v39 = vmax.f32 %v7726_v17, 0.0  ;;  %v3506_v41 = vpop.permute.xlu0 %3505  ;;  %v8605_v17 = vld [vmem:[#allocation32_spill] sm:$0xff]  ;;  %v8608_v37 = vld [vmem:[#allocation51_spill] sm:$0xff]  ;;  %v8609_v16 = vld [vmem:[#allocation50_spill] sm:$0xff] }
 0x4d2   : > { %v3154_v26 = vpop.permute.xlu1 %3153  ;;  %v3605_v31 = vmul.f32 %v8572_v29, %v3569_v5  ;;  %v2925_v57 = vadd.f32 %v2924_v54, %v2923_v20  ;;  %v2926_v49 = vsel %vm1154_vm2, %v2878_v1, 0.0  ;;  %v2928_v63 = vsel %vm1154_vm2, %v2879_v36, 0.0 }
 0x4d3   : > { %v3731_v38 = vsel %vm1154_vm2, %v3672_v19, 0.0  ;;  %v3606_v24 = vmul.f32 %v8572_v29, %v3570_v60  ;;  %v2817_v51 = vmul.f32 %v8596_v15, %v2781_v59  ;;  %v3187_v7 = vmul.f32 %v3154_v26, %v8602_v2 }
 0x4d4   : > { %v3641_v43 = vadd.f32 %v7459_v62, %v3605_v31  ;;  %v3732_v22 = vadd.f32 %v3731_v38, %v3730_v0  ;;  %v2927_v53 = vadd.f32 %v2926_v49, %v2925_v57  ;;  %v2783_v9 = vadd.f32 %v2751_v12, %v8605_v17 }
 0x4d5   : > { %v2753_v1 = vmul.f32 %v6842_v45, %v7746_v4  ;;  %v3642_v36 = vadd.f32 %v7459_v62, %v3606_v24  ;;  %v3539_v52 = vmul.f32 %v3506_v41, %v6842_v45  ;;  %v2930_v2 = vsel %vm1154_vm2, %v2880_v61, 0.0 }
 0x4d6   : > { %v3673_v56 = vmax.f32 %v3641_v43, 0.0  ;;  %v2929_v23 = vadd.f32 %v2928_v63, %v2927_v53  ;;  %v2755_v4 = vmul.f32 %v6842_v45, %v7784_v10  ;;  %v2932_v26 = vsel %vm1154_vm2, %v2881_v55, 0.0  ;;  %v8607_v55 = vld [vmem:[#allocation99_spill] sm:$0xff] }
 0x4d7   : > { %v3314_v11 = vpop.permute.xlu1 %3313  ;;  %v3674_v18 = vmax.f32 %v3642_v36, 0.0  ;;  %v2853_v27 = vadd.f32 %v7552_v6, %v2817_v51  ;;  %v2819_v5 = vmul.f32 %v8596_v15, %v2783_v9  ;;  %v2785_v58 = vadd.f32 %v2753_v1, %v8606_v28 }
 0x4d8   : > { %v3347_v14 = vmul.f32 %v3314_v11, %v6817_v40  ;;  %v3733_v42 = vsel %vm1154_vm2, %v3673_v56, 0.0  ;;  %v2754_v40 = vmul.f32 %v6842_v45, %v7756_v46  ;;  %v2931_v35 = vadd.f32 %v2930_v2, %v2929_v23 }
 0x4d9   : > { %v3734_v32 = vadd.f32 %v3733_v42, %v3732_v22  ;;  %v3735_v3 = vsel %vm1154_vm2, %v3674_v18, 0.0  ;;  %v2884_v46 = vmax.f32 %v7730_v8, 0.0  ;;  %v2934_v50 = vsel %vm1154_vm2, %v2882_v13, 0.0 }
 0x4da   : > { %v3379_v44 = vadd.f32 %v3347_v14, %v3187_v7  ;;  %v2933_v48 = vadd.f32 %v2932_v26, %v2931_v35  ;;  %v2854_v47 = vadd.f32 %v7552_v6, %v8607_v55  ;;  %v2786_v31 = vadd.f32 %v2754_v40, %v8608_v37 }
 0x4db   : > { %v3736_v30 = vadd.f32 %v3735_v3, %v3734_v32  ;;  %v2787_v20 = vadd.f32 %v2755_v4, %v8609_v16  ;;  %v2936_v59 = vsel %vm1154_vm2, %v2883_v39, 0.0  ;;  %v2885_v0 = vmax.f32 %v2853_v27, 0.0 }
 0x4dc   : > { %v2719_v21 = vpop.permute.xlu1 %2718  ;;  %v3571_v25 = vadd.f32 %v3539_v52, %v3379_v44  ;;  %v2935_v34 = vadd.f32 %v2934_v50, %v2933_v48  ;;  %v2855_v8 = vadd.f32 %v7552_v6, %v2819_v5  ;;  %v2821_v19 = vmul.f32 %v8596_v15, %v2785_v58 }
 0x4dd   : > { %v2756_v61 = vmul.f32 %v6842_v45, %v2719_v21  ;;  %v2856_v13 = vadd.f32 %v7552_v6, %v7735_v33  ;;  %v2938_v60 = vsel %vm1154_vm2, %v2884_v46, 0.0  ;;  %v2886_v11 = vmax.f32 %v2854_v47, 0.0 }
 0x4de   : > { %v3607_v10 = vmul.f32 %v8572_v29, %v3571_v25  ;;  %v8610_v29 = vld [vmem:[#allocation65_spill] sm:$0xff]  ;;  %v2937_v12 = vadd.f32 %v2936_v59, %v2935_v34  ;;  %v2822_v57 = vmul.f32 %v8596_v15, %v2786_v31  ;;  %v2823_v39 = vmul.f32 %v8596_v15, %v2787_v20  ;;  %v8611_v59 = vld [vmem:[#allocation35_spill] sm:$0xff] }
 0x4df   : > { %v2788_v54 = vadd.f32 %v2756_v61, %v8610_v29  ;;  %v2940_v38 = vsel %vm1154_vm2, %v2885_v0, 0.0  ;;  %v2887_v63 = vmax.f32 %v2855_v8, 0.0  ;;  %v2857_v22 = vadd.f32 %v7552_v6, %v2821_v19 }
 0x4e0   : > { %v3643_v45 = vadd.f32 %v7459_v62, %v3607_v10  ;;  %v2939_v62 = vadd.f32 %v2938_v60, %v2937_v12  ;;  %v2888_v41 = vmax.f32 %v2856_v13, 0.0  ;;  %v2942_v53 = vsel %vm1154_vm2, %v2886_v11, 0.0 }
 0x4e1   : > { %v2824_v56 = vmul.f32 %v8596_v15, %v2788_v54  ;;  %v2858_v51 = vadd.f32 %v7552_v6, %v2822_v57  ;;  %v2859_v7 = vadd.f32 %v7552_v6, %v2823_v39  ;;  %v2944_v17 = vsel %vm1154_vm2, %v2887_v63, 0.0 }
 0x4e2   : > { %v3675_v43 = vmax.f32 %v3643_v45, 0.0  ;;  %v2941_v33 = vadd.f32 %v2940_v38, %v2939_v62  ;;  %v2889_v9 = vmax.f32 %v2857_v22, 0.0  ;;  %v2946_v23 = vsel %vm1154_vm2, %v2888_v41, 0.0 }
 0x4e3   : > { %v2860_v1 = vadd.f32 %v7552_v6, %v2824_v56  ;;  %v2890_v15 = vmax.f32 %v2858_v51, 0.0  ;;  %v2891_v32 = vmax.f32 %v2859_v7, 0.0 }
 0x4e4   : > { %v3737_v49 = vsel %vm1154_vm2, %v3675_v43, 0.0  ;;  %v2943_v14 = vadd.f32 %v2942_v53, %v2941_v33  ;;  %v2948_v44 = vsel %vm1154_vm2, %v2889_v9, 0.0 }
 0x4e5   : > { %v3738_v24 = vadd.f32 %v3737_v49, %v3736_v30  ;;  %v2892_v21 = vmax.f32 %v2860_v1, 0.0  ;;  %v2950_v4 = vsel %vm1154_vm2, %v2890_v15, 0.0  ;;  %v2952_v18 = vsel %vm1154_vm2, %v2891_v32, 0.0 }
 0x4e6   : > { %v2945_v42 = vadd.f32 %v2944_v17, %v2943_v14 }
 0x4e7   : > { %v3739_v36 = vrot.slane %v3738_v24, 4  ;;  %v2954_v26 = vsel %vm1154_vm2, %v2892_v21, 0.0 }
 0x4e8   : > { %v2947_v52 = vadd.f32 %v2946_v23, %v2945_v42 }
 0x4e9   : > { %v3740_v40 = vadd.f32 %v3739_v36, %v3738_v24 }
 0x4ea   : > { %v2949_v2 = vadd.f32 %v2948_v44, %v2947_v52 }
 0x4eb   : > { %v3741_v27 = vrot.slane %v3740_v40, 2 }
 0x4ec   : > { %v2951_v35 = vadd.f32 %v2950_v4, %v2949_v2 }
 0x4ed   : > { %v3742_v28 = vadd.f32 %v3741_v27, %v3740_v40 }
 0x4ee   : > { %v2953_v6 = vadd.f32 %v2952_v18, %v2951_v35 }
 0x4ef   : > { %v3743_v61 = vrot.slane %v3742_v28, 1 }
 0x4f0   : > { %v2955_v25 = vadd.f32 %v2954_v26, %v2953_v6 }
 0x4f1   : > { %v3744_v30 = vadd.f32 %v3743_v61, %v3742_v28 }
 0x4f2   : > { %v2956_v5 = vrot.slane %v2955_v25, 4  ;;  %v3749_v37 = vpop.permute.xlu1 %3748 }
 0x4f3   : > { %v3745_v55 = vmul.f32 0.00390625, %v3744_v30 }
 0x4f4   : > { %v2957_v58 = vadd.f32 %v2956_v5, %v2955_v25 }
 0x4f6   : > { %v2958_v3 = vrot.slane %v2957_v58, 2 }
 0x4f8   : > { %v2959_v46 = vadd.f32 %v2958_v3, %v2957_v58 }
 0x4fa   : > { %v2960_v48 = vrot.slane %v2959_v46, 1 }
 0x4fc   : > { %v2961_v10 = vadd.f32 %v2960_v48, %v2959_v46 }
 0x4fe   : > { %v2962_v50 = vmul.f32 0.00390625, %v2961_v10 }
 0x500   : > { %v3746_v47 = vsel %vm2009_vm3, %v2962_v50, %v3745_v55 }
 0x501   : > { %4153 = vmatmul.mubr.msk.f32.vlgmr.msra.gmra.mrb[2].mxu0 %vm1154_vm2, %v3746_v47 }
 0x5d4   : > { %v3820_v31 = vpop.f32.mrb[2].mxu0 }
 0x5d5   : > { %v3821_v16 = vadd.f32 %v3820_v31, %v3749_v37  ;;  %v4154_v20 = vpop.f32.mrb[3].mxu0 }
 0x5d7   : > { %3825 = vrot.lane.b32.xlu0 %v3821_v16, %s4438_s14 }
 0x649   : > { %v3826_v34 = vpop.permute.xlu0 %3825 }
 0x64a   : > { %v3828_v45 = vsel %vm2092_vm4, %v8611_v59, %v3826_v34 }
 0x64b   : > { %3830 = vst.msk [vmem:[%s302_s29] sm:$0x3] %vm3829_vm5, %v3828_v45 }
 0x64c   : > { %4379 = shalt.err (!%p4376_p3)
}
 0x64d   : > { %s4380_s20 = scalar_lea.hbm %s7884_s13, 32  ;;  %s4384_s17 = scalar_lea.hbm %s7934_s6, 64 }
 0x64e   : > { %p4381_p4 = scmp.ne.s32.totalorder %s7884_s13, %s4380_s20  ;;  %p4385_p9 = scmp.lt.u32.totalorder %s7884_s13, %s7934_s6 }
 0x64f   : > { %p4386_p10 = scmp.lt.u32.totalorder %s4384_s17, %s4380_s20  ;;  %p4388_p12 = scmp.lt.u32.totalorder %s4380_s20, %s7884_s13 }
 0x650   : > { %p4382_p7 = pnand %p4381_p4, %p4513_p5 }
 0x651   : > { %p4387_p11 = por %p4386_p10, %p4385_p9 }
 0x652   : > { %p4383_p8 = pneg %p4382_p7 }
 0x653   : > { %p4389_p13 = por %p4388_p12, %p4387_p11 }
 0x655   : > { %p4390_p0 = pnand %p4389_p13, %p4383_p8 }
 0x657   : > { %4393 = shalt.err (!%p4390_p0)
}
 0x658   : > { %4189 = dma.vmem_to_hbm [thread:$0]  (%p4513_p5), %s7886_s10, 32, %s7884_s13, %s3832_s15  }
 0x659 PF: > { %p4195_p1 = scmp.ge.s32.totalorder %s4428_s24, 2  ;;  %s3857_s29 = sand.u32 1, %s4416_s21  }
 0x65a   : > { %s3858_s11 = scalar_lea.sflag [#allocation3], %s3857_s29 }
 0x65b   : > { %p4192_p2 = pnand %p4195_p1, %p4517_p6 }
 0x65d   : > { %4411 = dma.done.wait (!%p4192_p2), %s3858_s11, 32  }
 0x65e   : > { %4413 = vsyncadd (!%p4192_p2), %s3858_s11, 4294967264  ;;  %p16_p3 = scmp.ge.s32.totalorder %s4500_s27, 4   ;;  %s8612_s21 = smov %s4420_s22 }
 0x65f   : > { %s8613_s22 = smov %s4424_s23  ;;  %s8614_s23 = smov %s4511_s30 }
 0x660   : > { %s8615_s24 = smov %s4500_s27  ;;  %18 = sbr.rel (!%p16_p3) target bundleno = 3 (0x3), region = 95 }
 0x667   :  { %3863 = vsyncpa [#allocation3], 1 }
 0x668   :  { %3865 = vsyncpa [#allocation3 + $0x1], 1 }

</bundles_post_ra>
